<compile_context>
chip_gen: v5e
topology: v5e:2x2
jax: 0.10.0
libtpu: 0.0.40
codegen_flags: <defaults>
</compile_context>

<pallas_src>
import functools

import numpy as np
import jax
import jax.numpy as jnp
from jax.experimental import pallas as pl
from jax.experimental.pallas import tpu as pltpu

EPS = 1e-5
_HI = jax.lax.Precision.HIGHEST


# ----------------------------- in-kernel helpers -----------------------------

def _silu(x):
    return x * jax.nn.sigmoid(x)


def _group_reduce(s_c1, cg):
    """(C,1) per-channel sums -> (C,1) per-group sums broadcast back to every channel.

    Channels are grouped contiguously (group of channel c is c // cg), matching
    torch.nn.GroupNorm.
    """
    C = s_c1.shape[0]
    if cg == 1:
        return s_c1
    if cg == 2:
        nxt = pltpu.roll(s_c1, shift=C - 1, axis=0)          # s[(c+1) % C]
        prv = pltpu.roll(s_c1, shift=1, axis=0)              # s[(c-1) % C]
        even = jax.lax.broadcasted_iota(jnp.int32, (C, 1), 0) % 2 == 0
        return s_c1 + jnp.where(even, nxt, prv)
    # General fallback (not exercised by the demo configs): same-group one-hot matrix.
    gi = jax.lax.broadcasted_iota(jnp.int32, (C, C), 0) // cg
    gj = jax.lax.broadcasted_iota(jnp.int32, (C, C), 1) // cg
    gmat = (gi == gj).astype(jnp.float32)
    return jnp.dot(gmat, s_c1, preferred_element_type=jnp.float32)


def _group_norm(x_cs, gamma_c1, beta_c1, cg):
    """GroupNorm over a (C, S) slab (biased variance, eps=1e-5), all in f32 VPU math."""
    _, S = x_cs.shape
    inv_n = 1.0 / float(S * cg)
    s1 = jnp.sum(x_cs, axis=1, keepdims=True)                # (C, 1)
    mean = _group_reduce(s1, cg) * inv_n
    xc = x_cs - mean
    s2 = jnp.sum(xc * xc, axis=1, keepdims=True)             # (C, 1) centered two-pass
    var = _group_reduce(s2, cg) * inv_n
    inv = jax.lax.rsqrt(var + EPS)
    return xc * (inv * gamma_c1) + beta_c1


def _conv3x3(a_cs, w_ref, mask_ref, W, Cout):
    """3x3 / stride 1 / pad 1 conv on a (Cin, S=H*W) slab.

    Each of the 9 taps is a lane roll of the flat (row-major) spatial axis plus a
    host-precomputed border mask, feeding one (Cout,Cin)@(Cin,S) bf16 matmul accumulated
    in f32.  pltpu.roll follows jnp.roll semantics: out[s] = in[(s - shift) % S], so a
    shift of (-delta) % S yields shifted[s] = a[s + delta].
    """
    _, S = a_cs.shape
    acc = jnp.zeros((Cout, S), jnp.float32)
    for dh in range(3):
        for dw in range(3):
            k = 3 * dh + dw
            delta = (dh - 1) * W + (dw - 1)
            xs = a_cs if delta == 0 else pltpu.roll(a_cs, shift=(-delta) % S, axis=1)
            if k != 4:                                       # centre tap needs no mask
                xs = xs * mask_ref[k:k + 1, :]
            acc = acc + jnp.dot(w_ref[k], xs.astype(jnp.bfloat16),
                                preferred_element_type=jnp.float32)
    return acc


# --------------------------------- fused kernel --------------------------------

def resblock_kernel(x_ref, t_ref, vec_ref, mask_ref, w1_ref, tew_ref, w2_ref, *rest,
                    W, Cin, Cout, n_groups, has_shortcut):
    """Whole ResidualBlock forward for one batch element (grid=(B,))."""
    if has_shortcut:
        scw_ref, o_ref = rest
    else:
        (o_ref,) = rest
        scw_ref = None

    x = x_ref[0]                                              # (Cin, S) f32

    # Packed per-channel parameter vectors: one column each.
    gn1_w = vec_ref[0:Cin, 0:1]
    gn1_b = vec_ref[0:Cin, 1:2]
    b1 = vec_ref[0:Cout, 2:3]
    te_b = vec_ref[0:Cout, 3:4]
    gn2_w = vec_ref[0:Cout, 4:5]
    gn2_b = vec_ref[0:Cout, 5:6]
    b2 = vec_ref[0:Cout, 6:7]
    sc_b = vec_ref[0:Cout, 7:8]

    # h = conv1(silu(norm1(x)))
    a1 = _silu(_group_norm(x, gn1_w, gn1_b, Cin // n_groups))
    h = _conv3x3(a1, w1_ref, mask_ref, W, Cout) + b1          # (Cout, S)

    # h += time_emb(silu(t))  (broadcast over all spatial positions)
    te = jnp.dot(tew_ref[...], _silu(t_ref[0]).astype(jnp.bfloat16),
                 preferred_element_type=jnp.float32) + te_b   # (Cout, 1)
    h = h + te

    # h = conv2(dropout(silu(norm2(h))))
    # TODO(synk): nn.Dropout(0.1) is modeled as identity (inference / eval mode).
    a2 = _silu(_group_norm(h, gn2_w, gn2_b, Cout // n_groups))
    y = _conv3x3(a2, w2_ref, mask_ref, W, Cout) + b2          # (Cout, S)

    # out = h + shortcut(x)
    if has_shortcut:
        sc = jnp.dot(scw_ref[...], x.astype(jnp.bfloat16),
                     preferred_element_type=jnp.float32) + sc_b
    else:
        sc = x                                                # nn.Identity
    o_ref[0] = y + sc                                         # (Cout, S) == NCHW slab


# --------------------------------- wrapper -------------------------------------

def _tap_masks(H, W):
    """(9, H*W) f32 validity masks for the 9 conv taps (flat row-major spatial index)."""
    S = H * W
    hh = np.arange(S) // W
    ww = np.arange(S) % W
    m = np.zeros((9, S), np.float32)
    for dh in range(3):
        for dw in range(3):
            oh, ow = dh - 1, dw - 1
            valid = (hh + oh >= 0) & (hh + oh < H) & (ww + ow >= 0) & (ww + ow < W)
            m[3 * dh + dw] = valid.astype(np.float32)
    return jnp.asarray(m)


def residual_block_pallas(x_nchw, t, p, n_groups=16):
    """x_nchw: (B, Cin, H, W); t: (B, Tch).  Returns (B, Cout, H, W) float32."""
    B, Cin, H, W = x_nchw.shape
    Cout = p["conv1_b"].shape[0]
    Tch = t.shape[1]
    S = H * W
    Cmax = max(Cin, Cout)
    has_shortcut = "sc_w" in p

    # NCHW -> (B, C, S): channels on sublanes, spatial on lanes.  Pure reshape (free).
    x_in = x_nchw.astype(jnp.float32).reshape(B, Cin, S)
    t_cols = t.astype(jnp.float32)[:, :, None]                # (B, Tch, 1)

    def col(v):
        v = v.reshape(-1).astype(jnp.float32)
        return jnp.pad(v, (0, Cmax - v.shape[0]))

    vec = jnp.stack(
        [col(p["gn1_w"]), col(p["gn1_b"]), col(p["conv1_b"]), col(p["te_b"]),
         col(p["gn2_w"]), col(p["gn2_b"]), col(p["conv2_b"]),
         col(p["sc_b"]) if has_shortcut else jnp.zeros((Cmax,), jnp.float32)],
        axis=1)                                               # (Cmax, 8)

    masks = _tap_masks(H, W)                                  # (9, S) f32
    w1 = p["conv1_w"].astype(jnp.bfloat16)                    # (9, Cout, Cin)
    w2 = p["conv2_w"].astype(jnp.bfloat16)                    # (9, Cout, Cout)
    tew = p["te_w"].astype(jnp.bfloat16)                      # (Cout, Tch)

    def rep(a):
        return pl.BlockSpec(a.shape, lambda b, _nd=a.ndim: (0,) * _nd)

    inputs = [x_in, t_cols, vec, masks, w1, tew, w2]
    in_specs = [
        pl.BlockSpec((1, Cin, S), lambda b: (b, 0, 0)),
        pl.BlockSpec((1, Tch, 1), lambda b: (b, 0, 0)),
        rep(vec), rep(masks), rep(w1), rep(tew), rep(w2),
    ]
    if has_shortcut:
        scw = p["sc_w"].astype(jnp.bfloat16)                  # (Cout, Cin)
        inputs.append(scw)
        in_specs.append(rep(scw))

    out = pl.pallas_call(
        functools.partial(resblock_kernel, W=W, Cin=Cin, Cout=Cout,
                          n_groups=n_groups, has_shortcut=has_shortcut),
        out_shape=jax.ShapeDtypeStruct((B, Cout, S), jnp.float32),
        grid=(B,),
        in_specs=in_specs,
        out_specs=pl.BlockSpec((1, Cout, S), lambda b: (b, 0, 0)),
        compiler_params=pltpu.CompilerParams(dimension_semantics=("parallel",)),
    )(*inputs)

    return out.reshape(B, Cout, H, W)                         # already NCHW


# ------------------------- deterministic parameter init -----------------------

def init_params(key, Cin, Cout, Tch):
    ks = jax.random.split(key, 12)
    s = 0.1
    p = {
        "gn1_w":   1.0 + s * jax.random.normal(ks[0], (Cin,), jnp.float32),
        "gn1_b":   s * jax.random.normal(ks[1], (Cin,), jnp.float32),
        "conv1_w": s * jax.random.normal(ks[2], (9, Cout, Cin), jnp.float32),
        "conv1_b": s * jax.random.normal(ks[3], (Cout,), jnp.float32),
        "te_w":    s * jax.random.normal(ks[4], (Cout, Tch), jnp.float32),
        "te_b":    s * jax.random.normal(ks[5], (Cout,), jnp.float32),
        "gn2_w":   1.0 + s * jax.random.normal(ks[6], (Cout,), jnp.float32),
        "gn2_b":   s * jax.random.normal(ks[7], (Cout,), jnp.float32),
        "conv2_w": s * jax.random.normal(ks[8], (9, Cout, Cout), jnp.float32),
        "conv2_b": s * jax.random.normal(ks[9], (Cout,), jnp.float32),
    }
    if Cin != Cout:                                           # Conv1x1 shortcut
        p["sc_w"] = s * jax.random.normal(ks[10], (Cout, Cin), jnp.float32)
        p["sc_b"] = s * jax.random.normal(ks[11], (Cout,), jnp.float32)
    return p                                                  # else: Identity shortcut


# ------------------------------ pure-JAX reference ----------------------------

def ref_forward(x_nchw, t, p, n_groups=16):
    x = jnp.transpose(x_nchw, (0, 2, 3, 1)).astype(jnp.float32)   # NHWC

    def gn(a, w, b, G):
        Bn, Hn, Wn, C = a.shape
        ar = a.reshape(Bn, Hn * Wn, G, C // G)
        mean = ar.mean(axis=(1, 3), keepdims=True)
        var = ar.var(axis=(1, 3), keepdims=True)
        ar = (ar - mean) / jnp.sqrt(var + EPS)
        return ar.reshape(Bn, Hn, Wn, C) * w.reshape(1, 1, 1, C) + b.reshape(1, 1, 1, C)

    def silu(a):
        return a * jax.nn.sigmoid(a)

    def conv3(a, w9, bias):
        _, Co, Ci = w9.shape
        w = jnp.transpose(w9.reshape(3, 3, Co, Ci), (0, 1, 3, 2))  # -> HWIO
        y = jax.lax.conv_general_dilated(
            a, w, (1, 1), "SAME",
            dimension_numbers=("NHWC", "HWIO", "NHWC"), precision=_HI)
        return y + bias.reshape(1, 1, 1, -1)

    h = conv3(silu(gn(x, p["gn1_w"], p["gn1_b"], n_groups)), p["conv1_w"], p["conv1_b"])
    te = jnp.dot(silu(t), p["te_w"].T, precision=_HI) + p["te_b"]
    h = h + te[:, None, None, :]
    y = conv3(silu(gn(h, p["gn2_w"], p["gn2_b"], n_groups)), p["conv2_w"], p["conv2_b"])
    if "sc_w" in p:
        sc = jnp.einsum("bhwc,dc->bhwd", x, p["sc_w"], precision=_HI) \
            + p["sc_b"].reshape(1, 1, 1, -1)
    else:
        sc = x
    return jnp.transpose(y + sc, (0, 3, 1, 2))


# ------------------------------------ main -------------------------------------

if __name__ == "__main__":
    key = jax.random.PRNGKey(0)
    B, Tch, H, W, n_groups = 2, 32, 16, 16, 16

    # Two configs: Conv1x1 shortcut (Cin != Cout) and Identity shortcut (Cin == Cout).
    for (Cin, Cout) in ((16, 32), (32, 32)):
        cfg_key = jax.random.fold_in(key, 1000 * Cin + Cout)
        k0, k1, k2 = jax.random.split(cfg_key, 3)
        x = jax.random.normal(k0, (B, Cin, H, W), jnp.float32)   # NCHW (PyTorch layout)
        t = jax.random.normal(k1, (B, Tch), jnp.float32)
        params = init_params(k2, Cin, Cout, Tch)

        out = jax.block_until_ready(residual_block_pallas(x, t, params, n_groups))
        assert out.shape == (B, Cout, H, W) and out.dtype == jnp.float32

        ref = ref_forward(x, t, params, n_groups)
        max_err = float(jnp.max(jnp.abs(out - ref)))
        rel = float(jnp.linalg.norm(out - ref) / jnp.linalg.norm(ref))
        # Conv / shortcut / time-emb matmuls use bf16 operands (f32 accumulation), so allow
        # a small bf16-level deviation from the all-f32 HIGHEST reference.
        if not (max_err < 1e-1 and rel < 2e-2):
            raise AssertionError(
                f"mismatch (Cin={Cin}, Cout={Cout}): max_abs={max_err:.3e} rel_fro={rel:.3e}")

    print("KERNEL_OK")
</pallas_src>

<mosaic_0001>
module attributes {stable_mosaic.version = 11 : i64} {
  func.func @resblock_kernel(%arg0: i32, %arg1: memref<1x16x256xf32, #tpu.memory_space<vmem>>, %arg2: memref<1x32x1xf32, #tpu.memory_space<vmem>>, %arg3: memref<32x8xf32, #tpu.memory_space<vmem>>, %arg4: memref<9x256xf32, #tpu.memory_space<vmem>>, %arg5: memref<9x32x16xbf16, #tpu.memory_space<vmem>>, %arg6: memref<32x32xbf16, #tpu.memory_space<vmem>>, %arg7: memref<9x32x32xbf16, #tpu.memory_space<vmem>>, %arg8: memref<32x16xbf16, #tpu.memory_space<vmem>>, %arg9: memref<1x32x256xf32, #tpu.memory_space<vmem>>) attributes {dimension_semantics = [#tpu.dimension_semantics<parallel>], iteration_bounds = array<i64: 2>, scalar_prefetch = 0 : i64, scratch_operands = 0 : i64, tpu.core_type = #tpu.core_type<tc>, window_params = [{transform_indices = @transform_0, window_bounds = array<i64: 1, 16, 256>}, {transform_indices = @transform_1, window_bounds = array<i64: 1, 32, 1>}, {pipeline_mode = #tpu.pipeline_mode<synchronous>, transform_indices = @transform_2, window_bounds = array<i64: 32, 8>}, {pipeline_mode = #tpu.pipeline_mode<synchronous>, transform_indices = @transform_3, window_bounds = array<i64: 9, 256>}, {pipeline_mode = #tpu.pipeline_mode<synchronous>, transform_indices = @transform_4, window_bounds = array<i64: 9, 32, 16>}, {pipeline_mode = #tpu.pipeline_mode<synchronous>, transform_indices = @transform_5, window_bounds = array<i64: 32, 32>}, {pipeline_mode = #tpu.pipeline_mode<synchronous>, transform_indices = @transform_6, window_bounds = array<i64: 9, 32, 32>}, {pipeline_mode = #tpu.pipeline_mode<synchronous>, transform_indices = @transform_7, window_bounds = array<i64: 32, 16>}, {transform_indices = @transform_8, window_bounds = array<i64: 1, 32, 256>}]} {
    %c0 = arith.constant 0 : index
    %c0_0 = arith.constant 0 : index
    %c0_1 = arith.constant 0 : index
    %0 = vector.load %arg1[%c0, %c0_0, %c0_1] : memref<1x16x256xf32, #tpu.memory_space<vmem>>, vector<1x16x256xf32>
    %1 = vector.shape_cast %0 : vector<1x16x256xf32> to vector<16x256xf32>
    %c0_2 = arith.constant 0 : index
    %c0_3 = arith.constant 0 : index
    %2 = vector.load %arg3[%c0_2, %c0_3] : memref<32x8xf32, #tpu.memory_space<vmem>>, vector<16x1xf32>
    %c0_4 = arith.constant 0 : index
    %c1 = arith.constant 1 : index
    %3 = vector.load %arg3[%c0_4, %c1] : memref<32x8xf32, #tpu.memory_space<vmem>>, vector<16x1xf32>
    %c0_5 = arith.constant 0 : index
    %c2 = arith.constant 2 : index
    %4 = vector.load %arg3[%c0_5, %c2] : memref<32x8xf32, #tpu.memory_space<vmem>>, vector<32x1xf32>
    %c0_6 = arith.constant 0 : index
    %c3 = arith.constant 3 : index
    %5 = vector.load %arg3[%c0_6, %c3] : memref<32x8xf32, #tpu.memory_space<vmem>>, vector<32x1xf32>
    %c0_7 = arith.constant 0 : index
    %c4 = arith.constant 4 : index
    %6 = vector.load %arg3[%c0_7, %c4] : memref<32x8xf32, #tpu.memory_space<vmem>>, vector<32x1xf32>
    %c0_8 = arith.constant 0 : index
    %c5 = arith.constant 5 : index
    %7 = vector.load %arg3[%c0_8, %c5] : memref<32x8xf32, #tpu.memory_space<vmem>>, vector<32x1xf32>
    %c0_9 = arith.constant 0 : index
    %c6 = arith.constant 6 : index
    %8 = vector.load %arg3[%c0_9, %c6] : memref<32x8xf32, #tpu.memory_space<vmem>>, vector<32x1xf32>
    %c0_10 = arith.constant 0 : index
    %c7 = arith.constant 7 : index
    %9 = vector.load %arg3[%c0_10, %c7] : memref<32x8xf32, #tpu.memory_space<vmem>>, vector<32x1xf32>
    %cst = arith.constant dense<0.000000e+00> : vector<16xf32>
    %10 = vector.multi_reduction <add>, %1, %cst [1] : vector<16x256xf32> to vector<16xf32>
    %11 = vector.shape_cast %10 : vector<16xf32> to vector<16x1xf32>
    %cst_11 = arith.constant 3.906250e-03 : f32
    %12 = vector.broadcast %cst_11 : f32 to vector<16x1xf32>
    %13 = arith.mulf %11, %12 : vector<16x1xf32>
    %14 = vector.broadcast %13 : vector<16x1xf32> to vector<16x256xf32>
    %15 = arith.subf %1, %14 : vector<16x256xf32>
    %16 = arith.mulf %15, %15 : vector<16x256xf32>
    %cst_12 = arith.constant dense<0.000000e+00> : vector<16xf32>
    %17 = vector.multi_reduction <add>, %16, %cst_12 [1] : vector<16x256xf32> to vector<16xf32>
    %18 = vector.shape_cast %17 : vector<16xf32> to vector<16x1xf32>
    %cst_13 = arith.constant 3.906250e-03 : f32
    %19 = vector.broadcast %cst_13 : f32 to vector<16x1xf32>
    %20 = arith.mulf %18, %19 : vector<16x1xf32>
    %cst_14 = arith.constant 9.99999974E-6 : f32
    %21 = vector.broadcast %cst_14 : f32 to vector<16x1xf32>
    %22 = arith.addf %20, %21 : vector<16x1xf32>
    %23 = math.rsqrt %22 : vector<16x1xf32>
    %24 = arith.mulf %23, %2 : vector<16x1xf32>
    %25 = vector.broadcast %24 : vector<16x1xf32> to vector<16x256xf32>
    %26 = arith.mulf %15, %25 : vector<16x256xf32>
    %27 = vector.broadcast %3 : vector<16x1xf32> to vector<16x256xf32>
    %28 = arith.addf %26, %27 : vector<16x256xf32>
    %29 = arith.negf %28 : vector<16x256xf32>
    %30 = math.exp %29 : vector<16x256xf32>
    %cst_15 = arith.constant 1.000000e+00 : f32
    %31 = vector.broadcast %cst_15 : f32 to vector<16x256xf32>
    %32 = arith.addf %31, %30 : vector<16x256xf32>
    %33 = arith.divf %31, %32 : vector<16x256xf32>
    %34 = arith.mulf %28, %33 : vector<16x256xf32>
    %cst_16 = arith.constant 0.000000e+00 : f32
    %35 = vector.broadcast %cst_16 : f32 to vector<32x256xf32>
    %c17_i32 = arith.constant 17 : i32
    %36 = tpu.dynamic_rotate %34 by %c17_i32 dim 1 : vector<16x256xf32>, i32 -> vector<16x256xf32>
    %c0_17 = arith.constant 0 : index
    %c0_18 = arith.constant 0 : index
    %37 = vector.load %arg4[%c0_17, %c0_18] : memref<9x256xf32, #tpu.memory_space<vmem>>, vector<1x256xf32>
    %38 = vector.broadcast %37 : vector<1x256xf32> to vector<16x256xf32>
    %39 = arith.mulf %36, %38 : vector<16x256xf32>
    %c0_19 = arith.constant 0 : index
    %c0_20 = arith.constant 0 : index
    %c0_21 = arith.constant 0 : index
    %40 = vector.load %arg5[%c0_19, %c0_20, %c0_21] : memref<9x32x16xbf16, #tpu.memory_space<vmem>>, vector<1x32x16xbf16>
    %41 = vector.shape_cast %40 : vector<1x32x16xbf16> to vector<32x16xbf16>
    %42 = arith.truncf %39 : vector<16x256xf32> to vector<16x256xbf16>
    %cst_22 = arith.constant dense<0.000000e+00> : vector<32x256xf32>
    %43 = tpu.matmul %41, %42, %cst_22 {dimension_numbers = #tpu.dot_dimension_numbers<[1], [0], [0], [1], [0, 0, 1, 1], [], []>} : vector<32x16xbf16>, vector<16x256xbf16>, vector<32x256xf32> -> vector<32x256xf32>
    %44 = arith.addf %35, %43 : vector<32x256xf32>
    %c16_i32 = arith.constant 16 : i32
    %45 = tpu.dynamic_rotate %34 by %c16_i32 dim 1 : vector<16x256xf32>, i32 -> vector<16x256xf32>
    %c1_23 = arith.constant 1 : index
    %c0_24 = arith.constant 0 : index
    %46 = vector.load %arg4[%c1_23, %c0_24] : memref<9x256xf32, #tpu.memory_space<vmem>>, vector<1x256xf32>
    %47 = vector.broadcast %46 : vector<1x256xf32> to vector<16x256xf32>
    %48 = arith.mulf %45, %47 : vector<16x256xf32>
    %c1_25 = arith.constant 1 : index
    %c0_26 = arith.constant 0 : index
    %c0_27 = arith.constant 0 : index
    %49 = vector.load %arg5[%c1_25, %c0_26, %c0_27] : memref<9x32x16xbf16, #tpu.memory_space<vmem>>, vector<1x32x16xbf16>
    %50 = vector.shape_cast %49 : vector<1x32x16xbf16> to vector<32x16xbf16>
    %51 = arith.truncf %48 : vector<16x256xf32> to vector<16x256xbf16>
    %cst_28 = arith.constant dense<0.000000e+00> : vector<32x256xf32>
    %52 = tpu.matmul %50, %51, %cst_28 {dimension_numbers = #tpu.dot_dimension_numbers<[1], [0], [0], [1], [0, 0, 1, 1], [], []>} : vector<32x16xbf16>, vector<16x256xbf16>, vector<32x256xf32> -> vector<32x256xf32>
    %53 = arith.addf %44, %52 : vector<32x256xf32>
    %c15_i32 = arith.constant 15 : i32
    %54 = tpu.dynamic_rotate %34 by %c15_i32 dim 1 : vector<16x256xf32>, i32 -> vector<16x256xf32>
    %c2_29 = arith.constant 2 : index
    %c0_30 = arith.constant 0 : index
    %55 = vector.load %arg4[%c2_29, %c0_30] : memref<9x256xf32, #tpu.memory_space<vmem>>, vector<1x256xf32>
    %56 = vector.broadcast %55 : vector<1x256xf32> to vector<16x256xf32>
    %57 = arith.mulf %54, %56 : vector<16x256xf32>
    %c2_31 = arith.constant 2 : index
    %c0_32 = arith.constant 0 : index
    %c0_33 = arith.constant 0 : index
    %58 = vector.load %arg5[%c2_31, %c0_32, %c0_33] : memref<9x32x16xbf16, #tpu.memory_space<vmem>>, vector<1x32x16xbf16>
    %59 = vector.shape_cast %58 : vector<1x32x16xbf16> to vector<32x16xbf16>
    %60 = arith.truncf %57 : vector<16x256xf32> to vector<16x256xbf16>
    %cst_34 = arith.constant dense<0.000000e+00> : vector<32x256xf32>
    %61 = tpu.matmul %59, %60, %cst_34 {dimension_numbers = #tpu.dot_dimension_numbers<[1], [0], [0], [1], [0, 0, 1, 1], [], []>} : vector<32x16xbf16>, vector<16x256xbf16>, vector<32x256xf32> -> vector<32x256xf32>
    %62 = arith.addf %53, %61 : vector<32x256xf32>
    %c1_i32 = arith.constant 1 : i32
    %63 = tpu.dynamic_rotate %34 by %c1_i32 dim 1 : vector<16x256xf32>, i32 -> vector<16x256xf32>
    %c3_35 = arith.constant 3 : index
    %c0_36 = arith.constant 0 : index
    %64 = vector.load %arg4[%c3_35, %c0_36] : memref<9x256xf32, #tpu.memory_space<vmem>>, vector<1x256xf32>
    %65 = vector.broadcast %64 : vector<1x256xf32> to vector<16x256xf32>
    %66 = arith.mulf %63, %65 : vector<16x256xf32>
    %c3_37 = arith.constant 3 : index
    %c0_38 = arith.constant 0 : index
    %c0_39 = arith.constant 0 : index
    %67 = vector.load %arg5[%c3_37, %c0_38, %c0_39] : memref<9x32x16xbf16, #tpu.memory_space<vmem>>, vector<1x32x16xbf16>
    %68 = vector.shape_cast %67 : vector<1x32x16xbf16> to vector<32x16xbf16>
    %69 = arith.truncf %66 : vector<16x256xf32> to vector<16x256xbf16>
    %cst_40 = arith.constant dense<0.000000e+00> : vector<32x256xf32>
    %70 = tpu.matmul %68, %69, %cst_40 {dimension_numbers = #tpu.dot_dimension_numbers<[1], [0], [0], [1], [0, 0, 1, 1], [], []>} : vector<32x16xbf16>, vector<16x256xbf16>, vector<32x256xf32> -> vector<32x256xf32>
    %71 = arith.addf %62, %70 : vector<32x256xf32>
    %c4_41 = arith.constant 4 : index
    %c0_42 = arith.constant 0 : index
    %c0_43 = arith.constant 0 : index
    %72 = vector.load %arg5[%c4_41, %c0_42, %c0_43] : memref<9x32x16xbf16, #tpu.memory_space<vmem>>, vector<1x32x16xbf16>
    %73 = vector.shape_cast %72 : vector<1x32x16xbf16> to vector<32x16xbf16>
    %74 = arith.truncf %34 : vector<16x256xf32> to vector<16x256xbf16>
    %cst_44 = arith.constant dense<0.000000e+00> : vector<32x256xf32>
    %75 = tpu.matmul %73, %74, %cst_44 {dimension_numbers = #tpu.dot_dimension_numbers<[1], [0], [0], [1], [0, 0, 1, 1], [], []>} : vector<32x16xbf16>, vector<16x256xbf16>, vector<32x256xf32> -> vector<32x256xf32>
    %76 = arith.addf %71, %75 : vector<32x256xf32>
    %c255_i32 = arith.constant 255 : i32
    %77 = tpu.dynamic_rotate %34 by %c255_i32 dim 1 : vector<16x256xf32>, i32 -> vector<16x256xf32>
    %c5_45 = arith.constant 5 : index
    %c0_46 = arith.constant 0 : index
    %78 = vector.load %arg4[%c5_45, %c0_46] : memref<9x256xf32, #tpu.memory_space<vmem>>, vector<1x256xf32>
    %79 = vector.broadcast %78 : vector<1x256xf32> to vector<16x256xf32>
    %80 = arith.mulf %77, %79 : vector<16x256xf32>
    %c5_47 = arith.constant 5 : index
    %c0_48 = arith.constant 0 : index
    %c0_49 = arith.constant 0 : index
    %81 = vector.load %arg5[%c5_47, %c0_48, %c0_49] : memref<9x32x16xbf16, #tpu.memory_space<vmem>>, vector<1x32x16xbf16>
    %82 = vector.shape_cast %81 : vector<1x32x16xbf16> to vector<32x16xbf16>
    %83 = arith.truncf %80 : vector<16x256xf32> to vector<16x256xbf16>
    %cst_50 = arith.constant dense<0.000000e+00> : vector<32x256xf32>
    %84 = tpu.matmul %82, %83, %cst_50 {dimension_numbers = #tpu.dot_dimension_numbers<[1], [0], [0], [1], [0, 0, 1, 1], [], []>} : vector<32x16xbf16>, vector<16x256xbf16>, vector<32x256xf32> -> vector<32x256xf32>
    %85 = arith.addf %76, %84 : vector<32x256xf32>
    %c241_i32 = arith.constant 241 : i32
    %86 = tpu.dynamic_rotate %34 by %c241_i32 dim 1 : vector<16x256xf32>, i32 -> vector<16x256xf32>
    %c6_51 = arith.constant 6 : index
    %c0_52 = arith.constant 0 : index
    %87 = vector.load %arg4[%c6_51, %c0_52] : memref<9x256xf32, #tpu.memory_space<vmem>>, vector<1x256xf32>
    %88 = vector.broadcast %87 : vector<1x256xf32> to vector<16x256xf32>
    %89 = arith.mulf %86, %88 : vector<16x256xf32>
    %c6_53 = arith.constant 6 : index
    %c0_54 = arith.constant 0 : index
    %c0_55 = arith.constant 0 : index
    %90 = vector.load %arg5[%c6_53, %c0_54, %c0_55] : memref<9x32x16xbf16, #tpu.memory_space<vmem>>, vector<1x32x16xbf16>
    %91 = vector.shape_cast %90 : vector<1x32x16xbf16> to vector<32x16xbf16>
    %92 = arith.truncf %89 : vector<16x256xf32> to vector<16x256xbf16>
    %cst_56 = arith.constant dense<0.000000e+00> : vector<32x256xf32>
    %93 = tpu.matmul %91, %92, %cst_56 {dimension_numbers = #tpu.dot_dimension_numbers<[1], [0], [0], [1], [0, 0, 1, 1], [], []>} : vector<32x16xbf16>, vector<16x256xbf16>, vector<32x256xf32> -> vector<32x256xf32>
    %94 = arith.addf %85, %93 : vector<32x256xf32>
    %c240_i32 = arith.constant 240 : i32
    %95 = tpu.dynamic_rotate %34 by %c240_i32 dim 1 : vector<16x256xf32>, i32 -> vector<16x256xf32>
    %c7_57 = arith.constant 7 : index
    %c0_58 = arith.constant 0 : index
    %96 = vector.load %arg4[%c7_57, %c0_58] : memref<9x256xf32, #tpu.memory_space<vmem>>, vector<1x256xf32>
    %97 = vector.broadcast %96 : vector<1x256xf32> to vector<16x256xf32>
    %98 = arith.mulf %95, %97 : vector<16x256xf32>
    %c7_59 = arith.constant 7 : index
    %c0_60 = arith.constant 0 : index
    %c0_61 = arith.constant 0 : index
    %99 = vector.load %arg5[%c7_59, %c0_60, %c0_61] : memref<9x32x16xbf16, #tpu.memory_space<vmem>>, vector<1x32x16xbf16>
    %100 = vector.shape_cast %99 : vector<1x32x16xbf16> to vector<32x16xbf16>
    %101 = arith.truncf %98 : vector<16x256xf32> to vector<16x256xbf16>
    %cst_62 = arith.constant dense<0.000000e+00> : vector<32x256xf32>
    %102 = tpu.matmul %100, %101, %cst_62 {dimension_numbers = #tpu.dot_dimension_numbers<[1], [0], [0], [1], [0, 0, 1, 1], [], []>} : vector<32x16xbf16>, vector<16x256xbf16>, vector<32x256xf32> -> vector<32x256xf32>
    %103 = arith.addf %94, %102 : vector<32x256xf32>
    %c239_i32 = arith.constant 239 : i32
    %104 = tpu.dynamic_rotate %34 by %c239_i32 dim 1 : vector<16x256xf32>, i32 -> vector<16x256xf32>
    %c8 = arith.constant 8 : index
    %c0_63 = arith.constant 0 : index
    %105 = vector.load %arg4[%c8, %c0_63] : memref<9x256xf32, #tpu.memory_space<vmem>>, vector<1x256xf32>
    %106 = vector.broadcast %105 : vector<1x256xf32> to vector<16x256xf32>
    %107 = arith.mulf %104, %106 : vector<16x256xf32>
    %c8_64 = arith.constant 8 : index
    %c0_65 = arith.constant 0 : index
    %c0_66 = arith.constant 0 : index
    %108 = vector.load %arg5[%c8_64, %c0_65, %c0_66] : memref<9x32x16xbf16, #tpu.memory_space<vmem>>, vector<1x32x16xbf16>
    %109 = vector.shape_cast %108 : vector<1x32x16xbf16> to vector<32x16xbf16>
    %110 = arith.truncf %107 : vector<16x256xf32> to vector<16x256xbf16>
    %cst_67 = arith.constant dense<0.000000e+00> : vector<32x256xf32>
    %111 = tpu.matmul %109, %110, %cst_67 {dimension_numbers = #tpu.dot_dimension_numbers<[1], [0], [0], [1], [0, 0, 1, 1], [], []>} : vector<32x16xbf16>, vector<16x256xbf16>, vector<32x256xf32> -> vector<32x256xf32>
    %112 = arith.addf %103, %111 : vector<32x256xf32>
    %113 = vector.broadcast %4 : vector<32x1xf32> to vector<32x256xf32>
    %114 = arith.addf %112, %113 : vector<32x256xf32>
    %c0_68 = arith.constant 0 : index
    %c0_69 = arith.constant 0 : index
    %115 = vector.load %arg6[%c0_68, %c0_69] : memref<32x32xbf16, #tpu.memory_space<vmem>>, vector<32x32xbf16>
    %c0_70 = arith.constant 0 : index
    %c0_71 = arith.constant 0 : index
    %c0_72 = arith.constant 0 : index
    %116 = vector.load %arg2[%c0_70, %c0_71, %c0_72] : memref<1x32x1xf32, #tpu.memory_space<vmem>>, vector<1x32x1xf32>
    %117 = vector.shape_cast %116 : vector<1x32x1xf32> to vector<32x1xf32>
    %118 = arith.negf %117 : vector<32x1xf32>
    %119 = math.exp %118 : vector<32x1xf32>
    %cst_73 = arith.constant 1.000000e+00 : f32
    %120 = vector.broadcast %cst_73 : f32 to vector<32x1xf32>
    %121 = arith.addf %120, %119 : vector<32x1xf32>
    %122 = arith.divf %120, %121 : vector<32x1xf32>
    %123 = arith.mulf %117, %122 : vector<32x1xf32>
    %124 = arith.truncf %123 : vector<32x1xf32> to vector<32x1xbf16>
    %cst_74 = arith.constant dense<0.000000e+00> : vector<32x1xf32>
    %125 = tpu.matmul %115, %124, %cst_74 {dimension_numbers = #tpu.dot_dimension_numbers<[1], [0], [0], [1], [0, 0, 1, 1], [], []>} : vector<32x32xbf16>, vector<32x1xbf16>, vector<32x1xf32> -> vector<32x1xf32>
    %126 = arith.addf %125, %5 : vector<32x1xf32>
    %127 = vector.broadcast %126 : vector<32x1xf32> to vector<32x256xf32>
    %128 = arith.addf %114, %127 : vector<32x256xf32>
    %cst_75 = arith.constant dense<0.000000e+00> : vector<32xf32>
    %129 = vector.multi_reduction <add>, %128, %cst_75 [1] : vector<32x256xf32> to vector<32xf32>
    %130 = vector.shape_cast %129 : vector<32xf32> to vector<32x1xf32>
    %c31_i32 = arith.constant 31 : i32
    %131 = tpu.dynamic_rotate %130 by %c31_i32 dim 0 : vector<32x1xf32>, i32 -> vector<32x1xf32>
    %c1_i32_76 = arith.constant 1 : i32
    %132 = tpu.dynamic_rotate %130 by %c1_i32_76 dim 0 : vector<32x1xf32>, i32 -> vector<32x1xf32>
    %133 = tpu.iota {dimensions = array<i32: 0>} : vector<32x1xi32>
    %c2_i32 = arith.constant 2 : i32
    %c0_i32 = arith.constant 0 : i32
    %134 = arith.cmpi eq, %c2_i32, %c0_i32 : i32
    %c1_i32_77 = arith.constant 1 : i32
    %135 = arith.select %134, %c1_i32_77, %c2_i32 : i32
    %136 = vector.broadcast %135 : i32 to vector<32x1xi32>
    %137 = arith.remsi %133, %136 : vector<32x1xi32>
    %c0_i32_78 = arith.constant 0 : i32
    %138 = vector.broadcast %c0_i32_78 : i32 to vector<32x1xi32>
    %139 = arith.cmpi ne, %137, %138 : vector<32x1xi32>
    %c0_i32_79 = arith.constant 0 : i32
    %140 = vector.broadcast %c0_i32_79 : i32 to vector<32x1xi32>
    %141 = arith.cmpi slt, %137, %140 : vector<32x1xi32>
    %c0_i32_80 = arith.constant 0 : i32
    %142 = arith.cmpi slt, %135, %c0_i32_80 : i32
    %143 = vector.broadcast %142 : i1 to vector<32x1xi1>
    %144 = vector.broadcast %143 : vector<32x1xi1> to vector<32x1xi1>
    %145 = arith.xori %141, %144 : vector<32x1xi1>
    %146 = arith.andi %145, %139 : vector<32x1xi1>
    %147 = vector.broadcast %135 : i32 to vector<32x1xi32>
    %148 = arith.addi %137, %147 : vector<32x1xi32>
    %149 = arith.select %146, %148, %137 : vector<32x1xi1>, vector<32x1xi32>
    %c0_i32_81 = arith.constant 0 : i32
    %150 = vector.broadcast %c0_i32_81 : i32 to vector<32x1xi32>
    %151 = arith.cmpi eq, %149, %150 : vector<32x1xi32>
    %152 = arith.select %151, %131, %132 : vector<32x1xi1>, vector<32x1xf32>
    %153 = arith.addf %130, %152 : vector<32x1xf32>
    %cst_82 = arith.constant 0.001953125 : f32
    %154 = vector.broadcast %cst_82 : f32 to vector<32x1xf32>
    %155 = arith.mulf %153, %154 : vector<32x1xf32>
    %156 = vector.broadcast %155 : vector<32x1xf32> to vector<32x256xf32>
    %157 = arith.subf %128, %156 : vector<32x256xf32>
    %158 = arith.mulf %157, %157 : vector<32x256xf32>
    %cst_83 = arith.constant dense<0.000000e+00> : vector<32xf32>
    %159 = vector.multi_reduction <add>, %158, %cst_83 [1] : vector<32x256xf32> to vector<32xf32>
    %160 = vector.shape_cast %159 : vector<32xf32> to vector<32x1xf32>
    %c31_i32_84 = arith.constant 31 : i32
    %161 = tpu.dynamic_rotate %160 by %c31_i32_84 dim 0 : vector<32x1xf32>, i32 -> vector<32x1xf32>
    %c1_i32_85 = arith.constant 1 : i32
    %162 = tpu.dynamic_rotate %160 by %c1_i32_85 dim 0 : vector<32x1xf32>, i32 -> vector<32x1xf32>
    %163 = tpu.iota {dimensions = array<i32: 0>} : vector<32x1xi32>
    %c2_i32_86 = arith.constant 2 : i32
    %c0_i32_87 = arith.constant 0 : i32
    %164 = arith.cmpi eq, %c2_i32_86, %c0_i32_87 : i32
    %c1_i32_88 = arith.constant 1 : i32
    %165 = arith.select %164, %c1_i32_88, %c2_i32_86 : i32
    %166 = vector.broadcast %165 : i32 to vector<32x1xi32>
    %167 = arith.remsi %163, %166 : vector<32x1xi32>
    %c0_i32_89 = arith.constant 0 : i32
    %168 = vector.broadcast %c0_i32_89 : i32 to vector<32x1xi32>
    %169 = arith.cmpi ne, %167, %168 : vector<32x1xi32>
    %c0_i32_90 = arith.constant 0 : i32
    %170 = vector.broadcast %c0_i32_90 : i32 to vector<32x1xi32>
    %171 = arith.cmpi slt, %167, %170 : vector<32x1xi32>
    %c0_i32_91 = arith.constant 0 : i32
    %172 = arith.cmpi slt, %165, %c0_i32_91 : i32
    %173 = vector.broadcast %172 : i1 to vector<32x1xi1>
    %174 = vector.broadcast %173 : vector<32x1xi1> to vector<32x1xi1>
    %175 = arith.xori %171, %174 : vector<32x1xi1>
    %176 = arith.andi %175, %169 : vector<32x1xi1>
    %177 = vector.broadcast %165 : i32 to vector<32x1xi32>
    %178 = arith.addi %167, %177 : vector<32x1xi32>
    %179 = arith.select %176, %178, %167 : vector<32x1xi1>, vector<32x1xi32>
    %c0_i32_92 = arith.constant 0 : i32
    %180 = vector.broadcast %c0_i32_92 : i32 to vector<32x1xi32>
    %181 = arith.cmpi eq, %179, %180 : vector<32x1xi32>
    %182 = arith.select %181, %161, %162 : vector<32x1xi1>, vector<32x1xf32>
    %183 = arith.addf %160, %182 : vector<32x1xf32>
    %cst_93 = arith.constant 0.001953125 : f32
    %184 = vector.broadcast %cst_93 : f32 to vector<32x1xf32>
    %185 = arith.mulf %183, %184 : vector<32x1xf32>
    %cst_94 = arith.constant 9.99999974E-6 : f32
    %186 = vector.broadcast %cst_94 : f32 to vector<32x1xf32>
    %187 = arith.addf %185, %186 : vector<32x1xf32>
    %188 = math.rsqrt %187 : vector<32x1xf32>
    %189 = arith.mulf %188, %6 : vector<32x1xf32>
    %190 = vector.broadcast %189 : vector<32x1xf32> to vector<32x256xf32>
    %191 = arith.mulf %157, %190 : vector<32x256xf32>
    %192 = vector.broadcast %7 : vector<32x1xf32> to vector<32x256xf32>
    %193 = arith.addf %191, %192 : vector<32x256xf32>
    %194 = arith.negf %193 : vector<32x256xf32>
    %195 = math.exp %194 : vector<32x256xf32>
    %cst_95 = arith.constant 1.000000e+00 : f32
    %196 = vector.broadcast %cst_95 : f32 to vector<32x256xf32>
    %197 = arith.addf %196, %195 : vector<32x256xf32>
    %198 = arith.divf %196, %197 : vector<32x256xf32>
    %199 = arith.mulf %193, %198 : vector<32x256xf32>
    %cst_96 = arith.constant 0.000000e+00 : f32
    %200 = vector.broadcast %cst_96 : f32 to vector<32x256xf32>
    %c17_i32_97 = arith.constant 17 : i32
    %201 = tpu.dynamic_rotate %199 by %c17_i32_97 dim 1 : vector<32x256xf32>, i32 -> vector<32x256xf32>
    %c0_98 = arith.constant 0 : index
    %c0_99 = arith.constant 0 : index
    %202 = vector.load %arg4[%c0_98, %c0_99] : memref<9x256xf32, #tpu.memory_space<vmem>>, vector<1x256xf32>
    %203 = vector.broadcast %202 : vector<1x256xf32> to vector<32x256xf32>
    %204 = arith.mulf %201, %203 : vector<32x256xf32>
    %c0_100 = arith.constant 0 : index
    %c0_101 = arith.constant 0 : index
    %c0_102 = arith.constant 0 : index
    %205 = vector.load %arg7[%c0_100, %c0_101, %c0_102] : memref<9x32x32xbf16, #tpu.memory_space<vmem>>, vector<1x32x32xbf16>
    %206 = vector.shape_cast %205 : vector<1x32x32xbf16> to vector<32x32xbf16>
    %207 = arith.truncf %204 : vector<32x256xf32> to vector<32x256xbf16>
    %cst_103 = arith.constant dense<0.000000e+00> : vector<32x256xf32>
    %208 = tpu.matmul %206, %207, %cst_103 {dimension_numbers = #tpu.dot_dimension_numbers<[1], [0], [0], [1], [0, 0, 1, 1], [], []>} : vector<32x32xbf16>, vector<32x256xbf16>, vector<32x256xf32> -> vector<32x256xf32>
    %209 = arith.addf %200, %208 : vector<32x256xf32>
    %c16_i32_104 = arith.constant 16 : i32
    %210 = tpu.dynamic_rotate %199 by %c16_i32_104 dim 1 : vector<32x256xf32>, i32 -> vector<32x256xf32>
    %c1_105 = arith.constant 1 : index
    %c0_106 = arith.constant 0 : index
    %211 = vector.load %arg4[%c1_105, %c0_106] : memref<9x256xf32, #tpu.memory_space<vmem>>, vector<1x256xf32>
    %212 = vector.broadcast %211 : vector<1x256xf32> to vector<32x256xf32>
    %213 = arith.mulf %210, %212 : vector<32x256xf32>
    %c1_107 = arith.constant 1 : index
    %c0_108 = arith.constant 0 : index
    %c0_109 = arith.constant 0 : index
    %214 = vector.load %arg7[%c1_107, %c0_108, %c0_109] : memref<9x32x32xbf16, #tpu.memory_space<vmem>>, vector<1x32x32xbf16>
    %215 = vector.shape_cast %214 : vector<1x32x32xbf16> to vector<32x32xbf16>
    %216 = arith.truncf %213 : vector<32x256xf32> to vector<32x256xbf16>
    %cst_110 = arith.constant dense<0.000000e+00> : vector<32x256xf32>
    %217 = tpu.matmul %215, %216, %cst_110 {dimension_numbers = #tpu.dot_dimension_numbers<[1], [0], [0], [1], [0, 0, 1, 1], [], []>} : vector<32x32xbf16>, vector<32x256xbf16>, vector<32x256xf32> -> vector<32x256xf32>
    %218 = arith.addf %209, %217 : vector<32x256xf32>
    %c15_i32_111 = arith.constant 15 : i32
    %219 = tpu.dynamic_rotate %199 by %c15_i32_111 dim 1 : vector<32x256xf32>, i32 -> vector<32x256xf32>
    %c2_112 = arith.constant 2 : index
    %c0_113 = arith.constant 0 : index
    %220 = vector.load %arg4[%c2_112, %c0_113] : memref<9x256xf32, #tpu.memory_space<vmem>>, vector<1x256xf32>
    %221 = vector.broadcast %220 : vector<1x256xf32> to vector<32x256xf32>
    %222 = arith.mulf %219, %221 : vector<32x256xf32>
    %c2_114 = arith.constant 2 : index
    %c0_115 = arith.constant 0 : index
    %c0_116 = arith.constant 0 : index
    %223 = vector.load %arg7[%c2_114, %c0_115, %c0_116] : memref<9x32x32xbf16, #tpu.memory_space<vmem>>, vector<1x32x32xbf16>
    %224 = vector.shape_cast %223 : vector<1x32x32xbf16> to vector<32x32xbf16>
    %225 = arith.truncf %222 : vector<32x256xf32> to vector<32x256xbf16>
    %cst_117 = arith.constant dense<0.000000e+00> : vector<32x256xf32>
    %226 = tpu.matmul %224, %225, %cst_117 {dimension_numbers = #tpu.dot_dimension_numbers<[1], [0], [0], [1], [0, 0, 1, 1], [], []>} : vector<32x32xbf16>, vector<32x256xbf16>, vector<32x256xf32> -> vector<32x256xf32>
    %227 = arith.addf %218, %226 : vector<32x256xf32>
    %c1_i32_118 = arith.constant 1 : i32
    %228 = tpu.dynamic_rotate %199 by %c1_i32_118 dim 1 : vector<32x256xf32>, i32 -> vector<32x256xf32>
    %c3_119 = arith.constant 3 : index
    %c0_120 = arith.constant 0 : index
    %229 = vector.load %arg4[%c3_119, %c0_120] : memref<9x256xf32, #tpu.memory_space<vmem>>, vector<1x256xf32>
    %230 = vector.broadcast %229 : vector<1x256xf32> to vector<32x256xf32>
    %231 = arith.mulf %228, %230 : vector<32x256xf32>
    %c3_121 = arith.constant 3 : index
    %c0_122 = arith.constant 0 : index
    %c0_123 = arith.constant 0 : index
    %232 = vector.load %arg7[%c3_121, %c0_122, %c0_123] : memref<9x32x32xbf16, #tpu.memory_space<vmem>>, vector<1x32x32xbf16>
    %233 = vector.shape_cast %232 : vector<1x32x32xbf16> to vector<32x32xbf16>
    %234 = arith.truncf %231 : vector<32x256xf32> to vector<32x256xbf16>
    %cst_124 = arith.constant dense<0.000000e+00> : vector<32x256xf32>
    %235 = tpu.matmul %233, %234, %cst_124 {dimension_numbers = #tpu.dot_dimension_numbers<[1], [0], [0], [1], [0, 0, 1, 1], [], []>} : vector<32x32xbf16>, vector<32x256xbf16>, vector<32x256xf32> -> vector<32x256xf32>
    %236 = arith.addf %227, %235 : vector<32x256xf32>
    %c4_125 = arith.constant 4 : index
    %c0_126 = arith.constant 0 : index
    %c0_127 = arith.constant 0 : index
    %237 = vector.load %arg7[%c4_125, %c0_126, %c0_127] : memref<9x32x32xbf16, #tpu.memory_space<vmem>>, vector<1x32x32xbf16>
    %238 = vector.shape_cast %237 : vector<1x32x32xbf16> to vector<32x32xbf16>
    %239 = arith.truncf %199 : vector<32x256xf32> to vector<32x256xbf16>
    %cst_128 = arith.constant dense<0.000000e+00> : vector<32x256xf32>
    %240 = tpu.matmul %238, %239, %cst_128 {dimension_numbers = #tpu.dot_dimension_numbers<[1], [0], [0], [1], [0, 0, 1, 1], [], []>} : vector<32x32xbf16>, vector<32x256xbf16>, vector<32x256xf32> -> vector<32x256xf32>
    %241 = arith.addf %236, %240 : vector<32x256xf32>
    %c255_i32_129 = arith.constant 255 : i32
    %242 = tpu.dynamic_rotate %199 by %c255_i32_129 dim 1 : vector<32x256xf32>, i32 -> vector<32x256xf32>
    %c5_130 = arith.constant 5 : index
    %c0_131 = arith.constant 0 : index
    %243 = vector.load %arg4[%c5_130, %c0_131] : memref<9x256xf32, #tpu.memory_space<vmem>>, vector<1x256xf32>
    %244 = vector.broadcast %243 : vector<1x256xf32> to vector<32x256xf32>
    %245 = arith.mulf %242, %244 : vector<32x256xf32>
    %c5_132 = arith.constant 5 : index
    %c0_133 = arith.constant 0 : index
    %c0_134 = arith.constant 0 : index
    %246 = vector.load %arg7[%c5_132, %c0_133, %c0_134] : memref<9x32x32xbf16, #tpu.memory_space<vmem>>, vector<1x32x32xbf16>
    %247 = vector.shape_cast %246 : vector<1x32x32xbf16> to vector<32x32xbf16>
    %248 = arith.truncf %245 : vector<32x256xf32> to vector<32x256xbf16>
    %cst_135 = arith.constant dense<0.000000e+00> : vector<32x256xf32>
    %249 = tpu.matmul %247, %248, %cst_135 {dimension_numbers = #tpu.dot_dimension_numbers<[1], [0], [0], [1], [0, 0, 1, 1], [], []>} : vector<32x32xbf16>, vector<32x256xbf16>, vector<32x256xf32> -> vector<32x256xf32>
    %250 = arith.addf %241, %249 : vector<32x256xf32>
    %c241_i32_136 = arith.constant 241 : i32
    %251 = tpu.dynamic_rotate %199 by %c241_i32_136 dim 1 : vector<32x256xf32>, i32 -> vector<32x256xf32>
    %c6_137 = arith.constant 6 : index
    %c0_138 = arith.constant 0 : index
    %252 = vector.load %arg4[%c6_137, %c0_138] : memref<9x256xf32, #tpu.memory_space<vmem>>, vector<1x256xf32>
    %253 = vector.broadcast %252 : vector<1x256xf32> to vector<32x256xf32>
    %254 = arith.mulf %251, %253 : vector<32x256xf32>
    %c6_139 = arith.constant 6 : index
    %c0_140 = arith.constant 0 : index
    %c0_141 = arith.constant 0 : index
    %255 = vector.load %arg7[%c6_139, %c0_140, %c0_141] : memref<9x32x32xbf16, #tpu.memory_space<vmem>>, vector<1x32x32xbf16>
    %256 = vector.shape_cast %255 : vector<1x32x32xbf16> to vector<32x32xbf16>
    %257 = arith.truncf %254 : vector<32x256xf32> to vector<32x256xbf16>
    %cst_142 = arith.constant dense<0.000000e+00> : vector<32x256xf32>
    %258 = tpu.matmul %256, %257, %cst_142 {dimension_numbers = #tpu.dot_dimension_numbers<[1], [0], [0], [1], [0, 0, 1, 1], [], []>} : vector<32x32xbf16>, vector<32x256xbf16>, vector<32x256xf32> -> vector<32x256xf32>
    %259 = arith.addf %250, %258 : vector<32x256xf32>
    %c240_i32_143 = arith.constant 240 : i32
    %260 = tpu.dynamic_rotate %199 by %c240_i32_143 dim 1 : vector<32x256xf32>, i32 -> vector<32x256xf32>
    %c7_144 = arith.constant 7 : index
    %c0_145 = arith.constant 0 : index
    %261 = vector.load %arg4[%c7_144, %c0_145] : memref<9x256xf32, #tpu.memory_space<vmem>>, vector<1x256xf32>
    %262 = vector.broadcast %261 : vector<1x256xf32> to vector<32x256xf32>
    %263 = arith.mulf %260, %262 : vector<32x256xf32>
    %c7_146 = arith.constant 7 : index
    %c0_147 = arith.constant 0 : index
    %c0_148 = arith.constant 0 : index
    %264 = vector.load %arg7[%c7_146, %c0_147, %c0_148] : memref<9x32x32xbf16, #tpu.memory_space<vmem>>, vector<1x32x32xbf16>
    %265 = vector.shape_cast %264 : vector<1x32x32xbf16> to vector<32x32xbf16>
    %266 = arith.truncf %263 : vector<32x256xf32> to vector<32x256xbf16>
    %cst_149 = arith.constant dense<0.000000e+00> : vector<32x256xf32>
    %267 = tpu.matmul %265, %266, %cst_149 {dimension_numbers = #tpu.dot_dimension_numbers<[1], [0], [0], [1], [0, 0, 1, 1], [], []>} : vector<32x32xbf16>, vector<32x256xbf16>, vector<32x256xf32> -> vector<32x256xf32>
    %268 = arith.addf %259, %267 : vector<32x256xf32>
    %c239_i32_150 = arith.constant 239 : i32
    %269 = tpu.dynamic_rotate %199 by %c239_i32_150 dim 1 : vector<32x256xf32>, i32 -> vector<32x256xf32>
    %c8_151 = arith.constant 8 : index
    %c0_152 = arith.constant 0 : index
    %270 = vector.load %arg4[%c8_151, %c0_152] : memref<9x256xf32, #tpu.memory_space<vmem>>, vector<1x256xf32>
    %271 = vector.broadcast %270 : vector<1x256xf32> to vector<32x256xf32>
    %272 = arith.mulf %269, %271 : vector<32x256xf32>
    %c8_153 = arith.constant 8 : index
    %c0_154 = arith.constant 0 : index
    %c0_155 = arith.constant 0 : index
    %273 = vector.load %arg7[%c8_153, %c0_154, %c0_155] : memref<9x32x32xbf16, #tpu.memory_space<vmem>>, vector<1x32x32xbf16>
    %274 = vector.shape_cast %273 : vector<1x32x32xbf16> to vector<32x32xbf16>
    %275 = arith.truncf %272 : vector<32x256xf32> to vector<32x256xbf16>
    %cst_156 = arith.constant dense<0.000000e+00> : vector<32x256xf32>
    %276 = tpu.matmul %274, %275, %cst_156 {dimension_numbers = #tpu.dot_dimension_numbers<[1], [0], [0], [1], [0, 0, 1, 1], [], []>} : vector<32x32xbf16>, vector<32x256xbf16>, vector<32x256xf32> -> vector<32x256xf32>
    %277 = arith.addf %268, %276 : vector<32x256xf32>
    %278 = vector.broadcast %8 : vector<32x1xf32> to vector<32x256xf32>
    %279 = arith.addf %277, %278 : vector<32x256xf32>
    %c0_157 = arith.constant 0 : index
    %c0_158 = arith.constant 0 : index
    %280 = vector.load %arg8[%c0_157, %c0_158] : memref<32x16xbf16, #tpu.memory_space<vmem>>, vector<32x16xbf16>
    %281 = arith.truncf %1 : vector<16x256xf32> to vector<16x256xbf16>
    %cst_159 = arith.constant dense<0.000000e+00> : vector<32x256xf32>
    %282 = tpu.matmul %280, %281, %cst_159 {dimension_numbers = #tpu.dot_dimension_numbers<[1], [0], [0], [1], [0, 0, 1, 1], [], []>} : vector<32x16xbf16>, vector<16x256xbf16>, vector<32x256xf32> -> vector<32x256xf32>
    %283 = vector.broadcast %9 : vector<32x1xf32> to vector<32x256xf32>
    %284 = arith.addf %282, %283 : vector<32x256xf32>
    %285 = arith.addf %279, %284 : vector<32x256xf32>
    %c0_160 = arith.constant 0 : index
    %c0_161 = arith.constant 0 : index
    %c0_162 = arith.constant 0 : index
    %286 = vector.load %arg9[%c0_160, %c0_161, %c0_162] : memref<1x32x256xf32, #tpu.memory_space<vmem>>, vector<1x32x256xf32>
    %287 = vector.shape_cast %286 : vector<1x32x256xf32> to vector<32x256xf32>
    %288 = vector.shape_cast %285 : vector<32x256xf32> to vector<1x32x256xf32>
    tpu.vector_store %arg9[%c0_160, %c0_161, %c0_162], %288 {strides = array<i32>} : memref<1x32x256xf32, #tpu.memory_space<vmem>>, vector<1x32x256xf32>,
    return
  }
  func.func @transform_0(%arg0: i32) -> (i32, i32, i32) {
    %c0_i32 = arith.constant 0 : i32
    %c0_i32_0 = arith.constant 0 : i32
    %c0_i32_1 = arith.constant 0 : i32
    return %arg0, %c0_i32, %c0_i32_0 : i32, i32, i32
  }
  func.func @transform_1(%arg0: i32) -> (i32, i32, i32) {
    %c0_i32 = arith.constant 0 : i32
    %c0_i32_0 = arith.constant 0 : i32
    %c0_i32_1 = arith.constant 0 : i32
    return %arg0, %c0_i32, %c0_i32_0 : i32, i32, i32
  }
  func.func @transform_2(%arg0: i32) -> (i32, i32) {
    %c0_i32 = arith.constant 0 : i32
    %c0_i32_0 = arith.constant 0 : i32
    %c0_i32_1 = arith.constant 0 : i32
    return %c0_i32, %c0_i32_0 : i32, i32
  }
  func.func @transform_3(%arg0: i32) -> (i32, i32) {
    %c0_i32 = arith.constant 0 : i32
    %c0_i32_0 = arith.constant 0 : i32
    %c0_i32_1 = arith.constant 0 : i32
    return %c0_i32, %c0_i32_0 : i32, i32
  }
  func.func @transform_4(%arg0: i32) -> (i32, i32, i32) {
    %c0_i32 = arith.constant 0 : i32
    %c0_i32_0 = arith.constant 0 : i32
    %c0_i32_1 = arith.constant 0 : i32
    %c0_i32_2 = arith.constant 0 : i32
    return %c0_i32, %c0_i32_0, %c0_i32_1 : i32, i32, i32
  }
  func.func @transform_5(%arg0: i32) -> (i32, i32) {
    %c0_i32 = arith.constant 0 : i32
    %c0_i32_0 = arith.constant 0 : i32
    %c0_i32_1 = arith.constant 0 : i32
    return %c0_i32, %c0_i32_0 : i32, i32
  }
  func.func @transform_6(%arg0: i32) -> (i32, i32, i32) {
    %c0_i32 = arith.constant 0 : i32
    %c0_i32_0 = arith.constant 0 : i32
    %c0_i32_1 = arith.constant 0 : i32
    %c0_i32_2 = arith.constant 0 : i32
    return %c0_i32, %c0_i32_0, %c0_i32_1 : i32, i32, i32
  }
  func.func @transform_7(%arg0: i32) -> (i32, i32) {
    %c0_i32 = arith.constant 0 : i32
    %c0_i32_0 = arith.constant 0 : i32
    %c0_i32_1 = arith.constant 0 : i32
    return %c0_i32, %c0_i32_0 : i32, i32
  }
  func.func @transform_8(%arg0: i32) -> (i32, i32, i32) {
    %c0_i32 = arith.constant 0 : i32
    %c0_i32_0 = arith.constant 0 : i32
    %c0_i32_1 = arith.constant 0 : i32
    return %arg0, %c0_i32, %c0_i32_0 : i32, i32, i32
  }
}

</mosaic_0001>

<bundles_post_ra>
// kernel: tpu_custom_call.1
= control target key start
LH: loop header
LB: loop body
LE: loop exit
PB: predicated region body
PF: predicated region fallthrough
CT: control target
= control target key end

     0   :  { %13 = vsyncpa [#allocation3], 0  ;;  %s5115_s0 = inlined_call_operand.vmem [shape: f32[2,16,256], index: 0, kind: input, shape index: {}]   ;;  %s5116_s1 = inlined_call_operand.vmem [shape: f32[2,32,1], index: 1, kind: input, shape index: {}]   ;;  %s5117_s2 = inlined_call_operand.vmem [shape: f32[32,8], index: 2, kind: input, shape index: {}]   ;;  %s5118_s3 = inlined_call_operand.vmem [shape: f32[9,256], index: 3, kind: input, shape index: {}]   ;;  %s5119_s4 = inlined_call_operand.vmem [shape: bf16[9,32,16], index: 4, kind: input, shape index: {}]   ;;  %s5120_s5 = inlined_call_operand.vmem [shape: bf16[32,32], index: 5, kind: input, shape index: {}]   ;;  %s5121_s6 = inlined_call_operand.vmem [shape: bf16[9,32,32], index: 6, kind: input, shape index: {}]   ;;  %s5122_s7 = inlined_call_operand.vmem [shape: bf16[32,16], index: 7, kind: input, shape index: {}]   ;;  %s5123_s8 = inlined_call_operand.hbm [shape: f32[2,32,256], index: 8, kind: output, shape index: {}]  }
   0x1   :  { %15 = vsyncpa [#allocation3 + $0x1], 0  ;;  %s3682_s27 = smov 0   ;;  %s3684_s28 = smov 0  }
   0x2   :  { %s3686_s29 = smov 0   ;;  %s3688_s30 = smov 0  }
   0x3 LB: > { %s3703_s9 = sadd.s32 4294967295, %s3618_s30   ;;  %s3010_s10 = sadd.s32 4294967294, %s3618_s30   ;;  %s3618_s30 = sphi %s3688_s30, %s5236_s30   ;;  %s3614_s29 = sphi %s3686_s29, %s5235_s29   ;;  %s3610_s28 = sphi %s3684_s28, %s5234_s28   ;;  %s3606_s27 = sphi %s3682_s27, %s5233_s27  }
   0x4   : > { %s3707_s11 = sadd.s32 1, %s3618_s30   ;;  %s206_s12 = sadd.s32 1, %s3614_s29 }
   0x5   : > { %s203_s13 = ssub.s32 %s3618_s30, %s3707_s11  ;;  %p216_p0 = scmp.ne.s32.totalorder %s3614_s29, %s3610_s28 }
   0x6   : > { %p204_p1 = scmp.eq.s32.totalorder %s203_s13, 0  ;;  %p217_p2 = scmp.eq.s32.totalorder %s3703_s9, 1 }
   0x7   : > { %p222_p3 = scmp.ne.s32.totalorder %s3610_s28, %s3606_s27  ;;  %p223_p4 = scmp.eq.s32.totalorder %s3010_s10, 1 }
   0x8   : > { %s3718_s14 = scalar_select %p204_p1, %s3614_s29, %s206_s12  }
   0x9   : > { %p3720_p5 = por %p217_p2, %p216_p0  ;;  %p3724_p6 = por %p223_p4, %p222_p3 }
   0xa   : > { %p3013_p7 = scmp.ge.s32.totalorder %s3618_s30, 1  ;;  %p275_p8 = scmp.lt.s32.totalorder %s3618_s30, 3 }
   0xc   : > { %p276_p9 = pnand %p3013_p7, %p275_p8 }
   0xe   : > { %279 = sbr.rel (%p276_p9) target bundleno = 1931 (0x78b), region = 52 }
  0x13   : > { %p314_p10 = scmp.lt.s32.totalorder %s3703_s9, 1  ;;  %v3620_v20 = vmov 1   ;;  %v3749_v21 = vld [vmem:[%s5117_s2] sm:$0xff]  ;;  %v3755_v22 = vld [vmem:[%s5117_s2 + $0x8] sm:$0xff]  ;;  %v5133_v23 = vmov 0   ;;  %s3622_s26 = smov 1  }
  0x14   : > { %3450 = vset.pattern.permute.xlu0 %v3620_v20  ;;  %3451 = vset.pattern.permute.xlu1 %v3620_v20  ;;  %s3623_s10 = smov 17   ;;  %s3624_s12 = smov 16  }
  0x15   : > { %s3732_s17 = scalar_select %p314_p10, %s3703_s9, 1  ;;  %3449 = vset.pattern.permute.xlu2 %v5133_v23 }
  0x16   : > { %s5130_s13 = smov 127   ;;  %s3626_s19 = smov 15  }
  0x17   : > { %s3349_s18 = sshll.u32 %s3732_s17, 5  ;;  %s5126_s20 = smov 112  }
  0x18   : > { %s3740_s21 = scalar_lea.vmem %s5115_s0, %s3349_s18  ;;  %s5128_s22 = smov 113  }
  0x19   : > { %v325_v0 = vld [vmem:[%s3740_s21] sm:$0xff]  ;;  %v326_v1 = vld [vmem:[%s3740_s21 + $0x8] sm:$0xff]  ;;  %v327_v3 = vld [vmem:[%s3740_s21 + $0x10] sm:$0xff]  ;;  %s5124_s23 = smov 111  }
  0x1a   : > { %v333_v2 = vadd.f32 %v326_v1, %v325_v0  ;;  %v328_v4 = vld [vmem:[%s3740_s21 + $0x18] sm:$0xff] }
  0x1b   : > { %v336_v5 = vadd.f32 %v328_v4, %v327_v3 }
  0x1c   : > { %334 = vadd.xlane.f32.xlu0 %v333_v2 }
  0x24   : > { %337 = vadd.xlane.f32.xlu0 %v336_v5 }
  0x38   : > { %397 = vperm.xlu0 %3450, %v3749_v21  }
  0x8f   : > { %v335_v6 = vpop.xlane.xlu0 %334 }
  0x90   : > { %v339_v7 = vmul.f32 0.00390625, %v335_v6 }
  0x92   : > { %v341_v8 = vsub.f32 %v325_v0, %v339_v7  ;;  %v342_v9 = vsub.f32 %v326_v1, %v339_v7 }
  0x94   : > { %v345_v10 = vmul.f32 %v341_v8, %v341_v8  ;;  %v346_v11 = vmul.f32 %v342_v9, %v342_v9 }
  0x96   : > { %v349_v12 = vadd.f32 %v346_v11, %v345_v10 }
  0x97   : > { %v338_v13 = vpop.xlane.xlu0 %337 }
  0x98   : > { %v340_v14 = vmul.f32 0.00390625, %v338_v13  ;;  %350 = vadd.xlane.f32.xlu1 %v349_v12 }
  0x9a   : > { %v343_v15 = vsub.f32 %v327_v3, %v340_v14  ;;  %v344_v16 = vsub.f32 %v328_v4, %v340_v14 }
  0x9c   : > { %v347_v17 = vmul.f32 %v343_v15, %v343_v15  ;;  %v348_v18 = vmul.f32 %v344_v16, %v344_v16 }
  0x9e   : > { %v352_v19 = vadd.f32 %v348_v18, %v347_v17 }
  0xa0   : > { %353 = vadd.xlane.f32.xlu1 %v352_v19 }
  0xaa   : > { %v398_v47 = vpop.permute.xlu0 %397 }
  0xb9   : > { %402 = vperm.xlu1 %3451, %v3755_v22  }
 0x10b   : > { %v351_v24 = vpop.xlane.xlu1 %350 }
 0x10c   : > { %v355_v25 = vmul.f32 0.00390625, %v351_v24 }
 0x10e   : > { %v357_v26 = vadd.f32 1e-05, %v355_v25 }
 0x110   : > { %3470 = vrsqrt.f32 %v357_v26  ;;  %vm365_vm1 = vweird.f32 %v357_v26 }
 0x113   : > { %v354_v27 = vpop.xlane.xlu1 %353 }
 0x114   : > { %v356_v28 = vmul.f32 0.00390625, %v354_v27 }
 0x116   : > { %v3471_v29 = vpop.eup %3470  ;;  %v358_v30 = vadd.f32 1e-05, %v356_v28 }
 0x117   : > { %v360_v31 = vmul.f32 %v3471_v29, %v357_v26  ;;  %vm366_vm0 = vweird.f32 %v3471_v29 }
 0x118   : > { %3472 = vrsqrt.f32 %v358_v30  ;;  %vm367_vm2 = vmor %vm365_vm1, %vm366_vm0  ;;  %vm375_vm4 = vweird.f32 %v358_v30 }
 0x119   : > { %v361_v32 = vmul.f32 %v3471_v29, %v360_v31 }
 0x11b   : > { %v362_v33 = vmul.f32 0.5, %v361_v32 }
 0x11d   : > { %v363_v34 = vsub.f32 1.5, %v362_v33 }
 0x11e   : > { %v3473_v35 = vpop.eup %3472 }
 0x11f   : > { %v370_v36 = vmul.f32 %v3473_v35, %v358_v30  ;;  %v364_v37 = vmul.f32 %v3471_v29, %v363_v34  ;;  %vm376_vm3 = vweird.f32 %v3473_v35 }
 0x120   : > { %vm377_vm5 = vmor %vm375_vm4, %vm376_vm3 }
 0x121   : > { %v371_v38 = vmul.f32 %v3473_v35, %v370_v36  ;;  %v368_v39 = vsel %vm367_vm2, %v3471_v29, %v364_v37 }
 0x122   : > { %v379_v40 = vmul.f32 %v368_v39, %v3749_v21 }
 0x123   : > { %v372_v41 = vmul.f32 0.5, %v371_v38 }
 0x124   : > { %383 = vperm.xlu2 %3449, %v379_v40  }
 0x125   : > { %v373_v42 = vsub.f32 1.5, %v372_v41 }
 0x127   : > { %v374_v43 = vmul.f32 %v3473_v35, %v373_v42 }
 0x129   : > { %v378_v44 = vsel %vm377_vm5, %v3473_v35, %v374_v43 }
 0x12a   : > { %v380_v45 = vmul.f32 %v378_v44, %v3755_v22 }
 0x12b   : > { %v403_v55 = vpop.permute.xlu1 %402 }
 0x12c   : > { %388 = vperm.xlu2 %3449, %v380_v45  }
 0x17e   : > { %v384_v46 = vpop.permute.xlu2 %383 }
 0x17f   : > { %v391_v48 = vmul.f32 %v384_v46, %v341_v8  ;;  %v392_v49 = vmul.f32 %v384_v46, %v342_v9 }
 0x181   : > { %v405_v50 = vadd.f32 %v398_v47, %v391_v48  ;;  %v3761_v51 = vadd.f32 %v398_v47, %v392_v49 }
 0x183   : > { %v3019_v52 = vmul.f32 -1.442695, %v405_v50  ;;  %v3020_v53 = vmul.f32 -1.442695, %v3761_v51 }
 0x185   : > { %3474 = vpow2.f32 %v3019_v52 }
 0x186   : > { %3476 = vpow2.f32 %v3020_v53  ;;  %v389_v54 = vpop.permute.xlu2 %388 }
 0x187   : > { %v393_v56 = vmul.f32 %v389_v54, %v343_v15  ;;  %v394_v57 = vmul.f32 %v389_v54, %v344_v16 }
 0x189   : > { %v3764_v58 = vadd.f32 %v403_v55, %v393_v56  ;;  %v3766_v59 = vadd.f32 %v403_v55, %v394_v57  ;;  %v5135_v56 = vlaneseq }
 0x18b   : > { %v3475_v60 = vpop.eup %3474  ;;  %v3021_v61 = vmul.f32 -1.442695, %v3764_v58  ;;  %v3022_v0 = vmul.f32 -1.442695, %v3766_v59  ;;  %v3852_v57 = vand.u32 127, %v5135_v56 }
 0x18c   : > { %v3477_v62 = vpop.eup %3476  ;;  %v421_v63 = vadd.f32 1.0, %v3475_v60 }
 0x18d   : > { %v422_v1 = vadd.f32 1.0, %v3477_v62  ;;  %3478 = vpow2.f32 %v3021_v61 }
 0x18e   : > { %3480 = vrcp.f32 %v421_v63  ;;  %v434_v11 = vand.u32 2147483647, %v421_v63  ;;  %v436_v12 = vand.u32 2147483648, %v421_v63  ;;  %vm430_vm7 = vweird.f32 %v421_v63 }
 0x18f   : > { %3482 = vrcp.f32 %v422_v1  ;;  %v449_v26 = vand.u32 2147483647, %v422_v1  ;;  %v451_v27 = vand.u32 2147483648, %v422_v1  ;;  %vm445_vm11 = vweird.f32 %v422_v1 }
 0x190   : > { %3484 = vpow2.f32 %v3022_v0  ;;  %vm435_vm9 = vcmp.eq.f32.partialorder %v434_v11, 8.507059e+37  ;;  %v437_v18 = vor.u32 1.1754944e-38, %v436_v12 }
 0x191   : > { %vm450_vm14 = vcmp.eq.f32.partialorder %v449_v26, 8.507059e+37  ;;  %v452_v37 = vor.u32 1.1754944e-38, %v451_v27 }
 0x193   : > { %v3479_v2 = vpop.eup %3478 }
 0x194   : > { %v3481_v3 = vpop.eup %3480  ;;  %v423_v4 = vadd.f32 1.0, %v3479_v2 }
 0x195   : > { %v3483_v5 = vpop.eup %3482  ;;  %v426_v6 = vmul.f32 %v3481_v3, %v421_v63  ;;  %vm431_vm6 = vweird.f32 %v3481_v3 }
 0x196   : > { %v3485_v7 = vpop.eup %3484  ;;  %v441_v8 = vmul.f32 %v3483_v5, %v422_v1  ;;  %3486 = vrcp.f32 %v423_v4  ;;  %vm432_vm8 = vmor %vm430_vm7, %vm431_vm6  ;;  %vm446_vm10 = vweird.f32 %v3483_v5  ;;  %v466_v31 = vand.u32 2147483648, %v423_v4 }
 0x197   : > { %v427_v9 = vsub.f32 1.0, %v426_v6  ;;  %v424_v10 = vadd.f32 1.0, %v3485_v7  ;;  %vm3772_vm12 = vmor %vm445_vm11, %vm446_vm10  ;;  %v464_v36 = vand.u32 2147483647, %v423_v4  ;;  %vm460_vm15 = vweird.f32 %v423_v4 }
 0x198   : > { %v442_v13 = vsub.f32 1.0, %v441_v8  ;;  %v467_v40 = vor.u32 1.1754944e-38, %v466_v31  ;;  %vm499_vm6 = vcmp.lt.s32.totalorder %v3852_v57, 17  ;;  %vm761_vm7 = vcmp.lt.s32.totalorder %v3852_v57, 1 }
 0x199   : > { %v428_v14 = vmul.f32 %v3481_v3, %v427_v9  ;;  %3488 = vrcp.f32 %v424_v10  ;;  %v481_v41 = vand.u32 2147483648, %v424_v10  ;;  %v479_v44 = vand.u32 2147483647, %v424_v10 }
 0x19a   : > { %v443_v15 = vmul.f32 %v3483_v5, %v442_v13  ;;  %vm465_vm2 = vcmp.eq.f32.partialorder %v464_v36, 8.507059e+37  ;;  %vm475_vm3 = vweird.f32 %v424_v10  ;;  %vm923_vm10 = vcmp.lt.s32.totalorder %v3852_v57, 127 }
 0x19b   : > { %v429_v16 = vadd.f32 %v3481_v3, %v428_v14  ;;  %v482_v49 = vor.u32 1.1754944e-38, %v481_v41  ;;  %vm480_vm5 = vcmp.eq.f32.partialorder %v479_v44, 8.507059e+37  ;;  %vm668_vm11 = vcmp.lt.s32.totalorder %v3852_v57, 15 }
 0x19c   : > { %v3487_v17 = vpop.eup %3486  ;;  %v444_v20 = vadd.f32 %v3483_v5, %v443_v15 }
 0x19d   : > { %v433_v19 = vsel %vm432_vm8, %v3481_v3, %v429_v16  ;;  %v456_v24 = vmul.f32 %v3487_v17, %v423_v4  ;;  %vm461_vm13 = vweird.f32 %v3487_v17  ;;  %v3069_v4 = vld [vmem:[%s5118_s3 + $0x3] ss:$8 sm:$0x3]  ;;  %vm5158_vm8 = vcmask 130048  }
 0x19e   : > { %v438_v25 = vsel %vm435_vm9, %v437_v18, %v433_v19  ;;  %v448_v34 = vsel %vm3772_vm12, %v3483_v5, %v444_v20  ;;  %vm462_vm0 = vmor %vm460_vm15, %vm461_vm13  ;;  %v3872_v5 = vld [vmem:[%s5119_s4] sm:$0xff]  ;;  %v3875_v6 = vperm.slane %v3069_v4, 0  ;;  %vm528_vm9 = vcmp.lt.s32.totalorder %v3852_v57, 16  ;;  %v3894_v20 = vld [vmem:[%s5119_s4 + $0x8] sm:$0xff] }
 0x19f   : > { %v3489_v28 = vpop.eup %3488  ;;  %v3770_v29 = vmul.f32 %v438_v25, %v405_v50  ;;  %v457_v30 = vsub.f32 1.0, %v456_v24  ;;  %v453_v42 = vsel %vm450_vm14, %v452_v37, %v448_v34  ;;  %v3913_v32 = vperm.slane %v3069_v4, 1 }
 0x1a0   : > { %v471_v33 = vmul.f32 %v3489_v28, %v424_v10  ;;  %vm476_vm1 = vweird.f32 %v3489_v28  ;;  %v3783_v48 = vmul.f32 %v453_v42, %v3761_v51  ;;  %5165 = vst [vmem:[#allocation5_spill] sm:$0xff] %v3875_v6  ;;  %vm5159_vm12 = vcmp.lt.s32.totalorder %v3852_v57, 112 }
 0x1a1   : > { %v458_v35 = vmul.f32 %v3487_v17, %v457_v30  ;;  %753 = vrot.lane.b32.xlu1 %v3770_v29, %s3622_s26  ;;  %489 = vrot.lane.b32.xlu2 %v3770_v29, %s3623_s10  ;;  %vm477_vm4 = vmor %vm475_vm3, %vm476_vm1  ;;  %5166 = vst [vmem:[#allocation6_spill] sm:$0xff] %v3913_v32  ;;  %vm5160_vm13 = vcmp.lt.s32.totalorder %v3852_v57, 113  ;;  %vm5132_vm14 = vcmp.lt.s32.totalorder %v3852_v57, 111 }
 0x1a2   : > { %v472_v38 = vsub.f32 1.0, %v471_v33 }
 0x1a3   : > { %v459_v39 = vadd.f32 %v3487_v17, %v458_v35 }
 0x1a4   : > { %v473_v43 = vmul.f32 %v3489_v28, %v472_v38 }
 0x1a5   : > { %v463_v45 = vsel %vm462_vm0, %v3487_v17, %v459_v39  ;;  %v3023_v17 = vld [vmem:[%s5118_s3 + $0x1] ss:$8 sm:$0x3] }
 0x1a6   : > { %v468_v46 = vsel %vm465_vm2, %v467_v40, %v463_v45  ;;  %v474_v47 = vadd.f32 %v3489_v28, %v473_v43  ;;  %v3902_v25 = vperm.slane %v3023_v17, 0  ;;  %v3904_v26 = vperm.slane %v3023_v17, 1  ;;  %v3102_v45 = vld [vmem:[%s5118_s3 + $0x5] ss:$8 sm:$0x3] }
 0x1a7   : > { %v3786_v50 = vmul.f32 %v468_v46, %v3764_v58 }
 0x1a8   : > { %v478_v52 = vsel %vm477_vm4, %v3489_v28, %v474_v47 }
 0x1a9   : > { %v483_v53 = vsel %vm480_vm5, %v482_v49, %v478_v52  ;;  %757 = vrot.lane.b32.xlu1 %v3783_v48, %s3622_s26  ;;  %491 = vrot.lane.b32.xlu2 %v3786_v50, %s3623_s10 }
 0x1aa   : > { %v3793_v54 = vmul.f32 %v483_v53, %v3766_v59  ;;  %v504_v59 = vld [vmem:[%s5118_s3] ss:$8 sm:$0x3] }
 0x1ab   : > { %v3858_v60 = vperm.slane %v504_v59, 0  ;;  %v3900_v24 = vperm.slane %v504_v59, 1 }
 0x1ac   : > { %759 = vrot.lane.b32.xlu0 %v3793_v54, %s3622_s26 }
 0x1b1   : > { %522 = vrot.lane.b32.xlu1 %v3786_v50, %s3624_s12  ;;  %493 = vrot.lane.b32.xlu2 %v3783_v48, %s3623_s10 }
 0x1b4   : > { %524 = vrot.lane.b32.xlu0 %v3783_v48, %s3624_s12 }
 0x1b9   : > { %915 = vrot.lane.b32.xlu1 %v3770_v29, %s5130_s13  ;;  %495 = vrot.lane.b32.xlu2 %v3793_v54, %s3623_s10 }
 0x1bc   : > { %917 = vrot.lane.b32.xlu0 %v3786_v50, %s5130_s13 }
 0x1c1   : > { %921 = vrot.lane.b32.xlu1 %v3793_v54, %s5130_s13  ;;  %755 = vrot.lane.b32.xlu2 %v3786_v50, %s3622_s26 }
 0x1c4   : > { %660 = vrot.lane.b32.xlu0 %v3770_v29, %s3626_s19 }
 0x1c9   : > { %664 = vrot.lane.b32.xlu1 %v3783_v48, %s3626_s19  ;;  %520 = vrot.lane.b32.xlu2 %v3770_v29, %s3624_s12 }
 0x1cc   : > { %666 = vrot.lane.b32.xlu0 %v3793_v54, %s3626_s19 }
 0x1d1   : > { %1103 = vrot.lane.b32.xlu1 %v3786_v50, %s5126_s20  ;;  %526 = vrot.lane.b32.xlu2 %v3793_v54, %s3624_s12 }
 0x1d4   : > { %1105 = vrot.lane.b32.xlu0 %v3783_v48, %s5126_s20 }
 0x1d9   : > { %1008 = vrot.lane.b32.xlu1 %v3770_v29, %s5128_s22  ;;  %919 = vrot.lane.b32.xlu2 %v3783_v48, %s5130_s13 }
 0x1dc   : > { %1010 = vrot.lane.b32.xlu0 %v3786_v50, %s5128_s22 }
 0x1e1   : > { %1014 = vrot.lane.b32.xlu1 %v3793_v54, %s5128_s22  ;;  %662 = vrot.lane.b32.xlu2 %v3786_v50, %s3626_s19 }
 0x1e4   : > { %1194 = vrot.lane.b32.xlu0 %v3770_v29, %s5124_s23 }
 0x1e9   : > { %1198 = vrot.lane.b32.xlu1 %v3783_v48, %s5124_s23  ;;  %1101 = vrot.lane.b32.xlu2 %v3770_v29, %s5126_s20 }
 0x1ec   : > { %1200 = vrot.lane.b32.xlu0 %v3793_v54, %s5124_s23 }
 0x1f1   : > { %1107 = vrot.lane.b32.xlu2 %v3793_v54, %s5126_s20  ;;  %s3391_s20 = sshll.u32 %s3703_s9, 6 }
 0x1f9   : > { %1012 = vrot.lane.b32.xlu2 %v3783_v48, %s5128_s22  ;;  %s3630_s22 = smov 125  }
 0x1fa   : > { %1415 = vrot.lane.b32.xlu1 %v3755_v22, %s3630_s22 }
 0x1fb   : > { %v490_v51 = vpop.permute.xlu2 %489 }
 0x201   : > { %1196 = vrot.lane.b32.xlu2 %v3786_v50, %s5124_s23  ;;  %s323_s23 = scalar_lea.vmem %s5116_s1, %s3349_s18 }
 0x203   : > { %v492_v55 = vpop.permute.xlu2 %491 }
 0x209   : > { %1413 = vrot.lane.b32.xlu2 %v3749_v21, %s3630_s22 }
 0x20b   : > { %v494_v58 = vpop.permute.xlu2 %493 }
 0x20c   : > { %v502_v61 = vsel %vm499_vm6, %v494_v58, %v490_v51  ;;  %v500_v30 = vsel %vm499_vm6, %v490_v51, %v494_v58  ;;  %v3353_v51 = vld [vmem:[%s5119_s4 + $0x10] sm:$0xff]  ;;  %v3354_v58 = vld [vmem:[%s5119_s4 + $0x18] sm:$0xff] }
 0x20d   : > { %v510_v1 = vmul.f32 %v3858_v60, %v502_v61  ;;  %v511_v43 = vmul.f32 %v3900_v24, %v500_v30 }
 0x213   : > { %v754_v62 = vpop.permute.xlu1 %753  ;;  %v496_v63 = vpop.permute.xlu2 %495 }
 0x214   : > { %v503_v0 = vsel %vm499_vm6, %v496_v63, %v492_v55  ;;  %v501_v19 = vsel %vm499_vm6, %v492_v55, %v496_v63  ;;  %v3939_v55 = vperm.slane %v3102_v45, 0 }
 0x215   : > { %v512_v2 = vmul.f32 %v3858_v60, %v503_v0  ;;  %v513_v31 = vmul.f32 %v3900_v24, %v501_v19 }
 0x216   : > { %5167 = vst [vmem:[#allocation7_spill] sm:$0xff] %v3939_v55 }
 0x217   : > { %v518_v3 = vpack.c.bf16 %v512_v2, %v510_v1  ;;  %v519_v53 = vpack.c.bf16 %v513_v31, %v511_v43 }
 0x219   : > { %629 = vmatpush.bf16.msra.mxu2 %v518_v3 }
 0x21b   : > { %v758_v7 = vpop.permute.xlu1 %757  ;;  %v756_v8 = vpop.permute.xlu2 %755 }
 0x21c   : > { %v764_v9 = vsel %vm761_vm7, %v758_v7, %v754_v62  ;;  %3048 = vmatmul.msk.bf16.vlgmr.msra.gmra.mxu2 %vm5158_vm8, %v3872_v5  ;;  %v762_v35 = vsel %vm761_vm7, %v754_v62, %v758_v7  ;;  %v3052_v7 = vld [vmem:[%s5118_s3 + $0x2] ss:$8 sm:$0x3] }
 0x21d   : > { %v773_v10 = vmul.f32 %v3875_v6, %v764_v9  ;;  %v774_v49 = vmul.f32 %v3913_v32, %v762_v35  ;;  %v3962_v9 = vperm.slane %v3052_v7, 0 }
 0x21e   : > { %v760_v11 = vpop.permute.xlu0 %759 }
 0x21f   : > { %v765_v12 = vsel %vm761_vm7, %v760_v11, %v756_v8  ;;  %v763_v36 = vsel %vm761_vm7, %v756_v8, %v760_v11  ;;  %v3959_v8 = vld [vmem:[%s5119_s4 + $0x30] sm:$0xff] }
 0x220   : > { %v775_v13 = vmul.f32 %v3875_v6, %v765_v12  ;;  %v776_v52 = vmul.f32 %v3913_v32, %v763_v36 }
 0x222   : > { %v782_v14 = vpack.c.bf16 %v775_v13, %v773_v10  ;;  %v783_v62 = vpack.c.bf16 %v776_v52, %v774_v49  ;;  %v3964_v10 = vperm.slane %v3052_v7, 1 }
 0x223   : > { %v523_v15 = vpop.permute.xlu1 %522  ;;  %v521_v16 = vpop.permute.xlu2 %520 }
 0x224   : > { %807 = vmatpush.bf16.msrb.mxu2 %v782_v14  ;;  %5168 = vst [vmem:[#allocation8_spill] sm:$0xff] %v3964_v10 }
 0x226   : > { %v525_v18 = vpop.permute.xlu0 %524 }
 0x227   : > { %v529_v27 = vsel %vm528_vm9, %v521_v16, %v525_v18  ;;  %v531_v28 = vsel %vm528_vm9, %v525_v18, %v521_v16 }
 0x228   : > { %v540_v39 = vmul.f32 %v3902_v25, %v531_v28  ;;  %v541_v41 = vmul.f32 %v3904_v26, %v529_v27 }
 0x22b   : > { %v916_v33 = vpop.permute.xlu1 %915  ;;  %v527_v34 = vpop.permute.xlu2 %526 }
 0x22c   : > { %v530_v37 = vsel %vm528_vm9, %v523_v15, %v527_v34  ;;  %v532_v38 = vsel %vm528_vm9, %v527_v34, %v523_v15  ;;  %3049 = vmatmul.msk.bf16.gmra.mxu2 %vm5158_vm8, %v3894_v20  ;;  %v3972_v15 = vperm.slane %v3102_v45, 1 }
 0x22d   : > { %v542_v40 = vmul.f32 %v3902_v25, %v532_v38  ;;  %v543_v42 = vmul.f32 %v3904_v26, %v530_v37  ;;  %v851_v38 = vpack.c.bf16 %v3786_v50, %v3770_v29  ;;  %v3136_v29 = vld [vmem:[%s5118_s3 + $0x7] ss:$8 sm:$0x3] }
 0x22e   : > { %v918_v44 = vpop.permute.xlu0 %917  ;;  %5169 = vst [vmem:[#allocation9_spill] sm:$0xff] %v3972_v15 }
 0x22f   : > { %v549_v46 = vpack.c.bf16 %v542_v40, %v540_v39  ;;  %v550_v47 = vpack.c.bf16 %v543_v42, %v541_v41  ;;  %v852_v39 = vpack.c.bf16 %v3793_v54, %v3783_v48  ;;  %v3355_v42 = vld [vmem:[%s5119_s4 + $0x20] sm:$0xff]  ;;  %v4012_v48 = vld [vmem:[%s5119_s4 + $0x38] sm:$0xff]  ;;  %v4014_v54 = vperm.slane %v3136_v29, 0 }
 0x231   : > { %575 = vmatpush.bf16.msra.mxu0 %v549_v46  ;;  %3392 = vmatpush.bf16.msra.mxu3 %v549_v46  ;;  %5170 = vst [vmem:[#allocation10_spill] sm:$0xff] %v4014_v54 }
 0x232   : > { %594 = vmatpush.bf16.msra.mxu1 %v550_v47 }
 0x233   : > { %v922_v59 = vpop.permute.xlu1 %921  ;;  %v920_v61 = vpop.permute.xlu2 %919 }
 0x234   : > { %v925_v63 = vsel %vm923_vm10, %v918_v44, %v922_v59  ;;  %v924_v0 = vsel %vm923_vm10, %v916_v33, %v920_v61  ;;  %3036 = vmatmul.msk.bf16.vlgmr.msra.gmra.mxu0 %vm5158_vm8, %v3353_v51  ;;  %3037 = vmatmul.msk.bf16.vlgmr.msra.gmra.mxu3 %vm5158_vm8, %v3354_v58  ;;  %v927_v16 = vsel %vm923_vm10, %v922_v59, %v918_v44 }
 0x235   : > { %648 = vmatpush.bf16.msrb.mxu3 %v519_v53  ;;  %v937_v1 = vmul.f32 %v3939_v55, %v925_v63  ;;  %v935_v2 = vmul.f32 %v3939_v55, %v924_v0  ;;  %3038 = vmatmul.msk.bf16.vlgmr.msra.gmra.mxu1 %vm5158_vm8, %v3353_v51  ;;  %v926_v17 = vsel %vm923_vm10, %v920_v61, %v916_v33  ;;  %v3119_v53 = vld [vmem:[%s5118_s3 + $0x6] ss:$8 sm:$0x3] }
 0x236   : > { %v661_v3 = vpop.permute.xlu0 %660  ;;  %v938_v35 = vmul.f32 %v3972_v15, %v927_v16  ;;  %v936_v36 = vmul.f32 %v3972_v15, %v926_v17  ;;  %v4033_v59 = vperm.slane %v3119_v53, 1  ;;  %v3356_v63 = vld [vmem:[%s5119_s4 + $0x28] sm:$0xff]  ;;  %v4062_v17 = vld [vmem:[%s5119_s4 + $0x50] sm:$0xff] }
 0x237   : > { %v944_v4 = vpack.c.bf16 %v937_v1, %v935_v2 }
 0x238   : > { %v945_v43 = vpack.c.bf16 %v938_v35, %v936_v36  ;;  %5172 = vst [vmem:[#allocation12_spill] sm:$0xff] %v4033_v59  ;;  %v4078_v35 = vld [vmem:[%s323_s23 + $0x8] sm:$0xff] }
 0x239   : > { %826 = vmatpush.bf16.msra.mxu3 %v783_v62  ;;  %969 = vmatpush.bf16.msra.mxu2 %v944_v4 }
 0x23b   : > { %v665_v11 = vpop.permute.xlu1 %664  ;;  %v663_v12 = vpop.permute.xlu2 %662 }
 0x23c   : > { %v669_v13 = vsel %vm668_vm11, %v661_v3, %v665_v11  ;;  %v671_v14 = vsel %vm668_vm11, %v665_v11, %v661_v3  ;;  %3082 = vmatmul.msk.bf16.vlgmr.msrb.gmra.mxu2 %vm5158_vm8, %v3959_v8 }
 0x23d   : > { %v680_v18 = vmul.f32 %v3962_v9, %v671_v14  ;;  %v681_v19 = vmul.f32 %v3964_v10, %v669_v13 }
 0x23e   : > { %v667_v27 = vpop.permute.xlu0 %666 }
 0x23f   : > { %v670_v28 = vsel %vm668_vm11, %v663_v12, %v667_v27  ;;  %v672_v30 = vsel %vm668_vm11, %v667_v27, %v663_v12 }
 0x240   : > { %v682_v31 = vmul.f32 %v3962_v9, %v672_v30  ;;  %v683_v34 = vmul.f32 %v3964_v10, %v670_v28  ;;  %v3153_v28 = vld [vmem:[%s5118_s3 + $0x10] ss:$8 sm:$0x3] }
 0x242   : > { %v689_v33 = vpack.c.bf16 %v682_v31, %v680_v18  ;;  %v690_v37 = vpack.c.bf16 %v683_v34, %v681_v19  ;;  %v4064_v18 = vld [vmem:[%s323_s23 + $0x10] sm:$0xff]  ;;  %v4066_v19 = vld [vmem:[%s323_s23 + $0x18] sm:$0xff]  ;;  %v4076_v34 = vld [vmem:[%s323_s23] sm:$0xff]  ;;  %s5193_s23 = smov 111  }
 0x243   : > { %v3992_v40 = vpop.permute.xlu1 %1103  ;;  %v3994_v41 = vpop.permute.xlu2 %1101  ;;  %v3172_v27 = vmul.f32 -1.442695, %v4064_v18  ;;  %v3170_v36 = vmul.f32 -1.442695, %v4076_v34 }
 0x244   : > { %714 = vmatpush.bf16.msrb.mxu0 %v689_v33  ;;  %733 = vmatpush.bf16.msrb.mxu1 %v690_v37  ;;  %v3171_v33 = vmul.f32 -1.442695, %v4078_v35 }
 0x245   : > { %3039 = vmatmul.msk.bf16.gmra.mxu1 %vm5158_vm8, %v3354_v58  ;;  %3050 = vmatmul.msk.bf16.vlgmr.msrb.gmra.mxu3 %vm5158_vm8, %v3872_v5  ;;  %v4031_v58 = vperm.slane %v3119_v53, 0  ;;  %3490 = vpow2.f32 %v3172_v27  ;;  %v4104_v53 = vld [vmem:[%s5119_s4 + $0x40] sm:$0xff] }
 0x246   : > { %v4002_v50 = vpop.permute.xlu0 %1105  ;;  %988 = vmatpush.bf16.msrb.mxu3 %v945_v43 }
 0x247   : > { %3065 = vmatmul.msk.bf16.vlgmr.msrb.gmra.mxu0 %vm5158_vm8, %v3355_v42  ;;  %v1110_v44 = vsel %vm5159_vm12, %v3994_v41, %v4002_v50  ;;  %5171 = vst [vmem:[#allocation11_spill] sm:$0xff] %v4031_v58 }
 0x248   : > { %876 = vmatpush.bf16.msra.mxu0 %v851_v38  ;;  %895 = vmatpush.bf16.msra.mxu1 %v852_v39  ;;  %v1121_v47 = vmul.f32 %v4014_v54, %v1110_v44  ;;  %v4085_v38 = vperm.slane %v3153_v28, 0 }
 0x24a   : > { %5173 = vst [vmem:[#allocation13_spill] sm:$0xff] %v4085_v38 }
 0x24b   : > { %v1009_v45 = vpop.permute.xlu1 %1008  ;;  %v1108_v46 = vpop.permute.xlu2 %1107 }
 0x24c   : > { %v1111_v5 = vsel %vm5159_vm12, %v3992_v40, %v1108_v46  ;;  %3083 = vmatmul.msk.bf16.gmra.mxu2 %vm5158_vm8, %v4012_v48  ;;  %v1113_v37 = vsel %vm5159_vm12, %v1108_v46, %v3992_v40 }
 0x24d   : > { %v1123_v49 = vmul.f32 %v4014_v54, %v1111_v5  ;;  %v3491_v5 = vpop.eup %3490 }
 0x24e   : > { %v1011_v52 = vpop.permute.xlu0 %1010 }
 0x24f   : > { %v1130_v51 = vpack.c.bf16 %v1123_v49, %v1121_v47  ;;  %v1335_v49 = vadd.f32 1.0, %v3491_v5 }
 0x251   : > { %1155 = vmatpush.bf16.msrb.mxu2 %v1130_v51  ;;  %vm1372_vm15 = vweird.f32 %v1335_v49 }
 0x253   : > { %v1015_v61 = vpop.permute.xlu1 %1014  ;;  %v1013_v62 = vpop.permute.xlu2 %1012 }
 0x254   : > { %v1018_v0 = vsel %vm5160_vm13, %v1011_v52, %v1015_v61  ;;  %v1020_v1 = vsel %vm5160_vm13, %v1015_v61, %v1011_v52  ;;  %v1017_v2 = vsel %vm5160_vm13, %v1009_v45, %v1013_v62  ;;  %v1019_v3 = vsel %vm5160_vm13, %v1013_v62, %v1009_v45 }
 0x255   : > { %v1030_v4 = vmul.f32 %v4031_v58, %v1018_v0  ;;  %v1031_v7 = vmul.f32 %v4033_v59, %v1020_v1  ;;  %v1028_v11 = vmul.f32 %v4031_v58, %v1017_v2  ;;  %v1029_v12 = vmul.f32 %v4033_v59, %v1019_v3  ;;  %3051 = vmatmul.msk.bf16.gmra.mxu3 %vm5158_vm8, %v3894_v20  ;;  %v4116_v1 = vld [vmem:[%s5119_s4 + $0x58] sm:$0xff] }
 0x256   : > { %v1195_v13 = vpop.permute.xlu0 %1194  ;;  %3067 = vmatmul.msk.bf16.vlgmr.msrb.gmra.mxu1 %vm5158_vm8, %v3355_v42  ;;  %v3173_v20 = vmul.f32 -1.442695, %v4066_v19  ;;  %v4087_v42 = vperm.slane %v3136_v29, 1  ;;  %v1112_v45 = vsel %vm5159_vm12, %v4002_v50, %v3994_v41  ;;  %v4122_v3 = vperm.slane %v3153_v28, 1 }
 0x257   : > { %v1037_v14 = vpack.c.bf16 %v1030_v4, %v1028_v11  ;;  %v1038_v16 = vpack.c.bf16 %v1031_v7, %v1029_v12  ;;  %3066 = vmatmul.msk.bf16.gmra.mxu0 %vm5158_vm8, %v3356_v63  ;;  %v1376_v12 = vand.u32 2147483647, %v1335_v49 }
 0x258   : > { %3492 = vpow2.f32 %v3173_v20  ;;  %5174 = vst [vmem:[#allocation14_spill] sm:$0xff] %v4087_v42  ;;  %v1124_v40 = vmul.f32 %v4087_v42, %v1113_v37  ;;  %v1122_v52 = vmul.f32 %v4087_v42, %v1112_v45 }
 0x259   : > { %1062 = vmatpush.bf16.msrb.mxu0 %v1037_v14  ;;  %1081 = vmatpush.bf16.msrb.mxu1 %v1038_v16  ;;  %3494 = vpow2.f32 %v3170_v36  ;;  %5175 = vst [vmem:[#allocation15_spill] sm:$0xff] %v4122_v3  ;;  %v1378_v14 = vand.u32 2147483648, %v1335_v49  ;;  %vm1377_vm4 = vcmp.eq.f32.partialorder %v1376_v12, 8.507059e+37 }
 0x25a   : > { %3496 = vpow2.f32 %v3171_v33  ;;  %v1131_v50 = vpack.c.bf16 %v1124_v40, %v1122_v52 }
 0x25b   : > { %v1199_v30 = vpop.permute.xlu1 %1198  ;;  %v1197_v31 = vpop.permute.xlu2 %1196  ;;  %3498 = vrcp.f32 %v1335_v49 }
 0x25c   : > { %3115 = vmatmul.msk.bf16.vlgmr.msra.gmra.mxu2 %vm5158_vm8, %v4062_v17  ;;  %v1203_v43 = vsel %vm5132_vm14, %v1195_v13, %v1199_v30  ;;  %v1205_v4 = vsel %vm5132_vm14, %v1199_v30, %v1195_v13 }
 0x25d   : > { %v1214_v29 = vmul.f32 %v4085_v38, %v1203_v43  ;;  %v1215_v13 = vmul.f32 %v4122_v3, %v1205_v4  ;;  %v3369_v43 = vld [vmem:[%s5120_s5] sm:$0xff] }
 0x25e   : > { %v1201_v39 = vpop.permute.xlu0 %1200  ;;  %v3493_v46 = vpop.eup %3492 }
 0x25f   : > { %v1204_v44 = vsel %vm5132_vm14, %v1197_v31, %v1201_v39  ;;  %v1336_v51 = vadd.f32 1.0, %v3493_v46  ;;  %v3495_v41 = vpop.eup %3494  ;;  %v1206_v11 = vsel %vm5132_vm14, %v1201_v39, %v1197_v31 }
 0x260   : > { %v1216_v47 = vmul.f32 %v4085_v38, %v1204_v44  ;;  %v3497_v61 = vpop.eup %3496  ;;  %v4109_v0 = vadd.f32 1.0, %v3495_v41  ;;  %v1217_v30 = vmul.f32 %v4122_v3, %v1206_v11  ;;  %v1379_v44 = vor.u32 1.1754944e-38, %v1378_v14 }
 0x261   : > { %3500 = vrcp.f32 %v1336_v51  ;;  %v4118_v2 = vadd.f32 1.0, %v3497_v61  ;;  %v1393_v20 = vand.u32 2147483648, %v1336_v51  ;;  %vm1387_vm1 = vweird.f32 %v1336_v51 }
 0x262   : > { %v1223_v62 = vpack.c.bf16 %v1216_v47, %v1214_v29  ;;  %3502 = vrcp.f32 %v4109_v0  ;;  %v1391_v33 = vand.u32 2147483647, %v1336_v51  ;;  %v1224_v52 = vpack.c.bf16 %v1217_v30, %v1215_v13 }
 0x263   : > { %3504 = vrcp.f32 %v4118_v2  ;;  %v1394_v46 = vor.u32 1.1754944e-38, %v1393_v20  ;;  %v1363_v11 = vand.u32 2147483648, %v4118_v2  ;;  %v1361_v20 = vand.u32 2147483647, %v4118_v2 }
 0x264   : > { %vm1392_vm14 = vcmp.eq.f32.partialorder %v1391_v33, 8.507059e+37 }
 0x265   : > { %3084 = vmatmul.msk.bf16.vlgmr.msra.gmra.mxu3 %vm5158_vm8, %v3959_v8 }
 0x266   : > { %3068 = vmatmul.msk.bf16.gmra.mxu1 %vm5158_vm8, %v3356_v63  ;;  %1174 = vmatpush.bf16.msra.mxu3 %v1131_v50  ;;  %v3499_v63 = vpop.eup %3498 }
 0x267   : > { %3098 = vmatmul.msk.bf16.vlgmr.msra.gmra.mxu0 %vm5158_vm8, %v4104_v53  ;;  %v3501_v8 = vpop.eup %3500  ;;  %v1368_v7 = vmul.f32 %v3499_v63, %v1335_v49  ;;  %vm1373_vm0 = vweird.f32 %v3499_v63 }
 0x268   : > { %1248 = vmatpush.bf16.msra.mxu0 %v1223_v62  ;;  %v1383_v16 = vmul.f32 %v3501_v8, %v1336_v51  ;;  %v3503_v36 = vpop.eup %3502  ;;  %vm1388_vm2 = vweird.f32 %v3501_v8  ;;  %vm4133_vm3 = vmor %vm1372_vm15, %vm1373_vm0  ;;  %v3360_v51 = vld [vmem:[%s5119_s4 + $0x48] sm:$0xff]  ;;  %vm1342_vm15 = vweird.f32 %v4109_v0 }
 0x269   : > { %v1369_v27 = vsub.f32 1.0, %v1368_v7  ;;  %v1338_v37 = vmul.f32 %v3503_v36, %v4109_v0  ;;  %v3505_v39 = vpop.eup %3504  ;;  %vm4137_vm5 = vmor %vm1387_vm1, %vm1388_vm2  ;;  %v1348_v7 = vand.u32 2147483648, %v4109_v0  ;;  %vm1343_vm0 = vweird.f32 %v3503_v36 }
 0x26a   : > { %v1384_v28 = vsub.f32 1.0, %v1383_v16  ;;  %v1353_v47 = vmul.f32 %v3505_v39, %v4118_v2  ;;  %vm1357_vm1 = vweird.f32 %v4118_v2  ;;  %vm1358_vm2 = vweird.f32 %v3505_v39 }
 0x26b   : > { %v1370_v31 = vmul.f32 %v3499_v63, %v1369_v27  ;;  %v1339_v29 = vsub.f32 1.0, %v1338_v37  ;;  %v1349_v27 = vor.u32 1.1754944e-38, %v1348_v7 }
 0x26c   : > { %3116 = vmatmul.msk.bf16.gmra.mxu2 %vm5158_vm8, %v4116_v1  ;;  %v1385_v45 = vmul.f32 %v3501_v8, %v1384_v28  ;;  %v1354_v61 = vsub.f32 1.0, %v1353_v47  ;;  %v3368_v47 = vld [vmem:[%s5119_s4 + $0x88] sm:$0xff] }
 0x26d   : > { %v1371_v5 = vadd.f32 %v3499_v63, %v1370_v31  ;;  %v1340_v50 = vmul.f32 %v3503_v36, %v1339_v29 }
 0x26e   : > { %v1386_v49 = vadd.f32 %v3501_v8, %v1385_v45  ;;  %v4214_v45 = vld [vmem:[%s5117_s2 + $0x18] sm:$0xff] }
 0x26f   : > { %v1375_v41 = vsel %vm4133_vm3, %v3499_v63, %v1371_v5  ;;  %v1341_v16 = vadd.f32 %v3503_v36, %v1340_v50  ;;  %1419 = vrot.lane.b32.xlu2 %v4214_v45, %s3630_s22 }
 0x270   : > { %v1380_v62 = vsel %vm1377_vm4, %v1379_v44, %v1375_v41  ;;  %v1390_v4 = vsel %vm4137_vm5, %v3501_v8, %v1386_v49  ;;  %v1346_v8 = vand.u32 2147483647, %v4109_v0  ;;  %vm1359_vm4 = vmor %vm1357_vm1, %vm1358_vm2  ;;  %v1364_v0 = vor.u32 1.1754944e-38, %v1363_v11 }
 0x271   : > { %v1395_v12 = vsel %vm1392_vm14, %v1394_v46, %v1390_v4  ;;  %v1399_v14 = vmul.f32 %v1380_v62, %v4064_v18  ;;  %vm1344_vm14 = vmor %vm1342_vm15, %vm1343_vm0  ;;  %v1355_v18 = vmul.f32 %v3505_v39, %v1354_v61  ;;  %vm1362_vm5 = vcmp.eq.f32.partialorder %v1361_v20, 8.507059e+37 }
 0x272   : > { %v1400_v63 = vmul.f32 %v1395_v12, %v4066_v19  ;;  %v1345_v19 = vsel %vm1344_vm14, %v3503_v36, %v1341_v16  ;;  %vm1347_vm3 = vcmp.eq.f32.partialorder %v1346_v8, 8.507059e+37  ;;  %v3363_v36 = vld [vmem:[%s5119_s4 + $0x60] sm:$0xff]  ;;  %vm1425_vm15 = vcmask 261120  }
 0x273   : > { %v1350_v28 = vsel %vm1347_vm3, %v1349_v27, %v1345_v19  ;;  %v1356_v33 = vadd.f32 %v3505_v39, %v1355_v18 }
 0x274   : > { %v1397_v30 = vmul.f32 %v1350_v28, %v4076_v34  ;;  %v3366_v34 = vld [vmem:[%s5119_s4 + $0x78] sm:$0xff] }
 0x275   : > { %3085 = vmatmul.msk.bf16.gmra.mxu3 %vm5158_vm8, %v4012_v48  ;;  %v3365_v48 = vld [vmem:[%s5119_s4 + $0x70] sm:$0xff]  ;;  %v1360_v13 = vsel %vm1359_vm4, %v3505_v39, %v1356_v33  ;;  %v3631_v39 = vmov 2  }
 0x276   : > { %3100 = vmatmul.msk.bf16.vlgmr.msra.gmra.mxu1 %vm5158_vm8, %v4104_v53  ;;  %v1402_v53 = vpack.c.bf16 %v1400_v63, %v1399_v14  ;;  %v1365_v31 = vsel %vm1362_vm5, %v1364_v0, %v1360_v13  ;;  %3452 = vset.pattern.permute.xlu1 %v3631_v39 }
 0x277   : > { %3099 = vmatmul.msk.bf16.gmra.mxu0 %vm5158_vm8, %v3360_v51  ;;  %1267 = vmatpush.bf16.msra.mxu1 %v1224_v52  ;;  %v1398_v2 = vmul.f32 %v1365_v31, %v4078_v35  ;;  %v4182_v35 = vld [vmem:[%s5117_s2 + $0x10] sm:$0xff] }
 0x278   : > { %1438 = vmatpush.bf16.msra.mxu2 %v1402_v53  ;;  %1417 = vrot.lane.b32.xlu0 %v4182_v35, %s3630_s22  ;;  %s3632_s22 = smov 124  }
 0x279   : > { %v1401_v37 = vpack.c.bf16 %v1398_v2, %v1397_v30  ;;  %1288 = vperm.xlu1 %3452, %v3749_v21   ;;  %3453 = vset.pattern.permute.xlu0 %v3631_v39 }
 0x27a   : > { %3454 = vset.pattern.permute.xlu2 %v3631_v39 }
 0x27b   : > { %1297 = vperm.xlu2 %3454, %v4182_v35  }
 0x27c   : > { %3149 = vmatmul.msk.bf16.vlgmr.msrb.gmra.mxu2 %vm5158_vm8, %v3365_v48 }
 0x27d   : > { %1439 = vmatpush.bf16.msra.mxu2 %v1401_v37 }
 0x280   : > { %1292 = vperm.xlu0 %3453, %v3755_v22   ;;  %v3370_v22 = vld [vmem:[%s5120_s5 + $0x8] sm:$0xff] }
 0x281   : > { %1302 = vperm.xlu1 %3452, %v4214_v45  }
 0x283   : > { %3455 = vset.pattern.permute.xlu2 %v5133_v23 }
 0x285   : > { %3117 = vmatmul.msk.bf16.vlgmr.msrb.gmra.mxu3 %vm5158_vm8, %v4062_v17  ;;  %v3364_v17 = vld [vmem:[%s5119_s4 + $0x68] sm:$0xff] }
 0x286   : > { %3101 = vmatmul.msk.bf16.gmra.mxu1 %vm5158_vm8, %v3360_v51 }
 0x287   : > { %3132 = vmatmul.msk.bf16.vlgmr.msrb.gmra.mxu0 %vm5158_vm8, %v3363_v36 }
 0x288   : > { %3457 = vset.pattern.permute.xlu0 %v5133_v23 }
 0x289   : > { %3456 = vset.pattern.permute.xlu1 %v5133_v23 }
 0x28c   : > { %3150 = vmatmul.msk.bf16.gmra.mxu2 %vm5158_vm8, %v3366_v34 }
 0x295   : > { %3118 = vmatmul.msk.bf16.gmra.mxu3 %vm5158_vm8, %v4116_v1  ;;  %v3367_v1 = vld [vmem:[%s5119_s4 + $0x80] sm:$0xff] }
 0x296   : > { %3134 = vmatmul.msk.bf16.vlgmr.msrb.gmra.mxu1 %vm5158_vm8, %v3363_v36 }
 0x297   : > { %3133 = vmatmul.msk.bf16.gmra.mxu0 %vm5158_vm8, %v3364_v17 }
 0x29c   : > { %3182 = vmatmul.msk.bf16.vlgmr.msra.gmra.mxu2 %vm1425_vm15, %v3369_v43 }
 0x29f   : > { %v631_v21 = vpop.f32.mrf.mxu2 }
 0x2a5   : > { %3151 = vmatmul.msk.bf16.vlgmr.msra.gmra.mxu3 %vm5158_vm8, %v3365_v48 }
 0x2a6   : > { %3135 = vmatmul.msk.bf16.gmra.mxu1 %vm5158_vm8, %v3364_v17 }
 0x2a7   : > { %3166 = vmatmul.msk.bf16.vlgmr.msra.gmra.mxu0 %vm5158_vm8, %v3367_v1  ;;  %v4206_v44 = vpop.f32.mrf.mxu2 }
 0x2ac   : > { %3183 = vmatmul.msk.bf16.gmra.mxu2 %vm1425_vm15, %v3370_v22 }
 0x2af   : > { %v636_v5 = vpop.f32.mrf.mxu2 }
 0x2b1   : > { %v577_v40 = vpop.f32.mrf.mxu0 }
 0x2b2   : > { %v632_v46 = vadd.f32 %v631_v21, %v577_v40  ;;  %v596_v29 = vpop.f32.mrf.mxu1 }
 0x2b5   : > { %3152 = vmatmul.msk.bf16.gmra.mxu3 %vm5158_vm8, %v3366_v34 }
 0x2b6   : > { %3168 = vmatmul.msk.bf16.vlgmr.msra.gmra.mxu1 %vm5158_vm8, %v3367_v1 }
 0x2b7   : > { %3167 = vmatmul.msk.bf16.gmra.mxu0 %vm5158_vm8, %v3368_v47  ;;  %v4228_v49 = vpop.f32.mrf.mxu2  ;;  %v582_v52 = vpop.f32.mrf.mxu3 }
 0x2b8   : > { %v637_v51 = vadd.f32 %v636_v5, %v582_v52 }
 0x2b9   : > { %v4230_v41 = vpop.f32.mrf.mxu0 }
 0x2ba   : > { %v4232_v50 = vpop.f32.mrf.mxu1 }
 0x2bf   : > { %v809_v61 = vpop.f32.mrf.mxu2  ;;  %v4235_v62 = vpop.f32.mrf.mxu3 }
 0x2c2   : > { %v601_v4 = vpop.f32.mrf.mxu1 }
 0x2c4   : > { %v716_v7 = vpop.f32.mrf.mxu0 }
 0x2c5   : > { %v745_v11 = vadd.f32 %v716_v7, %v632_v46 }
 0x2c6   : > { %3169 = vmatmul.msk.bf16.gmra.mxu1 %vm5158_vm8, %v3368_v47 }
 0x2c7   : > { %v4238_v12 = vpop.f32.mrf.mxu2  ;;  %v838_v14 = vadd.f32 %v809_v61, %v745_v11 }
 0x2c8   : > { %v650_v16 = vpop.f32.mrf.mxu3 }
 0x2c9   : > { %v651_v63 = vadd.f32 %v650_v16, %v596_v29 }
 0x2ca   : > { %v4240_v8 = vpop.f32.mrf.mxu1 }
 0x2cc   : > { %v4242_v27 = vpop.f32.mrf.mxu0 }
 0x2cf   : > { %v814_v18 = vpop.f32.mrf.mxu2 }
 0x2d0   : > { %v4244_v20 = vpop.f32.mrf.mxu3 }
 0x2d3   : > { %v735_v48 = vpop.f32.mrf.mxu1 }
 0x2d4   : > { %v721_v53 = vpop.f32.mrf.mxu0  ;;  %v4246_v19 = vadd.f32 %v735_v48, %v651_v63 }
 0x2d5   : > { %v749_v0 = vadd.f32 %v721_v53, %v637_v51 }
 0x2d7   : > { %v4248_v28 = vpop.f32.mrf.mxu2  ;;  %v842_v33 = vadd.f32 %v814_v18, %v749_v0 }
 0x2d8   : > { %v655_v13 = vpop.f32.mrf.mxu3 }
 0x2d9   : > { %v656_v30 = vadd.f32 %v655_v13, %v601_v4 }
 0x2db   : > { %v4250_v31 = vpop.f32.mrf.mxu1 }
 0x2dc   : > { %v4252_v2 = vpop.f32.mrf.mxu0 }
 0x2df   : > { %v971_v37 = vpop.f32.mrf.mxu2 }
 0x2e0   : > { %v4254_v36 = vpop.f32.mrf.mxu3 }
 0x2e1   : > { %v658_v10 = vadd.f32 %v4254_v36, %v4240_v8  ;;  %v653_v8 = vadd.f32 %v4244_v20, %v4232_v50 }
 0x2e3   : > { %v740_v34 = vpop.f32.mrf.mxu1  ;;  %v748_v36 = vadd.f32 %v4250_v31, %v653_v8 }
 0x2e4   : > { %v750_v39 = vadd.f32 %v740_v34, %v656_v30  ;;  %v878_v17 = vpop.f32.mrf.mxu0 }
 0x2e5   : > { %v907_v43 = vadd.f32 %v878_v17, %v838_v14 }
 0x2e7   : > { %v4256_v21 = vpop.f32.mrf.mxu2  ;;  %v1000_v1 = vadd.f32 %v971_v37, %v907_v43 }
 0x2e8   : > { %v828_v22 = vpop.f32.mrf.mxu3 }
 0x2eb   : > { %v4258_v5 = vpop.f32.mrf.mxu1 }
 0x2ec   : > { %v4260_v40 = vpop.f32.mrf.mxu0 }
 0x2ef   : > { %v976_v46 = vpop.f32.mrf.mxu2 }
 0x2f0   : > { %v4262_v29 = vpop.f32.mrf.mxu3 }
 0x2f1   : > { %v841_v20 = vadd.f32 %v4262_v29, %v748_v36 }
 0x2f3   : > { %v897_v47 = vpop.f32.mrf.mxu1 }
 0x2f4   : > { %v883_v52 = vpop.f32.mrf.mxu0 }
 0x2f5   : > { %v911_v51 = vadd.f32 %v883_v52, %v842_v33 }
 0x2f7   : > { %v4264_v61 = vpop.f32.mrf.mxu2  ;;  %v1004_v4 = vadd.f32 %v976_v46, %v911_v51  ;;  %v1414_v46 = vpop.permute.xlu2 %1413 }
 0x2f8   : > { %v833_v7 = vpop.f32.mrf.mxu3 }
 0x2f9   : > { %v843_v11 = vadd.f32 %v833_v7, %v750_v39  ;;  %v1416_v7 = vpop.permute.xlu1 %1415 }
 0x2fb   : > { %v4266_v14 = vpop.f32.mrf.mxu1 }
 0x2fc   : > { %v4268_v16 = vpop.f32.mrf.mxu0 }
 0x2ff   : > { %v1157_v63 = vpop.f32.mrf.mxu2 }
 0x301   : > { %v1289_v15 = vpop.permute.xlu1 %1288 }
 0x303   : > { %v902_v18 = vpop.f32.mrf.mxu1 }
 0x304   : > { %v4270_v48 = vadd.f32 %v902_v18, %v843_v11  ;;  %v1064_v53 = vpop.f32.mrf.mxu0 }
 0x305   : > { %v1093_v0 = vadd.f32 %v1064_v53, %v1000_v1  ;;  %v1418_v1 = vpop.permute.xlu0 %1417 }
 0x307   : > { %v4272_v13 = vpop.f32.mrf.mxu2  ;;  %v1186_v30 = vadd.f32 %v1157_v63, %v1093_v0  ;;  %v1420_v0 = vpop.permute.xlu2 %1419 }
 0x30c   : > { %v4274_v37 = vpop.f32.mrf.mxu0 }
 0x30f   : > { %v1162_v33 = vpop.f32.mrf.mxu2  ;;  %v4285_v42 = vpop.permute.xlu2 %1297 }
 0x314   : > { %v1069_v34 = vpop.f32.mrf.mxu0 }
 0x315   : > { %v1097_v17 = vadd.f32 %v1069_v34, %v1004_v4  ;;  %v835_v4 = vpop.f32.mrf.mxu3  ;;  %v904_v34 = vpop.f32.mrf.mxu1 }
 0x317   : > { %v4276_v43 = vpop.f32.mrf.mxu2  ;;  %v4278_v39 = vadd.f32 %v1162_v33, %v1097_v17 }
 0x31d   : > { %v990_v33 = vpop.f32.mrf.mxu3  ;;  %v1083_v17 = vpop.f32.mrf.mxu1 }
 0x31f   : > { %v1441_v52 = vpop.f32.mrf.mxu2 }
 0x320   : > { %v1442_v51 = vadd.f32 %v1441_v52, %v1414_v46 }
 0x322   : > { %1453 = vperm.xlu2 %3455, %v1442_v51  }
 0x325   : > { %v992_v3 = vpop.f32.mrf.mxu3  ;;  %v1085_v38 = vpop.f32.mrf.mxu1 }
 0x327   : > { %v1443_v11 = vpop.f32.mrf.mxu2 }
 0x328   : > { %v1444_v18 = vadd.f32 %v1443_v11, %v1416_v7  ;;  %v1071_v7 = vpop.f32.mrf.mxu0 }
 0x32a   : > { %1458 = vperm.xlu1 %3456, %v1444_v18   ;;  %v839_v18 = vadd.f32 %v828_v22, %v4246_v19  ;;  %v639_v19 = vadd.f32 %v4228_v49, %v4235_v62 }
 0x32d   : > { %v4280_v46 = vpop.f32.mrf.mxu3  ;;  %v4282_v52 = vpop.f32.mrf.mxu1 }
 0x32f   : > { %v1446_v53 = vpop.f32.mrf.mxu2 }
 0x330   : > { %v1447_v63 = vadd.f32 %v1446_v53, %v1418_v1  ;;  %v908_v1 = vadd.f32 %v897_v47, %v839_v18 }
 0x332   : > { %1463 = vperm.xlu0 %3457, %v1447_v63   ;;  %v1250_v63 = vpop.f32.mrf.mxu0 }
 0x333   : > { %v1279_v58 = vadd.f32 %v1250_v63, %v1186_v30 }
 0x335   : > { %v997_v51 = vpop.f32.mrf.mxu3  ;;  %v1090_v11 = vpop.f32.mrf.mxu1  ;;  %v1305_v22 = vadd.f32 %v1289_v15, %v1279_v58 }
 0x337   : > { %v1448_v23 = vpop.f32.mrf.mxu2 }
 0x338   : > { %v1449_v56 = vadd.f32 %v1448_v23, %v1420_v0  ;;  %v1001_v0 = vadd.f32 %v990_v33, %v908_v1  ;;  %v751_v33 = vadd.f32 %v4252_v2, %v639_v19 }
 0x33a   : > { %1468 = vperm.xlu2 %3455, %v1449_v56   ;;  %v1094_v56 = vadd.f32 %v1083_v17, %v1001_v0  ;;  %v1252_v32 = vpop.f32.mrf.mxu0  ;;  %v752_v17 = vadd.f32 %v4258_v5, %v658_v10  ;;  %v844_v49 = vadd.f32 %v4248_v28, %v751_v33  ;;  %v634_v10 = vadd.f32 %v4206_v44, %v4230_v41 }
 0x33c   : > { %v845_v58 = vadd.f32 %v835_v4, %v752_v17  ;;  %v913_v62 = vadd.f32 %v4268_v16, %v844_v49  ;;  %v747_v2 = vadd.f32 %v4242_v27, %v634_v10  ;;  %v910_v16 = vadd.f32 %v4266_v14, %v841_v20 }
 0x33d   : > { %v1176_v53 = vpop.f32.mrf.mxu3  ;;  %v1269_v23 = vpop.f32.mrf.mxu1 }
 0x33e   : > { %v1187_v54 = vadd.f32 %v1176_v53, %v1094_v56  ;;  %v914_v5 = vadd.f32 %v904_v34, %v845_v58  ;;  %v1006_v63 = vadd.f32 %v4264_v61, %v913_v62  ;;  %v840_v50 = vadd.f32 %v4238_v12, %v747_v2  ;;  %v1303_v12 = vpop.permute.xlu1 %1302 }
 0x340   : > { %v1280_v55 = vadd.f32 %v1269_v23, %v1187_v54  ;;  %v1099_v28 = vadd.f32 %v1071_v7, %v1006_v63  ;;  %v1007_v4 = vadd.f32 %v997_v51, %v914_v5  ;;  %v909_v0 = vadd.f32 %v4260_v40, %v840_v50 }
 0x341   : > { %v1003_v7 = vadd.f32 %v992_v3, %v910_v16  ;;  %v1293_v3 = vpop.permute.xlu0 %1292 }
 0x342   : > { %v1306_v47 = vadd.f32 %v1289_v15, %v1280_v55  ;;  %v1255_v55 = vpop.f32.mrf.mxu0  ;;  %v1100_v56 = vadd.f32 %v1090_v11, %v1007_v4  ;;  %v1192_v27 = vadd.f32 %v4276_v43, %v1099_v28  ;;  %v1002_v34 = vadd.f32 %v4256_v21, %v909_v0 }
 0x343   : > { %v1096_v51 = vadd.f32 %v1085_v38, %v1003_v7  ;;  %v1005_v21 = vadd.f32 %v4280_v46, %v4270_v48  ;;  %v1283_v10 = vadd.f32 %v1255_v55, %v4278_v39  ;;  %v5180_v39 = vlaneseq }
 0x344   : > { %v1095_v29 = vadd.f32 %v4274_v37, %v1002_v34 }
 0x345   : > { %v1178_v59 = vpop.f32.mrf.mxu3  ;;  %v1271_v6 = vpop.f32.mrf.mxu1  ;;  %v1098_v38 = vadd.f32 %v4282_v52, %v1005_v21  ;;  %v4341_v55 = vshrl.u32 %v5180_v39, 7 }
 0x346   : > { %v1188_v11 = vadd.f32 %v4272_v13, %v1095_v29 }
 0x347   : > { %v1518_v5 = vand.u32 1, %v4341_v55  ;;  %vm1506_vm0 = vcmp.lt.s32.totalorder %v4341_v55, 1  ;;  %v1512_v28 = vadd.s32 16, %v4341_v55  ;;  %v1513_v0 = vadd.s32 24, %v4341_v55 }
 0x348   : > { %v1281_v43 = vadd.f32 %v1252_v32, %v1188_v11  ;;  %v1309_v32 = vadd.f32 %v4285_v42, %v1283_v10  ;;  %vm1497_vm1 = vcmp.lt.s32.totalorder %v4341_v55, 7 }
 0x349   : > { %vm4346_vm14 = vcmp.eq.s32.totalorder %v1518_v5, 0  ;;  %v1532_v16 = vand.u32 1, %v1512_v28  ;;  %v1539_v34 = vand.u32 1, %v1513_v0 }
 0x34a   : > { %v1257_v44 = vpop.f32.mrf.mxu0 }
 0x34b   : > { %v1285_v61 = vadd.f32 %v1257_v44, %v1192_v27  ;;  %vm4359_vm2 = vcmp.eq.s32.totalorder %v1532_v16, 0  ;;  %vm4363_vm3 = vcmp.eq.s32.totalorder %v1539_v34, 0  ;;  %v5189_v34 = vmov 0  }
 0x34d   : > { %v1181_v53 = vpop.f32.mrf.mxu3  ;;  %v1274_v15 = vpop.f32.mrf.mxu1 }
 0x355   : > { %v1183_v23 = vpop.f32.mrf.mxu3  ;;  %v1276_v41 = vpop.f32.mrf.mxu1 }
 0x356   : > { %v1193_v31 = vadd.f32 %v1183_v23, %v1100_v56  ;;  %v1511_v56 = vadd.s32 8, %v4341_v55 }
 0x358   : > { %v1286_v19 = vadd.f32 %v1276_v41, %v1193_v31 }
 0x37c   : > { %v1454_v18 = vpop.permute.xlu2 %1453 }
 0x37d   : > { %v4293_v1 = vadd.f32 %v1454_v18, %v1305_v22  ;;  %v4295_v30 = vadd.f32 %v1454_v18, %v1306_v47  ;;  %v1311_v22 = vadd.f32 %v1303_v12, %v1285_v61  ;;  %v1312_v47 = vadd.f32 %v1303_v12, %v1286_v19 }
 0x37e   : > { %v1189_v18 = vadd.f32 %v1178_v59, %v1096_v51  ;;  %v1191_v59 = vadd.f32 %v1181_v53, %v1098_v38  ;;  %v1525_v61 = vand.u32 1, %v1511_v56 }
 0x37f   : > { %v1479_v54 = vadd.f32 %v4295_v30, %v4293_v1 }
 0x380   : > { %v1282_v17 = vadd.f32 %v1271_v6, %v1189_v18  ;;  %v1284_v48 = vadd.f32 %v1274_v15, %v1191_v59  ;;  %vm4367_vm4 = vcmp.eq.s32.totalorder %v1525_v61, 0 }
 0x381   : > { %1480 = vadd.xlane.f32.xlu1 %v1479_v54  ;;  %v1307_v54 = vadd.f32 %v1293_v3, %v1281_v43 }
 0x382   : > { %v1308_v8 = vadd.f32 %v1293_v3, %v1282_v17  ;;  %v1310_v46 = vadd.f32 %v4285_v42, %v1284_v48 }
 0x394   : > { %v1469_v40 = vpop.permute.xlu2 %1468 }
 0x395   : > { %v4316_v33 = vadd.f32 %v1469_v40, %v1311_v22  ;;  %v4318_v14 = vadd.f32 %v1469_v40, %v1312_v47 }
 0x397   : > { %v1488_v37 = vadd.f32 %v4318_v14, %v4316_v33 }
 0x399   : > { %1489 = vadd.xlane.f32.xlu1 %v1488_v37 }
 0x39c   : > { %v1459_v13 = vpop.permute.xlu1 %1458 }
 0x39d   : > { %v4325_v49 = vadd.f32 %v1459_v13, %v1307_v54  ;;  %v4327_v58 = vadd.f32 %v1459_v13, %v1308_v8 }
 0x39f   : > { %v1482_v6 = vadd.f32 %v4327_v58, %v4325_v49 }
 0x3a1   : > { %1483 = vadd.xlane.f32.xlu2 %v1482_v6 }
 0x3a4   : > { %v1464_v52 = vpop.permute.xlu0 %1463 }
 0x3a5   : > { %v4334_v62 = vadd.f32 %v1464_v52, %v1309_v32  ;;  %v4336_v2 = vadd.f32 %v1464_v52, %v1310_v46 }
 0x3a7   : > { %v1485_v53 = vadd.f32 %v4336_v2, %v4334_v62 }
 0x3a9   : > { %1486 = vadd.xlane.f32.xlu0 %v1485_v53 }
 0x3f4   : > { %v1481_v36 = vpop.xlane.xlu1 %1480 }
 0x3f5   : > { %v1491_v50 = vrot.slane %v1481_v36, 1  ;;  %v1502_v20 = vrot.slane %v1481_v36, 7 }
 0x40c   : > { %v1490_v15 = vpop.xlane.xlu1 %1489 }
 0x40d   : > { %v1505_v63 = vrot.slane %v1490_v15, 7  ;;  %v1494_v19 = vrot.slane %v1490_v15, 1 }
 0x40f   : > { %v1510_v41 = vsel %vm1506_vm0, %v1505_v63, %v1502_v20  ;;  %v1501_v18 = vsel %vm1497_vm1, %v1494_v19, %v1491_v50 }
 0x414   : > { %v1484_v42 = vpop.xlane.xlu2 %1483 }
 0x415   : > { %v1492_v4 = vrot.slane %v1484_v42, 1  ;;  %v1503_v12 = vrot.slane %v1484_v42, 7 }
 0x417   : > { %v1500_v44 = vsel %vm1497_vm1, %v1491_v50, %v1492_v4  ;;  %v1509_v21 = vsel %vm1506_vm0, %v1502_v20, %v1503_v12 }
 0x418   : > { %v1566_v27 = vsel %vm4346_vm14, %v1500_v44, %v1510_v41 }
 0x419   : > { %v1570_v31 = vadd.f32 %v1566_v27, %v1481_v36  ;;  %v3633_v27 = vmov 5  }
 0x41b   : > { %v1574_v29 = vmul.f32 0.001953125, %v1570_v31 }
 0x41c   : > { %v1487_v51 = vpop.xlane.xlu0 %1486 }
 0x41d   : > { %v1493_v22 = vrot.slane %v1487_v51, 1  ;;  %v1504_v47 = vrot.slane %v1487_v51, 7  ;;  %1580 = vperm.xlu2 %3455, %v1574_v29  }
 0x41f   : > { %v1498_v43 = vsel %vm1497_vm1, %v1493_v22, %v1494_v19  ;;  %v1508_v17 = vsel %vm1506_vm0, %v1503_v12, %v1504_v47  ;;  %v1507_v37 = vsel %vm1506_vm0, %v1504_v47, %v1505_v63  ;;  %v1499_v3 = vsel %vm1497_vm1, %v1492_v4, %v1493_v22 }
 0x420   : > { %v1568_v38 = vsel %vm4359_vm2, %v1498_v43, %v1508_v17  ;;  %v1569_v54 = vsel %vm4363_vm3, %v1501_v18, %v1507_v37  ;;  %v1567_v8 = vsel %vm4367_vm4, %v1499_v3, %v1509_v21 }
 0x421   : > { %v1572_v13 = vadd.f32 %v1568_v38, %v1487_v51  ;;  %v1573_v59 = vadd.f32 %v1569_v54, %v1490_v15  ;;  %v1571_v10 = vadd.f32 %v1567_v8, %v1484_v42 }
 0x423   : > { %v1577_v48 = vmul.f32 0.001953125, %v1573_v59  ;;  %v1575_v6 = vmul.f32 0.001953125, %v1571_v10  ;;  %v1576_v32 = vmul.f32 0.001953125, %v1572_v13 }
 0x425   : > { %1595 = vperm.xlu2 %3455, %v1577_v48   ;;  %1585 = vperm.xlu1 %3456, %v1575_v6  }
 0x426   : > { %1590 = vperm.xlu0 %3457, %v1576_v32  }
 0x42d   : > { %3458 = vset.pattern.permute.xlu1 %v3633_v27  ;;  %3459 = vset.pattern.permute.xlu2 %v3633_v27 }
 0x42e   : > { %1702 = vrot.lane.b32.xlu0 %v4182_v35, %s3632_s22 }
 0x477   : > { %v1581_v46 = vpop.permute.xlu2 %1580 }
 0x478   : > { %v4392_v52 = vsub.f32 %v4293_v1, %v1581_v46  ;;  %v4395_v53 = vsub.f32 %v4295_v30, %v1581_v46 }
 0x47a   : > { %v1606_v36 = vmul.f32 %v4392_v52, %v4392_v52  ;;  %v1607_v39 = vmul.f32 %v4395_v53, %v4395_v53 }
 0x47c   : > { %v1614_v15 = vadd.f32 %v1607_v39, %v1606_v36 }
 0x47e   : > { %1615 = vadd.xlane.f32.xlu1 %v1614_v15 }
 0x47f   : > { %v1596_v5 = vpop.permute.xlu2 %1595 }
 0x480   : > { %v4402_v63 = vsub.f32 %v4316_v33, %v1596_v5  ;;  %v4405_v50 = vsub.f32 %v4318_v14, %v1596_v5 }
 0x482   : > { %v1612_v1 = vmul.f32 %v4402_v63, %v4402_v63  ;;  %v1613_v30 = vmul.f32 %v4405_v50, %v4405_v50 }
 0x484   : > { %v1623_v20 = vadd.f32 %v1613_v30, %v1612_v1 }
 0x486   : > { %1624 = vadd.xlane.f32.xlu1 %v1623_v20 }
 0x497   : > { %v1586_v42 = vpop.permute.xlu1 %1585 }
 0x498   : > { %v4412_v28 = vsub.f32 %v4325_v49, %v1586_v42  ;;  %v4415_v4 = vsub.f32 %v4327_v58, %v1586_v42  ;;  %v1591_v33 = vpop.permute.xlu0 %1590 }
 0x499   : > { %v4418_v0 = vsub.f32 %v4334_v62, %v1591_v33  ;;  %v4421_v14 = vsub.f32 %v4336_v2, %v1591_v33  ;;  %v4434_v62 = vld [vmem:[%s5117_s2] sm:$0xff]  ;;  %v4441_v2 = vld [vmem:[%s5117_s2 + $0x8] sm:$0xff] }
 0x49a   : > { %v1608_v56 = vmul.f32 %v4412_v28, %v4412_v28  ;;  %v1609_v44 = vmul.f32 %v4415_v4, %v4415_v4 }
 0x49b   : > { %v1610_v49 = vmul.f32 %v4418_v0, %v4418_v0  ;;  %v1611_v58 = vmul.f32 %v4421_v14, %v4421_v14 }
 0x49c   : > { %v1617_v41 = vadd.f32 %v1609_v44, %v1608_v56 }
 0x49d   : > { %v1620_v16 = vadd.f32 %v1611_v58, %v1610_v49 }
 0x49e   : > { %1618 = vadd.xlane.f32.xlu0 %v1617_v41 }
 0x49f   : > { %1621 = vadd.xlane.f32.xlu2 %v1620_v16  ;;  %1698 = vrot.lane.b32.xlu1 %v4434_v62, %s3632_s22 }
 0x4a0   : > { %v4453_v61 = vpop.permute.xlu0 %1702 }
 0x4a7   : > { %1751 = vperm.xlu1 %3458, %v4182_v35  }
 0x4af   : > { %3461 = vset.pattern.permute.xlu1 %v5189_v34 }
 0x4b2   : > { %1700 = vrot.lane.b32.xlu0 %v4441_v2, %s3632_s22 }
 0x4b7   : > { %1704 = vrot.lane.b32.xlu2 %v4214_v45, %s3632_s22  ;;  %s311_s22 = sand.u32 1, %s3610_s28  }
 0x4b8   : > { %s3014_s24 = sshll.u32 %s311_s22, 6  ;;  %s2921_s9 = scalar_lea.sflag [#allocation3], %s311_s22 }
 0x4b9   : > { %s5051_s25 = scalar_lea.vmem [#allocation2], %s3014_s24 }
 0x4bf   : > { %1755 = vperm.xlu2 %3459, %v4214_v45  }
 0x4c7   : > { %3460 = vset.pattern.permute.xlu2 %v5189_v34 }
 0x4f1   : > { %v1616_v31 = vpop.xlane.xlu1 %1615 }
 0x4f2   : > { %v1626_v22 = vrot.slane %v1616_v31, 1  ;;  %v1634_v47 = vrot.slane %v1616_v31, 7 }
 0x4f9   : > { %v1625_v19 = vpop.xlane.xlu1 %1624 }
 0x4fa   : > { %v1629_v12 = vrot.slane %v1625_v19, 1  ;;  %v1637_v29 = vrot.slane %v1625_v19, 7 }
 0x4fc   : > { %v1633_v45 = vsel %vm1497_vm1, %v1629_v12, %v1626_v22  ;;  %v1641_v37 = vsel %vm1506_vm0, %v1637_v29, %v1634_v47 }
 0x511   : > { %v1619_v51 = vpop.xlane.xlu0 %1618 }
 0x512   : > { %v1622_v18 = vpop.xlane.xlu2 %1621  ;;  %v1627_v21 = vrot.slane %v1619_v51, 1  ;;  %v1635_v43 = vrot.slane %v1619_v51, 7 }
 0x513   : > { %v1628_v17 = vrot.slane %v1622_v18, 1  ;;  %v1636_v35 = vrot.slane %v1622_v18, 7 }
 0x514   : > { %v1632_v3 = vsel %vm1497_vm1, %v1626_v22, %v1627_v21  ;;  %v1640_v38 = vsel %vm1506_vm0, %v1634_v47, %v1635_v43 }
 0x515   : > { %v1630_v54 = vsel %vm1497_vm1, %v1628_v17, %v1629_v12  ;;  %v1638_v8 = vsel %vm1506_vm0, %v1636_v35, %v1637_v29  ;;  %v1631_v13 = vsel %vm1497_vm1, %v1627_v21, %v1628_v17  ;;  %v1639_v59 = vsel %vm1506_vm0, %v1635_v43, %v1636_v35 }
 0x516   : > { %v1645_v10 = vsel %vm4363_vm3, %v1633_v45, %v1638_v8  ;;  %v1642_v48 = vsel %vm4346_vm14, %v1632_v3, %v1641_v37  ;;  %v1643_v6 = vsel %vm4367_vm4, %v1631_v13, %v1640_v38  ;;  %v1644_v32 = vsel %vm4359_vm2, %v1630_v54, %v1639_v59 }
 0x517   : > { %v1647_v46 = vadd.f32 %v1643_v6, %v1619_v51  ;;  %v1648_v36 = vadd.f32 %v1644_v32, %v1622_v18  ;;  %v1646_v39 = vadd.f32 %v1642_v48, %v1616_v31  ;;  %v1649_v15 = vadd.f32 %v1645_v10, %v1625_v19  ;;  %v1699_v6 = vpop.permute.xlu1 %1698 }
 0x519   : > { %v1651_v5 = vmul.f32 0.001953125, %v1647_v46  ;;  %v1652_v1 = vmul.f32 0.001953125, %v1648_v36  ;;  %v1650_v55 = vmul.f32 0.001953125, %v1646_v39  ;;  %v1653_v30 = vmul.f32 0.001953125, %v1649_v15 }
 0x51a   : > { %v1705_v38 = vpop.permute.xlu2 %1704 }
 0x51b   : > { %v1655_v20 = vadd.f32 1e-05, %v1651_v5  ;;  %v1656_v40 = vadd.f32 1e-05, %v1652_v1  ;;  %v1654_v42 = vadd.f32 1e-05, %v1650_v55 }
 0x51c   : > { %v1657_v33 = vadd.f32 1e-05, %v1653_v30 }
 0x51d   : > { %3506 = vrsqrt.f32 %v1655_v20  ;;  %vm1674_vm14 = vweird.f32 %v1655_v20  ;;  %vm1684_vm3 = vweird.f32 %v1656_v40 }
 0x51e   : > { %3508 = vrsqrt.f32 %v1656_v40  ;;  %vm1694_vm4 = vweird.f32 %v1657_v33 }
 0x51f   : > { %3510 = vrsqrt.f32 %v1654_v42  ;;  %v1752_v39 = vpop.permute.xlu1 %1751 }
 0x520   : > { %3512 = vrsqrt.f32 %v1657_v33 }
 0x523   : > { %v3507_v23 = vpop.eup %3506 }
 0x524   : > { %v3509_v11 = vpop.eup %3508  ;;  %v1669_v7 = vmul.f32 %v3507_v23, %v1655_v20  ;;  %vm1675_vm5 = vweird.f32 %v3507_v23  ;;  %v1701_v43 = vpop.permute.xlu0 %1700 }
 0x525   : > { %v3511_v56 = vpop.eup %3510  ;;  %v1679_v44 = vmul.f32 %v3509_v11, %v1656_v40  ;;  %vm1685_vm0 = vweird.f32 %v3509_v11  ;;  %vm1676_vm2 = vmor %vm1674_vm14, %vm1675_vm5  ;;  %vm1664_vm5 = vweird.f32 %v1654_v42 }
 0x526   : > { %v3513_v49 = vpop.eup %3512  ;;  %v1659_v58 = vmul.f32 %v3511_v56, %v1654_v42  ;;  %v1670_v41 = vmul.f32 %v3507_v23, %v1669_v7  ;;  %vm1686_vm8 = vmor %vm1684_vm3, %vm1685_vm0  ;;  %vm1665_vm13 = vweird.f32 %v3511_v56 }
 0x527   : > { %v1689_v16 = vmul.f32 %v3513_v49, %v1657_v33  ;;  %v1680_v31 = vmul.f32 %v3509_v11, %v1679_v44  ;;  %vm1695_vm1 = vweird.f32 %v3513_v49  ;;  %vm1666_vm14 = vmor %vm1664_vm5, %vm1665_vm13 }
 0x528   : > { %v1660_v34 = vmul.f32 %v3511_v56, %v1659_v58  ;;  %v1671_v19 = vmul.f32 0.5, %v1670_v41  ;;  %vm1696_vm12 = vmor %vm1694_vm4, %vm1695_vm1 }
 0x529   : > { %v1690_v12 = vmul.f32 %v3513_v49, %v1689_v16  ;;  %v1681_v29 = vmul.f32 0.5, %v1680_v31 }
 0x52a   : > { %v1672_v51 = vsub.f32 1.5, %v1671_v19  ;;  %v1661_v22 = vmul.f32 0.5, %v1660_v34 }
 0x52b   : > { %v1691_v47 = vmul.f32 0.5, %v1690_v12  ;;  %v1682_v18 = vsub.f32 1.5, %v1681_v29 }
 0x52c   : > { %v1673_v21 = vmul.f32 %v3507_v23, %v1672_v51  ;;  %v1662_v37 = vsub.f32 1.5, %v1661_v22 }
 0x52d   : > { %v1692_v17 = vsub.f32 1.5, %v1691_v47  ;;  %v1683_v35 = vmul.f32 %v3509_v11, %v1682_v18 }
 0x52e   : > { %v1677_v45 = vsel %vm1676_vm2, %v3507_v23, %v1673_v21  ;;  %v1663_v48 = vmul.f32 %v3511_v56, %v1662_v37 }
 0x52f   : > { %v1693_v3 = vmul.f32 %v3513_v49, %v1692_v17  ;;  %v1711_v54 = vmul.f32 %v1701_v43, %v1677_v45  ;;  %v1687_v8 = vsel %vm1686_vm8, %v3509_v11, %v1683_v35 }
 0x530   : > { %v1712_v13 = vmul.f32 %v4453_v61, %v1687_v8  ;;  %v1667_v32 = vsel %vm1666_vm14, %v3511_v56, %v1663_v48  ;;  %v1756_v61 = vpop.permute.xlu2 %1755 }
 0x531   : > { %v1697_v59 = vsel %vm1696_vm12, %v3513_v49, %v1693_v3  ;;  %1721 = vperm.xlu1 %3461, %v1711_v54   ;;  %v1710_v46 = vmul.f32 %v1699_v6, %v1667_v32 }
 0x532   : > { %v1713_v10 = vmul.f32 %v1705_v38, %v1697_v59  ;;  %1726 = vperm.xlu2 %3460, %v1712_v13  }
 0x534   : > { %1731 = vperm.xlu0 %3457, %v1713_v10  }
 0x53a   : > { %3462 = vset.pattern.permute.xlu2 %v3633_v27 }
 0x53b   : > { %1743 = vperm.xlu2 %3462, %v4434_v62  }
 0x53c   : > { %1716 = vperm.xlu0 %3457, %v1710_v46  }
 0x544   : > { %3463 = vset.pattern.permute.xlu0 %v3633_v27 }
 0x545   : > { %1747 = vperm.xlu0 %3463, %v4441_v2  }
 0x58c   : > { %v1727_v36 = vpop.permute.xlu2 %1726 }
 0x58d   : > { %v1738_v15 = vmul.f32 %v1727_v36, %v4418_v0  ;;  %v1739_v5 = vmul.f32 %v1727_v36, %v4421_v14 }
 0x58f   : > { %v1762_v1 = vadd.f32 %v1752_v39, %v1738_v15  ;;  %v4486_v55 = vadd.f32 %v1752_v39, %v1739_v5 }
 0x591   : > { %v3188_v30 = vmul.f32 -1.442695, %v1762_v1  ;;  %v3189_v20 = vmul.f32 -1.442695, %v4486_v55 }
 0x593   : > { %3514 = vpow2.f32 %v3188_v30 }
 0x594   : > { %3516 = vpow2.f32 %v3189_v20 }
 0x595   : > { %v1744_v17 = vpop.permute.xlu2 %1743 }
 0x599   : > { %v3515_v62 = vpop.eup %3514 }
 0x59a   : > { %v3517_v40 = vpop.eup %3516  ;;  %v1794_v27 = vadd.f32 1.0, %v3515_v62 }
 0x59b   : > { %v1795_v42 = vadd.f32 1.0, %v3517_v40 }
 0x59c   : > { %3518 = vrcp.f32 %v1794_v27  ;;  %v1867_v14 = vand.u32 2147483647, %v1794_v27  ;;  %v1869_v7 = vand.u32 2147483648, %v1794_v27  ;;  %vm1863_vm12 = vweird.f32 %v1794_v27 }
 0x59d   : > { %3520 = vrcp.f32 %v1795_v42  ;;  %v1884_v18 = vand.u32 2147483648, %v1795_v42  ;;  %vm1878_vm2 = vweird.f32 %v1795_v42 }
 0x59e   : > { %vm1868_vm0 = vcmp.eq.f32.partialorder %v1867_v14, 8.507059e+37  ;;  %v1870_v12 = vor.u32 1.1754944e-38, %v1869_v7 }
 0x59f   : > { %v1885_v3 = vor.u32 1.1754944e-38, %v1884_v18 }
 0x5a2   : > { %v3519_v2 = vpop.eup %3518 }
 0x5a3   : > { %v3521_v33 = vpop.eup %3520  ;;  %v1859_v23 = vmul.f32 %v3519_v2, %v1794_v27  ;;  %vm1864_vm8 = vweird.f32 %v3519_v2  ;;  %v1722_v59 = vpop.permute.xlu1 %1721 }
 0x5a4   : > { %v1874_v0 = vmul.f32 %v3521_v33, %v1795_v42  ;;  %vm1865_vm13 = vmor %vm1863_vm12, %vm1864_vm8  ;;  %vm1879_vm1 = vweird.f32 %v3521_v33  ;;  %v1736_v46 = vmul.f32 %v1722_v59, %v4412_v28 }
 0x5a5   : > { %v1860_v11 = vsub.f32 1.0, %v1859_v23  ;;  %vm1880_vm3 = vmor %vm1878_vm2, %vm1879_vm1 }
 0x5a6   : > { %v1875_v56 = vsub.f32 1.0, %v1874_v0  ;;  %v1732_v44 = vpop.permute.xlu0 %1731 }
 0x5a7   : > { %v1861_v49 = vmul.f32 %v3519_v2, %v1860_v11  ;;  %v1740_v58 = vmul.f32 %v1732_v44, %v4402_v63  ;;  %v1741_v41 = vmul.f32 %v1732_v44, %v4405_v50  ;;  %v1882_v50 = vand.u32 2147483647, %v1795_v42 }
 0x5a8   : > { %v1876_v16 = vmul.f32 %v3521_v33, %v1875_v56 }
 0x5a9   : > { %v1862_v31 = vadd.f32 %v3519_v2, %v1861_v49  ;;  %v4491_v34 = vadd.f32 %v1756_v61, %v1740_v58  ;;  %v4493_v19 = vadd.f32 %v1756_v61, %v1741_v41  ;;  %vm1883_vm4 = vcmp.eq.f32.partialorder %v1882_v50, 8.507059e+37 }
 0x5aa   : > { %v1877_v51 = vadd.f32 %v3521_v33, %v1876_v16  ;;  %v1737_v61 = vmul.f32 %v1722_v59, %v4415_v4 }
 0x5ab   : > { %v1866_v29 = vsel %vm1865_vm13, %v3519_v2, %v1862_v31  ;;  %v3190_v22 = vmul.f32 -1.442695, %v4491_v34  ;;  %v3191_v47 = vmul.f32 -1.442695, %v4493_v19 }
 0x5ac   : > { %v1871_v63 = vsel %vm1868_vm0, %v1870_v12, %v1866_v29  ;;  %v1881_v35 = vsel %vm1880_vm3, %v3521_v33, %v1877_v51 }
 0x5ad   : > { %v4497_v21 = vmul.f32 %v1871_v63, %v1762_v1  ;;  %3522 = vpow2.f32 %v3190_v22  ;;  %v1886_v8 = vsel %vm1883_vm4, %v1885_v3, %v1881_v35 }
 0x5ae   : > { %3524 = vpow2.f32 %v3191_v47  ;;  %v1717_v43 = vpop.permute.xlu0 %1716  ;;  %v4512_v6 = vmul.f32 %v1886_v8, %v4486_v55 }
 0x5af   : > { %v1734_v45 = vmul.f32 %v1717_v43, %v4392_v52  ;;  %v1735_v37 = vmul.f32 %v1717_v43, %v4395_v53  ;;  %1930 = vrot.lane.b32.xlu0 %v4497_v21, %s3623_s10  ;;  %1970 = vrot.lane.b32.xlu1 %v4497_v21, %s3624_s12 }
 0x5b1   : > { %v4505_v38 = vadd.f32 %v1744_v17, %v1734_v45  ;;  %v4507_v54 = vadd.f32 %v1744_v17, %v1735_v37 }
 0x5b3   : > { %v3523_v13 = vpop.eup %3522  ;;  %v3184_v10 = vmul.f32 -1.442695, %v4505_v38  ;;  %v3185_v53 = vmul.f32 -1.442695, %v4507_v54 }
 0x5b4   : > { %v3525_v52 = vpop.eup %3524  ;;  %v1796_v48 = vadd.f32 1.0, %v3523_v13 }
 0x5b5   : > { %v1797_v32 = vadd.f32 1.0, %v3525_v52  ;;  %3526 = vpow2.f32 %v3184_v10 }
 0x5b6   : > { %3528 = vrcp.f32 %v1796_v48  ;;  %v1897_v2 = vand.u32 2147483647, %v1796_v48  ;;  %v1899_v33 = vand.u32 2147483648, %v1796_v48  ;;  %vm1893_vm8 = vweird.f32 %v1796_v48 }
 0x5b7   : > { %3530 = vrcp.f32 %v1797_v32  ;;  %v1748_v36 = vpop.permute.xlu0 %1747  ;;  %1978 = vrot.lane.b32.xlu1 %v4512_v6, %s3624_s12  ;;  %v1914_v0 = vand.u32 2147483648, %v1797_v32  ;;  %v1912_v56 = vand.u32 2147483647, %v1797_v32  ;;  %vm1908_vm12 = vweird.f32 %v1797_v32 }
 0x5b8   : > { %3532 = vpow2.f32 %v3185_v53  ;;  %v4518_v39 = vadd.f32 %v1748_v36, %v1736_v46  ;;  %v4520_v15 = vadd.f32 %v1748_v36, %v1737_v61  ;;  %vm1898_vm0 = vcmp.eq.f32.partialorder %v1897_v2, 8.507059e+37 }
 0x5b9   : > { %v1900_v16 = vor.u32 1.1754944e-38, %v1899_v33  ;;  %v1915_v12 = vor.u32 1.1754944e-38, %v1914_v0  ;;  %vm1913_vm2 = vcmp.eq.f32.partialorder %v1912_v56, 8.507059e+37 }
 0x5ba   : > { %v3186_v5 = vmul.f32 -1.442695, %v4518_v39  ;;  %v3187_v55 = vmul.f32 -1.442695, %v4520_v15 }
 0x5bb   : > { %v3527_v1 = vpop.eup %3526 }
 0x5bc   : > { %v3529_v30 = vpop.eup %3528  ;;  %v4524_v28 = vadd.f32 1.0, %v3527_v1  ;;  %3534 = vpow2.f32 %v3186_v5 }
 0x5bd   : > { %v3531_v4 = vpop.eup %3530  ;;  %v1889_v20 = vmul.f32 %v3529_v30, %v1796_v48  ;;  %3536 = vpow2.f32 %v3187_v55  ;;  %vm1894_vm5 = vweird.f32 %v3529_v30 }
 0x5be   : > { %v3533_v62 = vpop.eup %3532  ;;  %v1904_v40 = vmul.f32 %v3531_v4, %v1797_v32  ;;  %3538 = vrcp.f32 %v4524_v28  ;;  %vm1909_vm14 = vweird.f32 %v3531_v4  ;;  %vm1895_vm13 = vmor %vm1893_vm8, %vm1894_vm5  ;;  %v1809_v45 = vand.u32 2147483648, %v4524_v28 }
 0x5bf   : > { %v1890_v27 = vsub.f32 1.0, %v1889_v20  ;;  %v4527_v42 = vadd.f32 1.0, %v3533_v62  ;;  %vm1910_vm1 = vmor %vm1908_vm12, %vm1909_vm14  ;;  %v1807_v8 = vand.u32 2147483647, %v4524_v28  ;;  %vm1803_vm4 = vweird.f32 %v4524_v28 }
 0x5c0   : > { %v1905_v23 = vsub.f32 1.0, %v1904_v40  ;;  %v1810_v52 = vor.u32 1.1754944e-38, %v1809_v45 }
 0x5c1   : > { %v1891_v11 = vmul.f32 %v3529_v30, %v1890_v27  ;;  %3540 = vrcp.f32 %v4527_v42  ;;  %v1824_v10 = vand.u32 2147483648, %v4527_v42  ;;  %vm1808_vm8 = vcmp.eq.f32.partialorder %v1807_v8, 8.507059e+37 }
 0x5c2   : > { %v3535_v14 = vpop.eup %3534  ;;  %v1906_v7 = vmul.f32 %v3531_v4, %v1905_v23  ;;  %vm1818_vm12 = vweird.f32 %v4527_v42 }
 0x5c3   : > { %v3537_v44 = vpop.eup %3536  ;;  %v1892_v49 = vadd.f32 %v3529_v30, %v1891_v11  ;;  %v4530_v58 = vadd.f32 1.0, %v3535_v14  ;;  %v1825_v1 = vor.u32 1.1754944e-38, %v1824_v10 }
 0x5c4   : > { %v3539_v41 = vpop.eup %3538  ;;  %v1907_v31 = vadd.f32 %v3531_v4, %v1906_v7  ;;  %v4533_v22 = vadd.f32 1.0, %v3537_v44 }
 0x5c5   : > { %v1896_v29 = vsel %vm1895_vm13, %v3529_v30, %v1892_v49  ;;  %v1799_v51 = vmul.f32 %v3539_v41, %v4524_v28  ;;  %3542 = vrcp.f32 %v4530_v58  ;;  %vm1804_vm3 = vweird.f32 %v3539_v41 }
 0x5c6   : > { %v1901_v47 = vsel %vm1898_vm0, %v1900_v16, %v1896_v29  ;;  %v1911_v63 = vsel %vm1910_vm1, %v3531_v4, %v1907_v31  ;;  %3544 = vrcp.f32 %v4533_v22  ;;  %vm1805_vm5 = vmor %vm1803_vm4, %vm1804_vm3  ;;  %v1837_v30 = vand.u32 2147483647, %v4530_v58 }
 0x5c7   : > { %v3541_v18 = vpop.eup %3540  ;;  %v1916_v50 = vsel %vm1913_vm2, %v1915_v12, %v1911_v63  ;;  %v4537_v43 = vmul.f32 %v1901_v47, %v4491_v34  ;;  %v1800_v17 = vsub.f32 1.0, %v1799_v51  ;;  %v1839_v28 = vand.u32 2147483648, %v4530_v58 }
 0x5c8   : > { %v4540_v35 = vmul.f32 %v1916_v50, %v4493_v19  ;;  %v1814_v37 = vmul.f32 %v3541_v18, %v4527_v42  ;;  %v1822_v19 = vand.u32 2147483647, %v4527_v42  ;;  %vm1819_vm14 = vweird.f32 %v3541_v18 }
 0x5c9   : > { %v1801_v3 = vmul.f32 %v3539_v41, %v1800_v17  ;;  %1932 = vrot.lane.b32.xlu1 %v4537_v43, %s3623_s10  ;;  %1972 = vrot.lane.b32.xlu2 %v4537_v43, %s3624_s12  ;;  %vm1820_vm0 = vmor %vm1818_vm12, %vm1819_vm14  ;;  %vm1833_vm2 = vweird.f32 %v4530_v58  ;;  %vm1838_vm4 = vcmp.eq.f32.partialorder %v1837_v30, 8.507059e+37  ;;  %v1840_v2 = vor.u32 1.1754944e-38, %v1839_v28 }
 0x5ca   : > { %v1815_v34 = vsub.f32 1.0, %v1814_v37  ;;  %1940 = vrot.lane.b32.xlu0 %v4540_v35, %s3623_s10  ;;  %vm1823_vm13 = vcmp.eq.f32.partialorder %v1822_v19, 8.507059e+37  ;;  %v1854_v33 = vand.u32 2147483648, %v4533_v22  ;;  %v1852_v11 = vand.u32 2147483647, %v4533_v22 }
 0x5cb   : > { %v3543_v13 = vpop.eup %3542  ;;  %v1802_v59 = vadd.f32 %v3539_v41, %v1801_v3  ;;  %vm1848_vm14 = vweird.f32 %v4533_v22 }
 0x5cc   : > { %v1816_v48 = vmul.f32 %v3541_v18, %v1815_v34  ;;  %v1829_v53 = vmul.f32 %v3543_v13, %v4530_v58  ;;  %v3545_v5 = vpop.eup %3544  ;;  %vm1834_vm1 = vweird.f32 %v3543_v13  ;;  %v1855_v7 = vor.u32 1.1754944e-38, %v1854_v33 }
 0x5cd   : > { %v1806_v32 = vsel %vm1805_vm5, %v3539_v41, %v1802_v59  ;;  %v1844_v62 = vmul.f32 %v3545_v5, %v4533_v22  ;;  %vm1835_vm3 = vmor %vm1833_vm2, %vm1834_vm1  ;;  %vm1849_vm5 = vweird.f32 %v3545_v5  ;;  %vm1853_vm12 = vcmp.eq.f32.partialorder %v1852_v11, 8.507059e+37 }
 0x5ce   : > { %v1811_v46 = vsel %vm1808_vm8, %v1810_v52, %v1806_v32  ;;  %v1817_v61 = vadd.f32 %v3541_v18, %v1816_v48  ;;  %v1830_v36 = vsub.f32 1.0, %v1829_v53  ;;  %vm1850_vm8 = vmor %vm1848_vm14, %vm1849_vm5 }
 0x5cf   : > { %v4558_v55 = vmul.f32 %v1811_v46, %v4505_v38  ;;  %v1845_v42 = vsub.f32 1.0, %v1844_v62 }
 0x5d0   : > { %v1821_v4 = vsel %vm1820_vm0, %v3541_v18, %v1817_v61  ;;  %v1831_v20 = vmul.f32 %v3543_v13, %v1830_v36 }
 0x5d1   : > { %v1826_v40 = vsel %vm1823_vm13, %v1825_v1, %v1821_v4  ;;  %1980 = vrot.lane.b32.xlu2 %v4540_v35, %s3624_s12  ;;  %1966 = vrot.lane.b32.xlu1 %v4558_v55, %s3624_s12  ;;  %v1846_v0 = vmul.f32 %v3545_v5, %v1845_v42 }
 0x5d2   : > { %v4568_v27 = vmul.f32 %v1826_v40, %v4507_v54  ;;  %v1832_v38 = vadd.f32 %v3543_v13, %v1831_v20 }
 0x5d3   : > { %v1847_v54 = vadd.f32 %v3545_v5, %v1846_v0 }
 0x5d4   : > { %v1836_v23 = vsel %vm1835_vm3, %v3543_v13, %v1832_v38  ;;  %1974 = vrot.lane.b32.xlu0 %v4568_v27, %s3624_s12 }
 0x5d5   : > { %v1841_v14 = vsel %vm1838_vm4, %v1840_v2, %v1836_v23  ;;  %v1851_v56 = vsel %vm1850_vm8, %v3545_v5, %v1847_v54  ;;  %v3373_v54 = vld [vmem:[%s5121_s6 + $0x10] sm:$0xff] }
 0x5d6   : > { %v4577_v44 = vmul.f32 %v1841_v14, %v4518_v39  ;;  %v1856_v49 = vsel %vm1853_vm12, %v1855_v7, %v1851_v56 }
 0x5d7   : > { %v4582_v58 = vmul.f32 %v1856_v49, %v4520_v15 }
 0x5d9   : > { %1938 = vrot.lane.b32.xlu2 %v4512_v6, %s3623_s10  ;;  %1976 = vrot.lane.b32.xlu1 %v4582_v58, %s3624_s12 }
 0x5dc   : > { %1928 = vrot.lane.b32.xlu0 %v4577_v44, %s3623_s10 }
 0x5e1   : > { %1968 = vrot.lane.b32.xlu2 %v4577_v44, %s3624_s12  ;;  %1934 = vrot.lane.b32.xlu1 %v4568_v27, %s3623_s10 }
 0x5e4   : > { %2119 = vrot.lane.b32.xlu0 %v4497_v21, %s3626_s19 }
 0x5e9   : > { %1926 = vrot.lane.b32.xlu2 %v4558_v55, %s3623_s10  ;;  %2121 = vrot.lane.b32.xlu1 %v4537_v43, %s3626_s19 }
 0x5ec   : > { %2129 = vrot.lane.b32.xlu0 %v4540_v35, %s3626_s19 }
 0x5f1   : > { %1936 = vrot.lane.b32.xlu2 %v4582_v58, %s3623_s10  ;;  %2222 = vrot.lane.b32.xlu1 %v4497_v21, %s3622_s26  ;;  %s5190_s10 = smov 127  }
 0x5f4   : > { %2230 = vrot.lane.b32.xlu0 %v4512_v6, %s3622_s26 }
 0x5f9   : > { %2127 = vrot.lane.b32.xlu2 %v4512_v6, %s3626_s19  ;;  %2232 = vrot.lane.b32.xlu1 %v4540_v35, %s3622_s26 }
 0x5fc   : > { %2117 = vrot.lane.b32.xlu0 %v4577_v44, %s3626_s19 }
 0x601   : > { %2224 = vrot.lane.b32.xlu2 %v4537_v43, %s3622_s26  ;;  %2123 = vrot.lane.b32.xlu1 %v4568_v27, %s3626_s19 }
 0x604   : > { %2218 = vrot.lane.b32.xlu0 %v4558_v55, %s3622_s26 }
 0x609   : > { %2115 = vrot.lane.b32.xlu2 %v4558_v55, %s3626_s19  ;;  %2220 = vrot.lane.b32.xlu1 %v4577_v44, %s3622_s26 }
 0x60c   : > { %2228 = vrot.lane.b32.xlu0 %v4582_v58, %s3622_s26 }
 0x611   : > { %2125 = vrot.lane.b32.xlu2 %v4582_v58, %s3626_s19  ;;  %2396 = vrot.lane.b32.xlu1 %v4497_v21, %s5190_s10  ;;  %s5191_s19 = smov 113  }
 0x614   : > { %2404 = vrot.lane.b32.xlu0 %v4512_v6, %s5190_s10 }
 0x619   : > { %2226 = vrot.lane.b32.xlu2 %v4568_v27, %s3622_s26  ;;  %2406 = vrot.lane.b32.xlu1 %v4540_v35, %s5190_s10  ;;  %s5192_s26 = smov 112  }
 0x61c   : > { %2394 = vrot.lane.b32.xlu0 %v4577_v44, %s5190_s10 }
 0x621   : > { %2398 = vrot.lane.b32.xlu2 %v4537_v43, %s5190_s10  ;;  %v1971_v39 = vpop.permute.xlu1 %1970  ;;  %2400 = vrot.lane.b32.xlu1 %v4568_v27, %s5190_s10  ;;  %v1931_v37 = vpop.permute.xlu0 %1930 }
 0x623   : > { %v1973_v15 = vpop.permute.xlu2 %1972 }
 0x624   : > { %2499 = vrot.lane.b32.xlu0 %v4497_v21, %s5191_s19 }
 0x629   : > { %2392 = vrot.lane.b32.xlu2 %v4558_v55, %s5190_s10  ;;  %v1979_v41 = vpop.permute.xlu1 %1978  ;;  %2501 = vrot.lane.b32.xlu1 %v4537_v43, %s5191_s19 }
 0x62a   : > { %v1984_v16 = vsel %vm528_vm9, %v1971_v39, %v1979_v41  ;;  %v1988_v31 = vsel %vm528_vm9, %v1979_v41, %v1971_v39 }
 0x62b   : > { %v1994_v12 = vmul.f32 %v1988_v31, %v3902_v25  ;;  %v1995_v29 = vmul.f32 %v1984_v16, %v3904_v26  ;;  %v1981_v51 = vpop.permute.xlu2 %1980 }
 0x62c   : > { %2509 = vrot.lane.b32.xlu0 %v4540_v35, %s5191_s19  ;;  %v1985_v22 = vsel %vm528_vm9, %v1973_v15, %v1981_v51  ;;  %v1989_v47 = vsel %vm528_vm9, %v1981_v51, %v1973_v15 }
 0x62d   : > { %v1996_v63 = vmul.f32 %v1989_v47, %v3902_v25  ;;  %v1997_v18 = vmul.f32 %v1985_v22, %v3904_v26 }
 0x62f   : > { %v2005_v50 = vpack.c.bf16 %v1996_v63, %v1994_v12  ;;  %v2006_v17 = vpack.c.bf16 %v1997_v18, %v1995_v29 }
 0x631   : > { %2029 = vmatpush.bf16.msrb.mxu3 %v2005_v50  ;;  %2048 = vmatpush.bf16.msrb.mxu0 %v2006_v17 }
 0x632   : > { %2402 = vrot.lane.b32.xlu2 %v4582_v58, %s5190_s10  ;;  %2602 = vrot.lane.b32.xlu1 %v4497_v21, %s5192_s26  ;;  %s2932_s10 = scalar_lea.hbm %s5123_s8, %s3391_s20  ;;  %s3576_s20 = scalar_lea.hbm %s5123_s8, 128 }
 0x633   : > { %v1939_v45 = vpop.permute.xlu2 %1938 }
 0x634   : > { %2610 = vrot.lane.b32.xlu0 %v4512_v6, %s5192_s26  ;;  %v1944_v3 = vsel %vm499_vm6, %v1931_v37, %v1939_v45  ;;  %v1948_v8 = vsel %vm499_vm6, %v1939_v45, %v1931_v37  ;;  %v5194_v45 = vld [vmem:[#allocation8_spill] sm:$0xff] }
 0x635   : > { %v1954_v52 = vmul.f32 %v1948_v8, %v3858_v60  ;;  %v1955_v48 = vmul.f32 %v1944_v3, %v3900_v24 }
 0x63a   : > { %2507 = vrot.lane.b32.xlu2 %v4512_v6, %s5191_s19  ;;  %2612 = vrot.lane.b32.xlu1 %v4540_v35, %s5192_s26 }
 0x63b   : > { %v1933_v34 = vpop.permute.xlu1 %1932  ;;  %v1969_v19 = vpop.permute.xlu2 %1968 }
 0x63c   : > { %2497 = vrot.lane.b32.xlu0 %v4577_v44, %s5191_s19  ;;  %v1941_v13 = vpop.permute.xlu0 %1940 }
 0x63d   : > { %v1945_v59 = vsel %vm499_vm6, %v1933_v34, %v1941_v13  ;;  %v1949_v10 = vsel %vm499_vm6, %v1941_v13, %v1933_v34 }
 0x63e   : > { %v1956_v53 = vmul.f32 %v1949_v10, %v3858_v60  ;;  %v1957_v32 = vmul.f32 %v1945_v59, %v3900_v24  ;;  %v3374_v59 = vld [vmem:[%s5121_s6 + $0x18] sm:$0xff] }
 0x640   : > { %v1964_v46 = vpack.c.bf16 %v1956_v53, %v1954_v52  ;;  %v1965_v61 = vpack.c.bf16 %v1957_v32, %v1955_v48 }
 0x642   : > { %2604 = vrot.lane.b32.xlu2 %v4537_v43, %s5192_s26  ;;  %2083 = vmatpush.bf16.msrb.mxu1 %v1964_v46  ;;  %v3372_v46 = vld [vmem:[%s5121_s6 + $0x8] sm:$0xff] }
 0x643   : > { %2102 = vmatpush.bf16.msrb.mxu2 %v1965_v61  ;;  %v1927_v36 = vpop.permute.xlu2 %1926  ;;  %2503 = vrot.lane.b32.xlu1 %v4568_v27, %s5191_s19  ;;  %v1967_v5 = vpop.permute.xlu1 %1966 }
 0x644   : > { %2598 = vrot.lane.b32.xlu0 %v4558_v55, %s5192_s26 }
 0x646   : > { %v1975_v1 = vpop.permute.xlu0 %1974 }
 0x647   : > { %v1982_v28 = vsel %vm528_vm9, %v1967_v5, %v1975_v1  ;;  %v1986_v4 = vsel %vm528_vm9, %v1975_v1, %v1967_v5 }
 0x648   : > { %v1990_v42 = vmul.f32 %v1986_v4, %v3902_v25  ;;  %v1991_v2 = vmul.f32 %v1982_v28, %v3904_v26  ;;  %v5196_v4 = vld [vmem:[#allocation6_spill] sm:$0xff] }
 0x64a   : > { %2495 = vrot.lane.b32.xlu2 %v4558_v55, %s5191_s19 }
 0x64b   : > { %v1937_v30 = vpop.permute.xlu2 %1936  ;;  %2600 = vrot.lane.b32.xlu1 %v4577_v44, %s5192_s26  ;;  %v1977_v20 = vpop.permute.xlu1 %1976 }
 0x64c   : > { %2608 = vrot.lane.b32.xlu0 %v4582_v58, %s5192_s26  ;;  %v1983_v40 = vsel %vm528_vm9, %v1969_v19, %v1977_v20  ;;  %v1987_v38 = vsel %vm528_vm9, %v1977_v20, %v1969_v19 }
 0x64d   : > { %v1992_v33 = vmul.f32 %v1987_v38, %v3902_v25  ;;  %v1993_v23 = vmul.f32 %v1983_v40, %v3904_v26 }
 0x64e   : > { %v1929_v62 = vpop.permute.xlu0 %1928 }
 0x64f   : > { %v2003_v0 = vpack.c.bf16 %v1992_v33, %v1990_v42  ;;  %v2004_v11 = vpack.c.bf16 %v1993_v23, %v1991_v2  ;;  %v1943_v25 = vsel %vm499_vm6, %v1929_v62, %v1937_v30  ;;  %v1947_v26 = vsel %vm499_vm6, %v1937_v30, %v1929_v62  ;;  %v5195_v30 = vld [vmem:[#allocation5_spill] sm:$0xff] }
 0x650   : > { %v1952_v15 = vmul.f32 %v1947_v26, %v3858_v60  ;;  %v1953_v41 = vmul.f32 %v1943_v25, %v3900_v24 }
 0x651   : > { %2030 = vmatpush.bf16.msrb.mxu3 %v2003_v0  ;;  %2049 = vmatpush.bf16.msrb.mxu0 %v2004_v11 }
 0x652   : > { %2505 = vrot.lane.b32.xlu2 %v4582_v58, %s5191_s19  ;;  %s2933_s19 = sshll.u32 %s5051_s25, 4  ;;  %s2934_s19 = int_to_ptr.vmem [resolvable:$true] %s2933_s19 }
 0x653   : > { %v2128_v14 = vpop.permute.xlu2 %2127  ;;  %2705 = vrot.lane.b32.xlu1 %v4497_v21, %s5193_s23  ;;  %v1935_v7 = vpop.permute.xlu1 %1934 }
 0x654   : > { %2713 = vrot.lane.b32.xlu0 %v4512_v6, %s5193_s23  ;;  %v1942_v49 = vsel %vm499_vm6, %v1927_v36, %v1935_v7  ;;  %v1946_v39 = vsel %vm499_vm6, %v1935_v7, %v1927_v36  ;;  %3204 = vmatmul.msk.bf16.vlgmr.msrb.gmra.mxu3 %vm1425_vm15, %v3373_v54  ;;  %vm5199_vm6 = vcmp.lt.s32.totalorder %v3852_v57, 113 }
 0x655   : > { %v1950_v16 = vmul.f32 %v1946_v39, %v3858_v60  ;;  %v1951_v31 = vmul.f32 %v1942_v49, %v3900_v24  ;;  %3206 = vmatmul.msk.bf16.vlgmr.msrb.gmra.mxu0 %vm1425_vm15, %v3373_v54  ;;  %v3371_v60 = vld [vmem:[%s5121_s6] sm:$0xff]  ;;  %vm5201_vm9 = vmmov %vm5199_vm6 }
 0x656   : > { %v2120_v56 = vpop.permute.xlu0 %2119  ;;  %vm5211_vm2 = vmmov %vm5199_vm6 }
 0x657   : > { %v1962_v12 = vpack.c.bf16 %v1952_v15, %v1950_v16  ;;  %v1963_v29 = vpack.c.bf16 %v1953_v41, %v1951_v31  ;;  %v2137_v22 = vsel %vm668_vm11, %v2128_v14, %v2120_v56  ;;  %v2133_v24 = vsel %vm668_vm11, %v2120_v56, %v2128_v14  ;;  %v3375_v31 = vld [vmem:[%s5121_s6 + $0x20] sm:$0xff]  ;;  %vm5212_vm3 = vmmov %vm5211_vm2 }
 0x658   : > { %v2143_v18 = vmul.f32 %v2137_v22, %v3962_v9  ;;  %v2144_v37 = vmul.f32 %v2133_v24, %v5194_v45  ;;  %v2328_v15 = vpack.c.bf16 %v4537_v43, %v4497_v21  ;;  %v2329_v41 = vpack.c.bf16 %v4540_v35, %v4512_v6  ;;  %vm5213_vm4 = vmmov %vm5211_vm2 }
 0x659   : > { %2084 = vmatpush.bf16.msrb.mxu1 %v1962_v12  ;;  %2103 = vmatpush.bf16.msrb.mxu2 %v1963_v29  ;;  %v2326_v6 = vpack.c.bf16 %v4577_v44, %v4558_v55  ;;  %vm5214_vm5 = vmmov %vm5211_vm2 }
 0x65a   : > { %2606 = vrot.lane.b32.xlu2 %v4568_v27, %s5192_s26  ;;  %s2935_s26 = sshll.u32 %s2932_s10, 4  ;;  %s2936_s26 = int_to_ptr.hbm [resolvable:$true] %s2935_s26 }
 0x65b   : > { %v2225_v51 = vpop.permute.xlu2 %2224  ;;  %2715 = vrot.lane.b32.xlu1 %v4540_v35, %s5193_s23  ;;  %v2122_v47 = vpop.permute.xlu1 %2121 }
 0x65c   : > { %2703 = vrot.lane.b32.xlu0 %v4577_v44, %s5193_s23  ;;  %3216 = vmatmul.msk.bf16.vlgmr.msrb.gmra.mxu1 %vm1425_vm15, %v3371_v60 }
 0x65d   : > { %3218 = vmatmul.msk.bf16.vlgmr.msrb.gmra.mxu2 %vm1425_vm15, %v3371_v60 }
 0x65e   : > { %v2130_v63 = vpop.permute.xlu0 %2129 }
 0x65f   : > { %v2134_v50 = vsel %vm668_vm11, %v2122_v47, %v2130_v63  ;;  %v2138_v17 = vsel %vm668_vm11, %v2130_v63, %v2122_v47 }
 0x660   : > { %v2145_v3 = vmul.f32 %v2138_v17, %v3962_v9  ;;  %v2146_v8 = vmul.f32 %v2134_v50, %v5194_v45  ;;  %v3376_v50 = vld [vmem:[%s5121_s6 + $0x28] sm:$0xff] }
 0x662   : > { %v2154_v34 = vpack.c.bf16 %v2145_v3, %v2143_v18  ;;  %v2155_v19 = vpack.c.bf16 %v2146_v8, %v2144_v37  ;;  %2707 = vrot.lane.b32.xlu2 %v4537_v43, %s5193_s23  ;;  %v3377_v18 = vld [vmem:[%s5121_s6 + $0x30] sm:$0xff] }
 0x663   : > { %v2116_v13 = vpop.permute.xlu2 %2115  ;;  %2709 = vrot.lane.b32.xlu1 %v4568_v27, %s5193_s23  ;;  %v2223_v10 = vpop.permute.xlu1 %2222 }
 0x664   : > { %2178 = vmatpush.bf16.msra.mxu3 %v2154_v34  ;;  %2197 = vmatpush.bf16.msra.mxu0 %v2155_v19 }
 0x665   : > { %3205 = vmatmul.msk.bf16.gmra.mxu3 %vm1425_vm15, %v3374_v59  ;;  %3207 = vmatmul.msk.bf16.gmra.mxu0 %vm1425_vm15, %v3374_v59 }
 0x666   : > { %v2231_v52 = vpop.permute.xlu0 %2230 }
 0x667   : > { %v2236_v53 = vsel %vm761_vm7, %v2223_v10, %v2231_v52  ;;  %v2240_v32 = vsel %vm761_vm7, %v2231_v52, %v2223_v10  ;;  %v5198_v10 = vld [vmem:[#allocation9_spill] sm:$0xff] }
 0x668   : > { %v2246_v28 = vmul.f32 %v2240_v32, %v5195_v30  ;;  %v2247_v20 = vmul.f32 %v2236_v53, %v5196_v4 }
 0x66a   : > { %2701 = vrot.lane.b32.xlu2 %v4558_v55, %s5193_s23 }
 0x66b   : > { %v2126_v48 = vpop.permute.xlu2 %2125  ;;  %v2233_v61 = vpop.permute.xlu1 %2232 }
 0x66c   : > { %v2237_v5 = vsel %vm761_vm7, %v2225_v51, %v2233_v61  ;;  %v2241_v1 = vsel %vm761_vm7, %v2233_v61, %v2225_v51  ;;  %3217 = vmatmul.msk.bf16.gmra.mxu1 %vm1425_vm15, %v3372_v46  ;;  %v2327_v51 = vpack.c.bf16 %v4582_v58, %v4568_v27  ;;  %v3378_v61 = vld [vmem:[%s5121_s6 + $0x38] sm:$0xff] }
 0x66d   : > { %v2248_v62 = vmul.f32 %v2241_v1, %v5195_v30  ;;  %v2249_v40 = vmul.f32 %v2237_v5, %v5196_v4  ;;  %3219 = vmatmul.msk.bf16.gmra.mxu2 %vm1425_vm15, %v3372_v46 }
 0x66e   : > { %v2118_v36 = vpop.permute.xlu0 %2117 }
 0x66f   : > { %v2257_v38 = vpack.c.bf16 %v2248_v62, %v2246_v28  ;;  %v2258_v42 = vpack.c.bf16 %v2249_v40, %v2247_v20  ;;  %v2132_v33 = vsel %vm668_vm11, %v2118_v36, %v2126_v48  ;;  %v2136_v23 = vsel %vm668_vm11, %v2126_v48, %v2118_v36 }
 0x670   : > { %v2141_v25 = vmul.f32 %v2136_v23, %v3962_v9  ;;  %v2142_v26 = vmul.f32 %v2132_v33, %v5194_v45  ;;  %v3379_v23 = vld [vmem:[%s5121_s6 + $0x40] sm:$0xff] }
 0x671   : > { %2281 = vmatpush.bf16.msra.mxu1 %v2257_v38  ;;  %2300 = vmatpush.bf16.msra.mxu2 %v2258_v42 }
 0x672   : > { %2711 = vrot.lane.b32.xlu2 %v4582_v58, %s5193_s23  ;;  %s3570_s23 = sshra.s32 %s2936_s26, 4  ;;  %s3571_s23 = int_to_ptr.hbm [resolvable:$true] %s3570_s23 }
 0x673   : > { %v2227_v2 = vpop.permute.xlu2 %2226  ;;  %v2124_v0 = vpop.permute.xlu1 %2123  ;;  %s3572_s17 = scalar_lea.hbm %s3571_s23, 64  ;;  %p3577_p0 = scmp.lt.s32.totalorder %s3571_s23, %s5123_s8 }
 0x674   : > { %v2131_v14 = vsel %vm668_vm11, %v2116_v13, %v2124_v0  ;;  %v2135_v54 = vsel %vm668_vm11, %v2124_v0, %v2116_v13  ;;  %v5197_v13 = vld [vmem:[#allocation7_spill] sm:$0xff]  ;;  %vm5205_vm11 = vcmp.lt.s32.totalorder %v3852_v57, 112  ;;  %p3573_p11 = scmp.ne.s32.totalorder %s3571_s23, %s3572_s17  ;;  %p3578_p1 = scmp.lt.s32.totalorder %s3576_s20, %s3572_s17 }
 0x675   : > { %v2139_v7 = vmul.f32 %v2135_v54, %v3962_v9  ;;  %v2140_v56 = vmul.f32 %v2131_v14, %v5194_v45  ;;  %vm5206_vm13 = vmmov %vm5205_vm11 }
 0x676   : > { %v2219_v11 = vpop.permute.xlu0 %2218  ;;  %vm5207_vm0 = vmmov %vm5205_vm11  ;;  %p3574_p12 = pnand %p3573_p11, %p3720_p5  ;;  %p3579_p2 = por %p3578_p1, %p3577_p0 }
 0x677   : > { %v2152_v49 = vpack.c.bf16 %v2141_v25, %v2139_v7  ;;  %v2153_v39 = vpack.c.bf16 %v2142_v26, %v2140_v56  ;;  %v2234_v9 = vsel %vm761_vm7, %v2219_v11, %v2227_v2  ;;  %v2238_v12 = vsel %vm761_vm7, %v2227_v2, %v2219_v11  ;;  %v5203_v56 = vld [vmem:[#allocation11_spill] sm:$0xff]  ;;  %vm5208_vm1 = vmmov %vm5207_vm0 }
 0x678   : > { %v2242_v22 = vmul.f32 %v2238_v12, %v5195_v30  ;;  %v2243_v60 = vmul.f32 %v2234_v9, %v5196_v4  ;;  %v3381_v12 = vld [vmem:[%s5121_s6 + $0x50] sm:$0xff]  ;;  %vm5215_vm14 = vmmov %vm5207_vm0  ;;  %p3575_p13 = pneg %p3574_p12 }
 0x679   : > { %2179 = vmatpush.bf16.msra.mxu3 %v2152_v49  ;;  %2198 = vmatpush.bf16.msra.mxu0 %v2153_v39  ;;  %v5204_v39 = vld [vmem:[#allocation12_spill] sm:$0xff]  ;;  %vm5216_vm8 = vmmov %vm5207_vm0 }
 0x67a   : > { %vm5217_vm12 = vmmov %vm5207_vm0  ;;  %p3580_p3 = pnand %p3579_p2, %p3575_p13 }
 0x67b   : > { %v2399_v16 = vpop.permute.xlu2 %2398  ;;  %v2221_v29 = vpop.permute.xlu1 %2220 }
 0x67c   : > { %3232 = vmatmul.msk.bf16.vlgmr.msra.gmra.mxu3 %vm1425_vm15, %v3375_v31  ;;  %3234 = vmatmul.msk.bf16.vlgmr.msra.gmra.mxu0 %vm1425_vm15, %v3375_v31 }
 0x67d   : > { %2352 = vmatpush.bf16.msrb.mxu3 %v2328_v15  ;;  %2371 = vmatpush.bf16.msrb.mxu0 %v2329_v41 }
 0x67e   : > { %v2229_v21 = vpop.permute.xlu0 %2228 }
 0x67f   : > { %v2235_v43 = vsel %vm761_vm7, %v2221_v29, %v2229_v21  ;;  %v2239_v35 = vsel %vm761_vm7, %v2229_v21, %v2221_v29  ;;  %vm5200_vm7 = vmmov %vm5199_vm6 }
 0x680   : > { %v2244_v24 = vmul.f32 %v2239_v35, %v5195_v30  ;;  %v2245_v55 = vmul.f32 %v2235_v43, %v5196_v4  ;;  %v3380_v43 = vld [vmem:[%s5121_s6 + $0x48] sm:$0xff] }
 0x681   : > { %2353 = vmatpush.bf16.msrb.mxu3 %v2326_v6  ;;  %2372 = vmatpush.bf16.msrb.mxu0 %v2327_v51 }
 0x682   : > { %v2255_v44 = vpack.c.bf16 %v2244_v24, %v2242_v22  ;;  %v2256_v47 = vpack.c.bf16 %v2245_v55, %v2243_v60 }
 0x683   : > { %v2393_v63 = vpop.permute.xlu2 %2392  ;;  %v2397_v27 = vpop.permute.xlu1 %2396 }
 0x684   : > { %2282 = vmatpush.bf16.msra.mxu1 %v2255_v44  ;;  %2301 = vmatpush.bf16.msra.mxu2 %v2256_v47  ;;  %v5209_v47 = vld [vmem:[#allocation10_spill] sm:$0xff] }
 0x686   : > { %v2405_v58 = vpop.permute.xlu0 %2404 }
 0x687   : > { %3248 = vmatmul.msk.bf16.vlgmr.msra.gmra.mxu1 %vm1425_vm15, %v3377_v18  ;;  %3250 = vmatmul.msk.bf16.vlgmr.msra.gmra.mxu2 %vm1425_vm15, %v3377_v18  ;;  %v2410_v45 = vsel %vm923_vm10, %v2397_v27, %v2405_v58  ;;  %v2414_v37 = vsel %vm923_vm10, %v2405_v58, %v2397_v27  ;;  %v5210_v18 = vld [vmem:[#allocation14_spill] sm:$0xff] }
 0x688   : > { %v2420_v59 = vmul.f32 %v2410_v45, %v5197_v13  ;;  %v2421_v52 = vmul.f32 %v2414_v37, %v5198_v10  ;;  %v3382_v37 = vld [vmem:[%s5121_s6 + $0x58] sm:$0xff] }
 0x68b   : > { %v2407_v3 = vpop.permute.xlu1 %2406 }
 0x68c   : > { %v2403_v17 = vpop.permute.xlu2 %2402  ;;  %v2411_v34 = vsel %vm923_vm10, %v2399_v16, %v2407_v3  ;;  %v2415_v19 = vsel %vm923_vm10, %v2407_v3, %v2399_v16  ;;  %3233 = vmatmul.msk.bf16.gmra.mxu3 %vm1425_vm15, %v3376_v50  ;;  %3235 = vmatmul.msk.bf16.gmra.mxu0 %vm1425_vm15, %v3376_v50 }
 0x68d   : > { %v2422_v48 = vmul.f32 %v2411_v34, %v5197_v13  ;;  %v2423_v53 = vmul.f32 %v2415_v19, %v5198_v10 }
 0x68e   : > { %v2395_v8 = vpop.permute.xlu0 %2394 }
 0x68f   : > { %v2431_v32 = vpack.c.bf16 %v2422_v48, %v2420_v59  ;;  %v2432_v46 = vpack.c.bf16 %v2423_v53, %v2421_v52  ;;  %v2409_v5 = vsel %vm923_vm10, %v2395_v8, %v2403_v17  ;;  %v2413_v1 = vsel %vm923_vm10, %v2403_v17, %v2395_v8 }
 0x690   : > { %v2418_v62 = vmul.f32 %v2409_v5, %v5197_v13  ;;  %v2419_v40 = vmul.f32 %v2413_v1, %v5198_v10 }
 0x691   : > { %2455 = vmatpush.bf16.msrb.mxu1 %v2431_v32  ;;  %2474 = vmatpush.bf16.msrb.mxu2 %v2432_v46 }
 0x693   : > { %v2401_v30 = vpop.permute.xlu1 %2400 }
 0x694   : > { %v2508_v36 = vpop.permute.xlu2 %2507  ;;  %v2408_v4 = vsel %vm923_vm10, %v2393_v63, %v2401_v30  ;;  %v2412_v20 = vsel %vm923_vm10, %v2401_v30, %v2393_v63  ;;  %vm5202_vm10 = vmmov %vm5199_vm6 }
 0x695   : > { %v2416_v38 = vmul.f32 %v2408_v4, %v5197_v13  ;;  %v2417_v42 = vmul.f32 %v2412_v20, %v5198_v10 }
 0x696   : > { %v2500_v28 = vpop.permute.xlu0 %2499 }
 0x697   : > { %3249 = vmatmul.msk.bf16.gmra.mxu1 %vm1425_vm15, %v3378_v61  ;;  %3251 = vmatmul.msk.bf16.gmra.mxu2 %vm1425_vm15, %v3378_v61  ;;  %v2429_v2 = vpack.c.bf16 %v2418_v62, %v2416_v38  ;;  %v2430_v33 = vpack.c.bf16 %v2419_v40, %v2417_v42  ;;  %v2513_v11 = vsel %vm5199_vm6, %v2500_v28, %v2508_v36  ;;  %vm5218_vm6 = vmmov %vm5207_vm0 }
 0x698   : > { %v2517_v14 = vsel %vm5200_vm7, %v2508_v36, %v2500_v28  ;;  %v2523_v49 = vmul.f32 %v2513_v11, %v5203_v56  ;;  %v3383_v36 = vld [vmem:[%s5121_s6 + $0x60] sm:$0xff]  ;;  %v3550_v11 = vld [vmem:[%s3740_s21 + $0x8] sm:$0xff]  ;;  %vm5219_vm7 = vcmp.lt.s32.totalorder %v3852_v57, 111 }
 0x699   : > { %2456 = vmatpush.bf16.msrb.mxu1 %v2429_v2  ;;  %2475 = vmatpush.bf16.msrb.mxu2 %v2430_v33  ;;  %v2524_v15 = vmul.f32 %v2517_v14, %v5204_v39  ;;  %v3548_v33 = vld [vmem:[%s3740_s21] sm:$0xff]  ;;  %v3551_v14 = vld [vmem:[%s3740_s21 + $0x18] sm:$0xff] }
 0x69a   : > { %v3387_v57 = vld [vmem:[%s5121_s6 + $0x80] sm:$0xff] }
 0x69b   : > { %v2502_v54 = vpop.permute.xlu1 %2501 }
 0x69c   : > { %v2605_v0 = vpop.permute.xlu2 %2604  ;;  %3264 = vmatmul.msk.bf16.vlgmr.msrb.gmra.mxu3 %vm1425_vm15, %v3379_v23  ;;  %3266 = vmatmul.msk.bf16.vlgmr.msrb.gmra.mxu0 %vm1425_vm15, %v3379_v23  ;;  %v3549_v23 = vld [vmem:[%s3740_s21 + $0x10] sm:$0xff] }
 0x69e   : > { %v2510_v25 = vpop.permute.xlu0 %2509 }
 0x69f   : > { %v2514_v26 = vsel %vm5201_vm9, %v2502_v54, %v2510_v25  ;;  %v2518_v7 = vsel %vm5202_vm10, %v2510_v25, %v2502_v54  ;;  %v2833_v54 = vpack.c.bf16 %v3551_v14, %v3550_v11  ;;  %vm5220_vm9 = vmmov %vm5219_vm7 }
 0x6a0   : > { %v2525_v41 = vmul.f32 %v2514_v26, %v5203_v56  ;;  %v2526_v16 = vmul.f32 %v2518_v7, %v5204_v39  ;;  %v3385_v7 = vld [vmem:[%s5121_s6 + $0x70] sm:$0xff]  ;;  %vm5221_vm10 = vmmov %vm5219_vm7 }
 0x6a2   : > { %v2534_v31 = vpack.c.bf16 %v2525_v41, %v2523_v49  ;;  %v2535_v9 = vpack.c.bf16 %v2526_v16, %v2524_v15  ;;  %v3634_v15 = vmov 6   ;;  %v3552_v41 = vld [vmem:[%s5117_s2] sm:$0xff]  ;;  %v3553_v16 = vld [vmem:[%s5117_s2 + $0x8] sm:$0xff] }
 0x6a3   : > { %3464 = vset.pattern.permute.xlu0 %v3634_v15  ;;  %3465 = vset.pattern.permute.xlu1 %v3634_v15 }
 0x6a4   : > { %2558 = vmatpush.bf16.msra.mxu3 %v2534_v31  ;;  %2577 = vmatpush.bf16.msra.mxu0 %v2535_v9  ;;  %v2496_v29 = vpop.permute.xlu2 %2495  ;;  %v2603_v21 = vpop.permute.xlu1 %2602  ;;  %v3384_v31 = vld [vmem:[%s5121_s6 + $0x68] sm:$0xff]  ;;  %v3554_v9 = vld [vmem:[%s5117_s2 + $0x10] sm:$0xff] }
 0x6a5   : > { %2805 = vperm.xlu0 %3464, %v3552_v41   ;;  %2809 = vperm.xlu1 %3465, %v3553_v16  }
 0x6a6   : > { %v2611_v6 = vpop.permute.xlu0 %2610  ;;  %3466 = vset.pattern.permute.xlu2 %v3634_v15 }
 0x6a7   : > { %3280 = vmatmul.msk.bf16.vlgmr.msrb.gmra.mxu1 %vm1425_vm15, %v3381_v12  ;;  %3282 = vmatmul.msk.bf16.vlgmr.msrb.gmra.mxu2 %vm1425_vm15, %v3381_v12  ;;  %v2616_v51 = vsel %vm5205_vm11, %v2603_v21, %v2611_v6  ;;  %v2620_v22 = vsel %vm5206_vm13, %v2611_v6, %v2603_v21  ;;  %vm5222_vm11 = vmmov %vm5219_vm7 }
 0x6a8   : > { %v2626_v63 = vmul.f32 %v2616_v51, %v5209_v47  ;;  %v2627_v27 = vmul.f32 %v2620_v22, %v5210_v18  ;;  %2813 = vperm.xlu2 %3466, %v3554_v9   ;;  %v5224_v22 = vld [vmem:[#allocation15_spill] sm:$0xff]  ;;  %vm5225_vm13 = vmmov %vm5219_vm7 }
 0x6ac   : > { %v2506_v35 = vpop.permute.xlu2 %2505  ;;  %v2613_v60 = vpop.permute.xlu1 %2612  ;;  %3265 = vmatmul.msk.bf16.gmra.mxu3 %vm1425_vm15, %v3380_v43  ;;  %3267 = vmatmul.msk.bf16.gmra.mxu0 %vm1425_vm15, %v3380_v43 }
 0x6ad   : > { %v2617_v55 = vsel %vm5207_vm0, %v2605_v0, %v2613_v60  ;;  %v2621_v44 = vsel %vm5208_vm1, %v2613_v60, %v2605_v0  ;;  %v2832_v0 = vpack.c.bf16 %v3549_v23, %v3548_v33  ;;  %vm5226_vm0 = vmmov %vm5219_vm7 }
 0x6ae   : > { %v2498_v24 = vpop.permute.xlu0 %2497  ;;  %v2628_v58 = vmul.f32 %v2617_v55, %v5209_v47  ;;  %v2629_v50 = vmul.f32 %v2621_v44, %v5210_v18  ;;  %vm5227_vm1 = vmmov %vm5226_vm0 }
 0x6af   : > { %v2512_v8 = vsel %vm5211_vm2, %v2498_v24, %v2506_v35  ;;  %v2516_v34 = vsel %vm5212_vm3, %v2506_v35, %v2498_v24  ;;  %v5223_v35 = vld [vmem:[#allocation13_spill] sm:$0xff]  ;;  %vm5228_vm2 = vmmov %vm5226_vm0  ;;  %vm5229_vm3 = vcmask 130048  }
 0x6b0   : > { %v2637_v17 = vpack.c.bf16 %v2628_v58, %v2626_v63  ;;  %v2638_v45 = vpack.c.bf16 %v2629_v50, %v2627_v27  ;;  %v2521_v52 = vmul.f32 %v2512_v8, %v5203_v56  ;;  %v2522_v48 = vmul.f32 %v2516_v34, %v5204_v39  ;;  %v3555_v27 = vld [vmem:[%s5117_s2 + $0x18] sm:$0xff] }
 0x6b1   : > { %2817 = vperm.xlu1 %3465, %v3555_v27   ;;  %v3386_v58 = vld [vmem:[%s5121_s6 + $0x78] sm:$0xff] }
 0x6b2   : > { %2661 = vmatpush.bf16.msra.mxu1 %v2637_v17  ;;  %2680 = vmatpush.bf16.msra.mxu2 %v2638_v45 }
 0x6b4   : > { %v2607_v3 = vpop.permute.xlu2 %2606 }
 0x6b5   : > { %v2504_v19 = vpop.permute.xlu1 %2503 }
 0x6b6   : > { %v2599_v13 = vpop.permute.xlu0 %2598  ;;  %v2511_v59 = vsel %vm5213_vm4, %v2496_v29, %v2504_v19  ;;  %v2515_v10 = vsel %vm5214_vm5, %v2504_v19, %v2496_v29  ;;  %vm5230_vm4 = vmmov %vm5229_vm3 }
 0x6b7   : > { %3281 = vmatmul.msk.bf16.gmra.mxu1 %vm1425_vm15, %v3382_v37  ;;  %v2519_v53 = vmul.f32 %v2511_v59, %v5203_v56  ;;  %v2520_v32 = vmul.f32 %v2515_v10, %v5204_v39  ;;  %3283 = vmatmul.msk.bf16.gmra.mxu2 %vm1425_vm15, %v3382_v37  ;;  %v2614_v5 = vsel %vm5215_vm14, %v2599_v13, %v2607_v3  ;;  %v3635_v10 = vmov 7   ;;  %vm5231_vm5 = vmmov %vm5229_vm3 }
 0x6b8   : > { %v2618_v1 = vsel %vm5216_vm8, %v2607_v3, %v2599_v13  ;;  %v2622_v40 = vmul.f32 %v2614_v5, %v5209_v47  ;;  %3468 = vset.pattern.permute.xlu0 %v3635_v10  ;;  %3467 = vset.pattern.permute.xlu2 %v3635_v10  ;;  %vm5232_vm14 = vmmov %vm5229_vm3 }
 0x6b9   : > { %v2532_v46 = vpack.c.bf16 %v2521_v52, %v2519_v53  ;;  %v2533_v61 = vpack.c.bf16 %v2522_v48, %v2520_v32  ;;  %v2623_v38 = vmul.f32 %v2618_v1, %v5210_v18  ;;  %2839 = vperm.xlu0 %3468, %v3553_v16   ;;  %3469 = vset.pattern.permute.xlu1 %v3635_v10 }
 0x6ba   : > { %2843 = vperm.xlu1 %3469, %v3554_v9   ;;  %2835 = vperm.xlu2 %3467, %v3552_v41  }
 0x6bb   : > { %2559 = vmatpush.bf16.msra.mxu3 %v2532_v46  ;;  %2578 = vmatpush.bf16.msra.mxu0 %v2533_v61 }
 0x6bc   : > { %v2708_v30 = vpop.permute.xlu2 %2707 }
 0x6bd   : > { %v2601_v28 = vpop.permute.xlu1 %2600 }
 0x6be   : > { %v2609_v4 = vpop.permute.xlu0 %2608  ;;  %3296 = vmatmul.msk.bf16.vlgmr.msra.gmra.mxu3 %vm1425_vm15, %v3383_v36  ;;  %3298 = vmatmul.msk.bf16.vlgmr.msra.gmra.mxu0 %vm1425_vm15, %v3383_v36  ;;  %v3389_v36 = vld [vmem:[%s5122_s7] sm:$0xff] }
 0x6bf   : > { %v2615_v20 = vsel %vm5217_vm12, %v2601_v28, %v2609_v4  ;;  %v2619_v62 = vsel %vm5218_vm6, %v2609_v4, %v2601_v28 }
 0x6c0   : > { %v2624_v42 = vmul.f32 %v2615_v20, %v5209_v47  ;;  %v2625_v2 = vmul.f32 %v2619_v62, %v5210_v18  ;;  %v3388_v62 = vld [vmem:[%s5121_s6 + $0x88] sm:$0xff] }
 0x6c2   : > { %v2635_v25 = vpack.c.bf16 %v2624_v42, %v2622_v40  ;;  %v2636_v26 = vpack.c.bf16 %v2625_v2, %v2623_v38  ;;  %2847 = vperm.xlu2 %3467, %v3555_v27  }
 0x6c4   : > { %2662 = vmatpush.bf16.msra.mxu1 %v2635_v25  ;;  %2681 = vmatpush.bf16.msra.mxu2 %v2636_v26  ;;  %v2702_v49 = vpop.permute.xlu2 %2701 }
 0x6c5   : > { %v2706_v56 = vpop.permute.xlu1 %2705 }
 0x6c6   : > { %v2714_v39 = vpop.permute.xlu0 %2713 }
 0x6c7   : > { %3312 = vmatmul.msk.bf16.vlgmr.msra.gmra.mxu1 %vm1425_vm15, %v3385_v7  ;;  %3314 = vmatmul.msk.bf16.vlgmr.msra.gmra.mxu2 %vm1425_vm15, %v3385_v7  ;;  %v2719_v12 = vsel %vm5219_vm7, %v2706_v56, %v2714_v39  ;;  %v2723_v29 = vsel %vm5220_vm9, %v2714_v39, %v2706_v56 }
 0x6c8   : > { %2892 = vmatpush.bf16.msrb.mxu2 %v2833_v54  ;;  %2873 = vmatpush.bf16.msrb.mxu1 %v2832_v0  ;;  %v2729_v51 = vmul.f32 %v2719_v12, %v5223_v35  ;;  %v2730_v60 = vmul.f32 %v2723_v29, %v5224_v22  ;;  %v3390_v0 = vld [vmem:[%s5122_s7 + $0x8] sm:$0xff] }
 0x6cc   : > { %v2712_v44 = vpop.permute.xlu2 %2711 }
 0x6cd   : > { %v2716_v21 = vpop.permute.xlu1 %2715 }
 0x6ce   : > { %v2720_v6 = vsel %vm5221_vm10, %v2708_v30, %v2716_v21  ;;  %v2724_v43 = vsel %vm5222_vm11, %v2716_v21, %v2708_v30  ;;  %3297 = vmatmul.msk.bf16.gmra.mxu3 %vm1425_vm15, %v3384_v31  ;;  %3299 = vmatmul.msk.bf16.gmra.mxu0 %vm1425_vm15, %v3384_v31  ;;  %v2704_v47 = vpop.permute.xlu0 %2703 }
 0x6cf   : > { %v2731_v24 = vmul.f32 %v2720_v6, %v5223_v35  ;;  %v2732_v55 = vmul.f32 %v2724_v43, %v5224_v22  ;;  %v2718_v50 = vsel %vm5225_vm13, %v2704_v47, %v2712_v44  ;;  %v2722_v17 = vsel %vm5226_vm0, %v2712_v44, %v2704_v47 }
 0x6d0   : > { %v2727_v3 = vmul.f32 %v2718_v50, %v5223_v35  ;;  %v2728_v19 = vmul.f32 %v2722_v17, %v5224_v22 }
 0x6d1   : > { %v2740_v63 = vpack.c.bf16 %v2731_v24, %v2729_v51  ;;  %v2741_v18 = vpack.c.bf16 %v2732_v55, %v2730_v60 }
 0x6d2   : > { %v2051_v37 = vpop.f32.mrf.mxu0 }
 0x6d3   : > { %2764 = vmatpush.bf16.msrb.mxu3 %v2740_v63  ;;  %2783 = vmatpush.bf16.msrb.mxu0 %v2741_v18 }
 0x6d5   : > { %v2710_v45 = vpop.permute.xlu1 %2709 }
 0x6d6   : > { %v2717_v8 = vsel %vm5227_vm1, %v2702_v49, %v2710_v45  ;;  %v2721_v34 = vsel %vm5228_vm2, %v2710_v45, %v2702_v49 }
 0x6d7   : > { %3313 = vmatmul.msk.bf16.gmra.mxu1 %vm1425_vm15, %v3386_v58  ;;  %v2725_v13 = vmul.f32 %v2717_v8, %v5223_v35  ;;  %v2726_v59 = vmul.f32 %v2721_v34, %v5224_v22  ;;  %3315 = vmatmul.msk.bf16.gmra.mxu2 %vm1425_vm15, %v3386_v58  ;;  %v2032_v53 = vpop.f32.mrf.mxu3 }
 0x6d9   : > { %v2738_v52 = vpack.c.bf16 %v2727_v3, %v2725_v13  ;;  %v2739_v48 = vpack.c.bf16 %v2728_v19, %v2726_v59  ;;  %v2086_v32 = vpop.f32.mrf.mxu1 }
 0x6da   : > { %v2053_v46 = vpop.f32.mrf.mxu0  ;;  %v2087_v61 = vadd.f32 %v2086_v32, %v2032_v53 }
 0x6db   : > { %2765 = vmatpush.bf16.msrb.mxu3 %v2738_v52  ;;  %2784 = vmatpush.bf16.msrb.mxu0 %v2739_v48 }
 0x6de   : > { %3328 = vmatmul.msk.bf16.vlgmr.msrb.gmra.mxu3 %vm1425_vm15, %v3387_v57  ;;  %3330 = vmatmul.msk.bf16.vlgmr.msrb.gmra.mxu0 %vm1425_vm15, %v3387_v57 }
 0x6df   : > { %v2034_v5 = vpop.f32.mrf.mxu3 }
 0x6e0   : > { %v2105_v1 = vpop.f32.mrf.mxu2 }
 0x6e1   : > { %v2106_v30 = vadd.f32 %v2105_v1, %v2051_v37  ;;  %v2088_v28 = vpop.f32.mrf.mxu1 }
 0x6e2   : > { %v2089_v4 = vadd.f32 %v2088_v28, %v2034_v5  ;;  %v2056_v20 = vpop.f32.mrf.mxu0 }
 0x6e7   : > { %3340 = vmatmul.msk.bf16.vlgmr.msrb.gmra.mxu1 %vm5229_vm3, %v3389_v36  ;;  %3342 = vmatmul.msk.bf16.vlgmr.msrb.gmra.mxu2 %vm5230_vm4, %v3389_v36 }
 0x6e8   : > { %v2037_v40 = vpop.f32.mrf.mxu3  ;;  %v2107_v38 = vpop.f32.mrf.mxu2 }
 0x6e9   : > { %v2108_v42 = vadd.f32 %v2107_v38, %v2053_v46  ;;  %v2091_v2 = vpop.f32.mrf.mxu1 }
 0x6ea   : > { %v2092_v33 = vadd.f32 %v2091_v2, %v2037_v40  ;;  %v2058_v23 = vpop.f32.mrf.mxu0 }
 0x6ee   : > { %3329 = vmatmul.msk.bf16.gmra.mxu3 %vm1425_vm15, %v3388_v62  ;;  %3331 = vmatmul.msk.bf16.gmra.mxu0 %vm1425_vm15, %v3388_v62 }
 0x6f0   : > { %v2039_v11 = vpop.f32.mrf.mxu3  ;;  %v2110_v14 = vpop.f32.mrf.mxu2 }
 0x6f1   : > { %v2111_v54 = vadd.f32 %v2110_v14, %v2056_v20  ;;  %v2093_v25 = vpop.f32.mrf.mxu1 }
 0x6f2   : > { %v2094_v26 = vadd.f32 %v2093_v25, %v2039_v11 }
 0x6f7   : > { %3341 = vmatmul.msk.bf16.gmra.mxu1 %vm5231_vm5, %v3390_v0  ;;  %3343 = vmatmul.msk.bf16.gmra.mxu2 %vm5232_vm14, %v3390_v0 }
 0x6f8   : > { %v2112_v56 = vpop.f32.mrf.mxu2 }
 0x6f9   : > { %v2200_v7 = vpop.f32.mrf.mxu0  ;;  %v2113_v39 = vadd.f32 %v2112_v56, %v2058_v23 }
 0x6fa   : > { %v2211_v49 = vadd.f32 %v2200_v7, %v2106_v30 }
 0x6ff   : > { %v2181_v15 = vpop.f32.mrf.mxu3 }
 0x700   : > { %v2210_v41 = vadd.f32 %v2181_v15, %v2087_v61 }
 0x701   : > { %v2202_v16 = vpop.f32.mrf.mxu0 }
 0x702   : > { %v2213_v9 = vadd.f32 %v2202_v16, %v2108_v42 }
 0x704   : > { %v2284_v31 = vpop.f32.mrf.mxu1 }
 0x705   : > { %v2313_v12 = vadd.f32 %v2284_v31, %v2210_v41 }
 0x707   : > { %v2183_v29 = vpop.f32.mrf.mxu3 }
 0x708   : > { %v2212_v6 = vadd.f32 %v2183_v29, %v2089_v4 }
 0x709   : > { %v2205_v51 = vpop.f32.mrf.mxu0 }
 0x70a   : > { %v2303_v21 = vpop.f32.mrf.mxu2  ;;  %v2215_v60 = vadd.f32 %v2205_v51, %v2111_v54 }
 0x70b   : > { %v2314_v43 = vadd.f32 %v2303_v21, %v2211_v49 }
 0x70c   : > { %v2286_v35 = vpop.f32.mrf.mxu1 }
 0x70d   : > { %v2315_v22 = vadd.f32 %v2286_v35, %v2212_v6 }
 0x70f   : > { %v2186_v24 = vpop.f32.mrf.mxu3 }
 0x710   : > { %v2214_v44 = vadd.f32 %v2186_v24, %v2092_v33 }
 0x711   : > { %v2207_v18 = vpop.f32.mrf.mxu0 }
 0x712   : > { %v2305_v55 = vpop.f32.mrf.mxu2  ;;  %v2217_v58 = vadd.f32 %v2207_v18, %v2113_v39 }
 0x713   : > { %v5008_v47 = vadd.f32 %v2305_v55, %v2213_v9 }
 0x714   : > { %v2289_v63 = vpop.f32.mrf.mxu1 }
 0x715   : > { %v5010_v27 = vadd.f32 %v2289_v63, %v2214_v44 }
 0x717   : > { %v2188_v50 = vpop.f32.mrf.mxu3  ;;  %v2810_v41 = vpop.permute.xlu1 %2809 }
 0x718   : > { %v2216_v17 = vadd.f32 %v2188_v50, %v2094_v26  ;;  %v5034_v26 = vpop.permute.xlu2 %2813  ;;  %v2806_v21 = vpop.permute.xlu0 %2805 }
 0x719   : > { %v2374_v34 = vpop.f32.mrf.mxu0 }
 0x71a   : > { %v2308_v45 = vpop.f32.mrf.mxu2  ;;  %v2385_v9 = vadd.f32 %v2374_v34, %v2314_v43 }
 0x71b   : > { %v5012_v37 = vadd.f32 %v2308_v45, %v2215_v60 }
 0x71c   : > { %v2291_v3 = vpop.f32.mrf.mxu1 }
 0x71d   : > { %v5014_v8 = vadd.f32 %v2291_v3, %v2216_v17 }
 0x71f   : > { %v2355_v19 = vpop.f32.mrf.mxu3 }
 0x720   : > { %v2384_v25 = vadd.f32 %v2355_v19, %v2313_v12  ;;  %v2836_v35 = vpop.permute.xlu2 %2835 }
 0x721   : > { %v2376_v52 = vpop.f32.mrf.mxu0 }
 0x722   : > { %v2310_v13 = vpop.f32.mrf.mxu2  ;;  %v2387_v17 = vadd.f32 %v2376_v52, %v5008_v47 }
 0x723   : > { %v5016_v59 = vadd.f32 %v2310_v13, %v2217_v58  ;;  %v5049_v3 = vpop.permute.xlu1 %2817 }
 0x724   : > { %v2458_v10 = vpop.f32.mrf.mxu1 }
 0x725   : > { %v2487_v56 = vadd.f32 %v2458_v10, %v2384_v25 }
 0x727   : > { %v2357_v48 = vpop.f32.mrf.mxu3 }
 0x728   : > { %v2386_v16 = vadd.f32 %v2357_v48, %v2315_v22 }
 0x729   : > { %v5018_v32 = vpop.f32.mrf.mxu0 }
 0x72a   : > { %v2477_v57 = vpop.f32.mrf.mxu2 }
 0x72b   : > { %v2488_v6 = vadd.f32 %v2477_v57, %v2385_v9  ;;  %v2840_v48 = vpop.permute.xlu0 %2839 }
 0x72c   : > { %v2460_v53 = vpop.f32.mrf.mxu1 }
 0x72d   : > { %v2489_v51 = vadd.f32 %v2460_v53, %v2386_v16 }
 0x72f   : > { %v2360_v46 = vpop.f32.mrf.mxu3 }
 0x730   : > { %v2388_v43 = vadd.f32 %v2360_v46, %v5010_v27 }
 0x731   : > { %v5020_v5 = vpop.f32.mrf.mxu0 }
 0x732   : > { %v2479_v61 = vpop.f32.mrf.mxu2 }
 0x733   : > { %v2490_v13 = vadd.f32 %v2479_v61, %v2387_v17 }
 0x734   : > { %v2463_v36 = vpop.f32.mrf.mxu1 }
 0x735   : > { %v2491_v57 = vadd.f32 %v2463_v36, %v2388_v43  ;;  %v2389_v36 = vadd.f32 %v5018_v32, %v5012_v37 }
 0x737   : > { %v5022_v1 = vpop.f32.mrf.mxu3 }
 0x738   : > { %v2390_v25 = vadd.f32 %v5022_v1, %v5014_v8 }
 0x73a   : > { %v5024_v30 = vpop.f32.mrf.mxu2 }
 0x73b   : > { %v2580_v4 = vpop.f32.mrf.mxu0 }
 0x73c   : > { %v5026_v28 = vpop.f32.mrf.mxu1  ;;  %v2591_v55 = vadd.f32 %v2580_v4, %v2488_v6 }
 0x741   : > { %v2561_v20 = vpop.f32.mrf.mxu3 }
 0x742   : > { %v5028_v62 = vpop.f32.mrf.mxu2  ;;  %v2590_v15 = vadd.f32 %v2561_v20, %v2487_v56 }
 0x743   : > { %v2582_v38 = vpop.f32.mrf.mxu0 }
 0x744   : > { %v2664_v40 = vpop.f32.mrf.mxu1  ;;  %v2593_v27 = vadd.f32 %v2582_v38, %v2490_v13  ;;  %v2492_v38 = vadd.f32 %v5024_v30, %v2389_v36 }
 0x745   : > { %v2693_v29 = vadd.f32 %v2664_v40, %v2590_v15 }
 0x749   : > { %v2563_v42 = vpop.f32.mrf.mxu3 }
 0x74a   : > { %v2683_v2 = vpop.f32.mrf.mxu2  ;;  %v2592_v63 = vadd.f32 %v2563_v42, %v2489_v51 }
 0x74b   : > { %v5030_v23 = vpop.f32.mrf.mxu0  ;;  %v2694_v22 = vadd.f32 %v2683_v2, %v2591_v55 }
 0x74c   : > { %v2666_v33 = vpop.f32.mrf.mxu1  ;;  %v2595_v8 = vadd.f32 %v5030_v23, %v2492_v38 }
 0x74d   : > { %v2695_v34 = vadd.f32 %v2666_v33, %v2592_v63 }
 0x751   : > { %v2566_v0 = vpop.f32.mrf.mxu3 }
 0x752   : > { %v2685_v11 = vpop.f32.mrf.mxu2  ;;  %v2594_v20 = vadd.f32 %v2566_v0, %v2491_v57  ;;  %v2493_v0 = vadd.f32 %v5026_v28, %v2390_v25  ;;  %v2391_v28 = vadd.f32 %v5020_v5, %v5016_v59  ;;  %v2848_v59 = vpop.permute.xlu2 %2847 }
 0x753   : > { %v5032_v54 = vpop.f32.mrf.mxu0  ;;  %v2696_v2 = vadd.f32 %v2685_v11, %v2593_v27 }
 0x754   : > { %v2669_v14 = vpop.f32.mrf.mxu1 }
 0x755   : > { %v2697_v15 = vadd.f32 %v2669_v14, %v2594_v20 }
 0x759   : > { %v5036_v7 = vpop.f32.mrf.mxu3 }
 0x75a   : > { %v5038_v49 = vpop.f32.mrf.mxu2  ;;  %v2596_v32 = vadd.f32 %v5036_v7, %v2493_v0 }
 0x75b   : > { %v2786_v31 = vpop.f32.mrf.mxu0  ;;  %v2698_v30 = vadd.f32 %v5038_v49, %v2595_v8 }
 0x75c   : > { %v5040_v39 = vpop.f32.mrf.mxu1  ;;  %v2797_v45 = vadd.f32 %v2786_v31, %v2694_v22  ;;  %v2844_v31 = vpop.permute.xlu1 %2843 }
 0x75d   : > { %v2699_v23 = vadd.f32 %v5040_v39, %v2596_v32 }
 0x75e   : > { %v2821_v46 = vadd.f32 %v2806_v21, %v2797_v45 }
 0x761   : > { %v2767_v12 = vpop.f32.mrf.mxu3 }
 0x762   : > { %v5043_v60 = vpop.f32.mrf.mxu2  ;;  %v2796_v24 = vadd.f32 %v2767_v12, %v2693_v29 }
 0x763   : > { %v2788_v19 = vpop.f32.mrf.mxu0 }
 0x764   : > { %v2875_v44 = vpop.f32.mrf.mxu1  ;;  %v2820_v18 = vadd.f32 %v2806_v21, %v2796_v24  ;;  %v2799_v56 = vadd.f32 %v2788_v19, %v2696_v2 }
 0x765   : > { %v2876_v58 = vadd.f32 %v2875_v44, %v2836_v35 }
 0x766   : > { %v2823_v1 = vadd.f32 %v2810_v41, %v2799_v56 }
 0x767   : > { %v2904_v50 = vadd.f32 %v2876_v58, %v2820_v18 }
 0x769   : > { %2912 = vst [vmem:[%s5051_s25] sm:$0xff] %v2904_v50  ;;  %v2769_v10 = vpop.f32.mrf.mxu3 }
 0x76a   : > { %v2798_v53 = vadd.f32 %v2769_v10, %v2695_v34  ;;  %v2894_v4 = vpop.f32.mrf.mxu2 }
 0x76b   : > { %v2895_v47 = vadd.f32 %v2894_v4, %v2836_v35  ;;  %v2791_v11 = vpop.f32.mrf.mxu0 }
 0x76c   : > { %v2877_v52 = vpop.f32.mrf.mxu1  ;;  %v2822_v40 = vadd.f32 %v2810_v41, %v2798_v53  ;;  %v2801_v51 = vadd.f32 %v2791_v11, %v2698_v30  ;;  %v2494_v41 = vadd.f32 %v5028_v62, %v2391_v28 }
 0x76d   : > { %v2878_v42 = vadd.f32 %v2877_v52, %v2840_v48  ;;  %v2905_v33 = vadd.f32 %v2895_v47, %v2821_v46 }
 0x76e   : > { %v2597_v49 = vadd.f32 %v5032_v54, %v2494_v41  ;;  %v2825_v44 = vadd.f32 %v5034_v26, %v2801_v51 }
 0x76f   : > { %v2906_v61 = vadd.f32 %v2878_v42, %v2822_v40  ;;  %2913 = vst [vmem:[%s5051_s25 + $0x8] sm:$0xff] %v2905_v33 }
 0x770   : > { %v2700_v62 = vadd.f32 %v5043_v60, %v2597_v49 }
 0x771   : > { %2914 = vst [vmem:[%s5051_s25 + $0x10] sm:$0xff] %v2906_v61  ;;  %v2772_v16 = vpop.f32.mrf.mxu3 }
 0x772   : > { %v2800_v9 = vadd.f32 %v2772_v16, %v2697_v15  ;;  %v2896_v29 = vpop.f32.mrf.mxu2 }
 0x773   : > { %v2897_v21 = vadd.f32 %v2896_v29, %v2840_v48  ;;  %v2793_v18 = vpop.f32.mrf.mxu0 }
 0x774   : > { %v2880_v37 = vpop.f32.mrf.mxu1  ;;  %v2824_v14 = vadd.f32 %v5034_v26, %v2800_v9  ;;  %v2803_v50 = vadd.f32 %v2793_v18, %v2700_v62 }
 0x775   : > { %v2881_v6 = vadd.f32 %v2880_v37, %v2844_v31  ;;  %v2907_v12 = vadd.f32 %v2897_v21, %v2823_v1 }
 0x776   : > { %v2827_v26 = vadd.f32 %v5049_v3, %v2803_v50 }
 0x777   : > { %v2908_v35 = vadd.f32 %v2881_v6, %v2824_v14  ;;  %2915 = vst [vmem:[%s5051_s25 + $0x18] sm:$0xff] %v2907_v12 }
 0x779   : > { %2916 = vst [vmem:[%s5051_s25 + $0x20] sm:$0xff] %v2908_v35  ;;  %v2774_v24 = vpop.f32.mrf.mxu3 }
 0x77a   : > { %v2802_v7 = vadd.f32 %v2774_v24, %v2699_v23  ;;  %v2899_v55 = vpop.f32.mrf.mxu2 }
 0x77b   : > { %v2900_v63 = vadd.f32 %v2899_v55, %v2844_v31 }
 0x77c   : > { %v2882_v5 = vpop.f32.mrf.mxu1  ;;  %v2826_v58 = vadd.f32 %v5049_v3, %v2802_v7 }
 0x77d   : > { %v2883_v39 = vadd.f32 %v2882_v5, %v2848_v59  ;;  %v2909_v22 = vadd.f32 %v2900_v63, %v2825_v44 }
 0x77f   : > { %v2910_v43 = vadd.f32 %v2883_v39, %v2826_v58  ;;  %2917 = vst [vmem:[%s5051_s25 + $0x28] sm:$0xff] %v2909_v22 }
 0x781   : > { %2918 = vst [vmem:[%s5051_s25 + $0x30] sm:$0xff] %v2910_v43 }
 0x782   : > { %v2901_v54 = vpop.f32.mrf.mxu2 }
 0x783   : > { %v2902_v17 = vadd.f32 %v2901_v54, %v2848_v59 }
 0x785   : > { %v2911_v45 = vadd.f32 %v2902_v17, %v2827_v26 }
 0x787   : > { %2919 = vst [vmem:[%s5051_s25 + $0x38] sm:$0xff] %v2911_v45 }
 0x788   : > { %3583 = shalt.err (!%p3580_p3)
}
 0x789   : > { %s3636_s22 = smov 256  }
 0x78a   : > { %3393 = dma.vmem_to_hbm [thread:$0]  (%p3720_p5), %s2934_s19, 1024, %s2936_s26, %s2921_s9, %s3636_s22, %s3636_s22, %s3624_s12  }
 0x78b PF: > { %p3399_p4 = scmp.ge.s32.totalorder %s3618_s30, 2  ;;  %s2950_s25 = sand.u32 1, %s3606_s27  }
 0x78c   : > { %s2951_s10 = scalar_lea.sflag [#allocation3], %s2950_s25 }
 0x78d   : > { %p3396_p7 = pnand %p3399_p4, %p3724_p6 }
 0x78f   : > { %p3397_p8 = pneg %p3396_p7 }
 0x791   : > { %3601 = dma.done.wait (%p3397_p8), %s2951_s10, 1024  }
 0x792   : > { %3603 = vsyncadd (%p3397_p8), %s2951_s10, 4294966272  ;;  %p18_p9 = scmp.ge.s32.totalorder %s3707_s11, 4   ;;  %s5233_s27 = smov %s3610_s28 }
 0x793   : > { %s5234_s28 = smov %s3614_s29  ;;  %s5235_s29 = smov %s3718_s14 }
 0x794   : > { %s5236_s30 = smov %s3707_s11  ;;  %20 = sbr.rel (!%p18_p9) target bundleno = 3 (0x3), region = 113 }
 0x799   :  { %2957 = vsyncpa [#allocation3], 1 }
 0x79a   :  { %2959 = vsyncpa [#allocation3 + $0x1], 1 }

</bundles_post_ra>
